<compile_context>
chip_gen: v7x
topology: tpu7x:2x2x1
jax: 0.10.0
libtpu: 0.0.40
codegen_flags: <defaults>
</compile_context>

<pallas_src>
import functools

import jax
import jax.numpy as jnp
import numpy as np
from jax import lax
from jax.experimental import pallas as pl
from jax.experimental.pallas import tpu as pltpu


# ----------------------------------------------------------------------------
# helpers
# ----------------------------------------------------------------------------
def _round_up(x, m):
    return (x + m - 1) // m * m


def _pick_tile(dim, max_tile, multiple):
    """Largest divisor of `dim` that is a multiple of `multiple` and <= max_tile."""
    best = multiple
    cand = multiple
    limit = min(dim, max_tile)
    while cand <= limit:
        if dim % cand == 0:
            best = cand
        cand += multiple
    return best


def _pad_gates(w_t, in_dim, in_dim_p, h, h_p):
    """(in_dim, 4h) -> (in_dim_p, 4h_p), each PyTorch gate block re-based at k*h_p."""
    out = jnp.zeros((in_dim_p, 4 * h_p), w_t.dtype)
    for k in range(4):
        out = out.at[:in_dim, k * h_p:k * h_p + h].set(w_t[:, k * h:(k + 1) * h])
    return out


def _pad_gate_bias(b, h, h_p):
    """(4h,) -> (1, 4h_p) with per-gate re-basing."""
    out = jnp.zeros((1, 4 * h_p), jnp.float32)
    for k in range(4):
        out = out.at[0, k * h_p:k * h_p + h].set(b[k * h:(k + 1) * h])
    return out


# ----------------------------------------------------------------------------
# Kernel 1: generic tiled matmul + bias (used for input and vocab projections)
#   A (M, K) bf16  x  B (K, N) bf16  + bias (1, N) f32  ->  (M, N) out_dtype
#   K is kept whole per block (K = padded E or H, small); M/N are tiled.
# ----------------------------------------------------------------------------
def _matmul_bias_kernel(a_ref, b_ref, bias_ref, o_ref):
    acc = jnp.dot(a_ref[...], b_ref[...], preferred_element_type=jnp.float32)
    o_ref[...] = (acc + bias_ref[...]).astype(o_ref.dtype)


def matmul_bias_pallas(a, b, bias, out_dtype, tm_max=256, tn_max=512):
    M, K = a.shape
    _, N = b.shape
    tm = _pick_tile(M, tm_max, 8)       # sublane multiple
    tn = _pick_tile(N, tn_max, 128)     # lane multiple -> lane-dense stores
    return pl.pallas_call(
        _matmul_bias_kernel,
        out_shape=jax.ShapeDtypeStruct((M, N), out_dtype),
        grid_spec=pltpu.PrefetchScalarGridSpec(
            num_scalar_prefetch=0,
            grid=(M // tm, N // tn),
            in_specs=[
                pl.BlockSpec((tm, K), lambda i, j: (i, 0)),
                pl.BlockSpec((K, tn), lambda i, j: (0, j)),
                pl.BlockSpec((1, tn), lambda i, j: (0, j)),
            ],
            out_specs=pl.BlockSpec((tm, tn), lambda i, j: (i, j)),
        ),
        compiler_params=pltpu.CompilerParams(
            dimension_semantics=("parallel", "parallel")),
    )(a, b, bias)


# ----------------------------------------------------------------------------
# Kernel 2: LSTM recurrence only (h @ W_hh^T + precomputed gates_x[t]).
#   gates_x : (Tp, B5p, 4Hp) bf16  (bias already folded in)
#   w_hh_t  : (Hp, 4Hp)      bf16
#   h_out   : (B5p, Tp, Hp)  bf16  -- written batch-first directly
#   Grid (batch_tiles [parallel], time_tiles [arbitrary]); TT steps unrolled
#   per grid iteration; h/c carried across time tiles in f32 VMEM scratch.
# ----------------------------------------------------------------------------
def _lstm_recurrent_kernel(gx_ref, whh_ref, h_out_ref, h_scr, c_scr, *, hidden, tt):
    @pl.when(pl.program_id(1) == 0)
    def _():
        h_scr[...] = jnp.zeros_like(h_scr)
        c_scr[...] = jnp.zeros_like(c_scr)

    H = hidden
    h = h_scr[...]
    c = c_scr[...]
    for i in range(tt):                                   # fully unrolled (tt = 8)
        rec = jnp.dot(h.astype(jnp.bfloat16), whh_ref[...],
                      preferred_element_type=jnp.float32)
        gates = gx_ref[i].astype(jnp.float32) + rec       # (bb, 4Hp), f32
        # PyTorch gate order [i, f, g, o]; Hp multiple of 128 -> lane-aligned slices
        i_g = jax.nn.sigmoid(gates[:, 0 * H:1 * H])
        f_g = jax.nn.sigmoid(gates[:, 1 * H:2 * H])
        g_g = jnp.tanh(gates[:, 2 * H:3 * H])
        o_g = jax.nn.sigmoid(gates[:, 3 * H:4 * H])
        c = f_g * c + i_g * g_g
        h = o_g * jnp.tanh(c)
        h_out_ref[:, i, :] = h.astype(h_out_ref.dtype)    # batch-first layout
    h_scr[...] = h
    c_scr[...] = c


def lstm_recurrence_pallas(gates_x_tm, w_hh_t_p, hidden_p, tt):
    Tp, B5p, H4p = gates_x_tm.shape
    Hp = hidden_p
    nt = Tp // tt
    if B5p <= 8:
        bb = B5p
    else:
        bb = _pick_tile(B5p, max(8, B5p // 2), 8)   # >=2 batch tiles for v7x megacore
    nb = B5p // bb

    kernel = functools.partial(_lstm_recurrent_kernel, hidden=Hp, tt=tt)
    # NOTE: at very large H, consider pipeline_mode=pl.Buffered(1) on the
    # (invariant) W_hh spec and an explicit vmem_limit_bytes to cut VMEM.
    return pl.pallas_call(
        kernel,
        out_shape=jax.ShapeDtypeStruct((B5p, Tp, Hp), jnp.bfloat16),
        grid_spec=pltpu.PrefetchScalarGridSpec(
            num_scalar_prefetch=0,
            grid=(nb, nt),
            in_specs=[
                pl.BlockSpec((tt, bb, 4 * Hp), lambda b, t: (t, b, 0)),  # gates_x
                pl.BlockSpec((Hp, 4 * Hp), lambda b, t: (0, 0)),         # W_hh^T
            ],
            out_specs=pl.BlockSpec((bb, tt, Hp), lambda b, t: (b, t, 0)),
            scratch_shapes=[
                pltpu.VMEM((bb, Hp), jnp.float32),   # h state (f32)
                pltpu.VMEM((bb, Hp), jnp.float32),   # c state (f32)
            ],
        ),
        compiler_params=pltpu.CompilerParams(
            dimension_semantics=("parallel", "arbitrary")),
    )(gates_x_tm, w_hh_t_p)


# ----------------------------------------------------------------------------
# Decoder forward: glue (repeat / embed / concat / pad) in JAX, GEMMs and the
# recurrence in the Pallas kernels above.
# ----------------------------------------------------------------------------
def decoder_forward(params, image_features, image_captions, lengths=None,
                    phase="Train"):
    del lengths  # unused, as in the reference forward
    if phase == "Train":
        image_features = jnp.repeat(image_features, 5, axis=0)        # (5B, E)

    B5, E = image_features.shape
    T = image_captions.shape[1]
    H = params["w_hh_t"].shape[0]
    V = params["w_out_t"].shape[1]

    # Build LSTM input directly in time-major layout (T, 5B, E) -- no transpose
    # of a materialized batch-first activation tensor.
    emb_tm = jnp.take(params["embed"], image_captions.T, axis=0)      # (T, 5B, E)
    x_tm = jnp.concatenate([image_features[None], emb_tm[:-1]], axis=0)

    # Pad to hardware tiles: batch -> x8, E/H/V -> x128, T -> x TT.
    TT = 8
    B5p = _round_up(B5, 8)
    Ep = _round_up(E, 128)
    Hp = _round_up(H, 128)
    Vp = _round_up(V, 128)
    Tp = _round_up(T, TT)

    x_p = jnp.zeros((Tp, B5p, Ep), jnp.bfloat16)
    x_p = x_p.at[:T, :B5, :E].set(x_tm.astype(jnp.bfloat16))

    w_ih_t_p = _pad_gates(params["w_ih_t"], E, Ep, H, Hp).astype(jnp.bfloat16)
    w_hh_t_p = _pad_gates(params["w_hh_t"], H, Hp, H, Hp).astype(jnp.bfloat16)
    bias_p = _pad_gate_bias(params["bias"], H, Hp)                    # (1, 4Hp) f32
    w_out_t_p = jnp.zeros((Hp, Vp), jnp.bfloat16)
    w_out_t_p = w_out_t_p.at[:H, :V].set(params["w_out_t"].astype(jnp.bfloat16))
    b_out_p = jnp.zeros((1, Vp), jnp.float32).at[0, :V].set(params["b_out"])

    # 1) input projection, hoisted out of the recurrence (one big GEMM).
    gates_x = matmul_bias_pallas(x_p.reshape(Tp * B5p, Ep), w_ih_t_p, bias_p,
                                 out_dtype=jnp.bfloat16)              # (Tp*B5p, 4Hp)
    gates_x = gates_x.reshape(Tp, B5p, 4 * Hp)

    # 2) recurrence: only h @ W_hh^T inside the time loop; batch-first h out.
    h_bf = lstm_recurrence_pallas(gates_x, w_hh_t_p, Hp, TT)          # (B5p, Tp, Hp)

    # 3) vocab projection as one GEMM; output already batch-first.
    logits_p = matmul_bias_pallas(h_bf.reshape(B5p * Tp, Hp), w_out_t_p, b_out_p,
                                  out_dtype=jnp.float32)              # (B5p*Tp, Vp)
    logits_p = logits_p.reshape(B5p, Tp, Vp)
    return logits_p[:B5, :T, :V]                                      # (5B, T, V)


# ----------------------------------------------------------------------------
# Pure-JAX f32 reference (lax.scan LSTM) for verification
# ----------------------------------------------------------------------------
def decoder_forward_ref(params, image_features, image_captions, phase="Train"):
    if phase == "Train":
        image_features = jnp.repeat(image_features, 5, axis=0)
    feats = image_features[:, None, :]
    emb = jnp.take(params["embed"], image_captions, axis=0)
    x = jnp.concatenate([feats, emb[:, :-1]], axis=1)                 # (5B, T, E)
    H = params["w_hh_t"].shape[0]

    def step(carry, x_t):
        h, c = carry
        gates = x_t @ params["w_ih_t"] + h @ params["w_hh_t"] + params["bias"]
        i_g = jax.nn.sigmoid(gates[:, 0 * H:1 * H])
        f_g = jax.nn.sigmoid(gates[:, 1 * H:2 * H])
        g_g = jnp.tanh(gates[:, 2 * H:3 * H])
        o_g = jax.nn.sigmoid(gates[:, 3 * H:4 * H])
        c_new = f_g * c + i_g * g_g
        h_new = o_g * jnp.tanh(c_new)
        return (h_new, c_new), h_new

    B5 = x.shape[0]
    h0 = jnp.zeros((B5, H), jnp.float32)
    c0 = jnp.zeros((B5, H), jnp.float32)
    _, hs = lax.scan(step, (h0, c0), jnp.transpose(x, (1, 0, 2)))     # (T, 5B, H)
    logits = hs @ params["w_out_t"] + params["b_out"]                 # (T, 5B, V)
    return jnp.transpose(logits, (1, 0, 2))


# ----------------------------------------------------------------------------
# Deterministic parameter init (synthetic stand-in for the nn.Module weights)
# ----------------------------------------------------------------------------
def init_params(key, embed_dim, hidden, vocab_size):
    ks = jax.random.split(key, 7)
    scale = 1.0 / np.sqrt(hidden)
    # PyTorch layouts: weight_ih (4H, E), weight_hh (4H, H); we store transposes.
    w_ih = jax.random.uniform(ks[0], (4 * hidden, embed_dim), jnp.float32, -scale, scale)
    w_hh = jax.random.uniform(ks[1], (4 * hidden, hidden), jnp.float32, -scale, scale)
    b_ih = jax.random.uniform(ks[2], (4 * hidden,), jnp.float32, -scale, scale)
    b_hh = jax.random.uniform(ks[3], (4 * hidden,), jnp.float32, -scale, scale)
    w_out = jax.random.uniform(ks[4], (vocab_size, hidden), jnp.float32, -scale, scale)
    b_out = jax.random.uniform(ks[5], (vocab_size,), jnp.float32, -scale, scale)
    embed = jax.random.normal(ks[6], (vocab_size, embed_dim), jnp.float32)
    return {
        "w_ih_t": w_ih.T,            # (E, 4H)
        "w_hh_t": w_hh.T,            # (H, 4H)
        "bias": b_ih + b_hh,         # (4H,)
        "w_out_t": w_out.T,          # (H, V)
        "b_out": b_out,              # (V,)
        "embed": embed,              # (V, E)
    }


if __name__ == "__main__":
    # Small synthetic sizes (VOCAB is empty in the source, so pick a synthetic vocab).
    B = 2              # images
    EMBED_DIM = 16
    HIDDEN = 32
    VOCAB_SIZE = 48
    T = 8              # caption length (5 captions per image in Train phase)

    key = jax.random.PRNGKey(0)
    k_feat, k_cap, k_param = jax.random.split(key, 3)

    params = init_params(k_param, EMBED_DIM, HIDDEN, VOCAB_SIZE)
    image_features = jax.random.normal(k_feat, (B, EMBED_DIM), jnp.float32)
    image_captions = jax.random.randint(k_cap, (5 * B, T), 0, VOCAB_SIZE, jnp.int32)
    lengths = jnp.full((5 * B,), T, jnp.int32)   # unused, as in reference

    fwd = jax.jit(lambda p, f, c, l: decoder_forward(p, f, c, l, phase="Train"))
    out = jax.block_until_ready(fwd(params, image_features, image_captions, lengths))

    ref = decoder_forward_ref(params, image_features, image_captions)
    # bf16 weights/activations with f32 accumulation (per perf review) => ~1e-2
    # level agreement with the pure-f32 reference.
    np.testing.assert_allclose(np.asarray(out), np.asarray(ref), rtol=3e-2, atol=3e-2)
    assert out.shape == (5 * B, T, VOCAB_SIZE)
    print("KERNEL_OK")
</pallas_src>

<mosaic_0001>
module attributes {stable_mosaic.version = 11 : i64} {
  func.func @_matmul_bias_kernel(%arg0: i32, %arg1: i32, %arg2: memref<128x128xbf16, #tpu.memory_space<vmem>>, %arg3: memref<128x512xbf16, #tpu.memory_space<vmem>>, %arg4: memref<1x512xf32, #tpu.memory_space<vmem>>, %arg5: memref<128x512xbf16, #tpu.memory_space<vmem>>) attributes {dimension_semantics = [#tpu.dimension_semantics<parallel>, #tpu.dimension_semantics<parallel>], iteration_bounds = array<i64: 1, 1>, scalar_prefetch = 0 : i64, scratch_operands = 0 : i64, tpu.core_type = #tpu.core_type<tc>, window_params = [{transform_indices = @transform_0, window_bounds = array<i64: 128, 128>}, {transform_indices = @transform_1, window_bounds = array<i64: 128, 512>}, {transform_indices = @transform_2, window_bounds = array<i64: 1, 512>}, {transform_indices = @transform_3, window_bounds = array<i64: 128, 512>}]} {
    %c0 = arith.constant 0 : index
    %c0_0 = arith.constant 0 : index
    %0 = vector.load %arg2[%c0, %c0_0] : memref<128x128xbf16, #tpu.memory_space<vmem>>, vector<128x128xbf16>
    %c0_1 = arith.constant 0 : index
    %c0_2 = arith.constant 0 : index
    %1 = vector.load %arg3[%c0_1, %c0_2] : memref<128x512xbf16, #tpu.memory_space<vmem>>, vector<128x512xbf16>
    %cst = arith.constant dense<0.000000e+00> : vector<128x512xf32>
    %2 = tpu.matmul %0, %1, %cst {dimension_numbers = #tpu.dot_dimension_numbers<[1], [0], [0], [1], [0, 0, 1, 1], [], []>} : vector<128x128xbf16>, vector<128x512xbf16>, vector<128x512xf32> -> vector<128x512xf32>
    %c0_3 = arith.constant 0 : index
    %c0_4 = arith.constant 0 : index
    %3 = vector.load %arg4[%c0_3, %c0_4] : memref<1x512xf32, #tpu.memory_space<vmem>>, vector<1x512xf32>
    %4 = vector.broadcast %3 : vector<1x512xf32> to vector<128x512xf32>
    %5 = arith.addf %2, %4 : vector<128x512xf32>
    %6 = arith.truncf %5 : vector<128x512xf32> to vector<128x512xbf16>
    %c0_5 = arith.constant 0 : index
    %c0_6 = arith.constant 0 : index
    %7 = vector.load %arg5[%c0_5, %c0_6] : memref<128x512xbf16, #tpu.memory_space<vmem>>, vector<128x512xbf16>
    tpu.vector_store %arg5[%c0_5, %c0_6], %6 {strides = array<i32>} : memref<128x512xbf16, #tpu.memory_space<vmem>>, vector<128x512xbf16>,
    return
  }
  func.func @transform_0(%arg0: i32, %arg1: i32) -> (i32, i32) {
    %c0_i32 = arith.constant 0 : i32
    %c0_i32_0 = arith.constant 0 : i32
    return %arg0, %c0_i32 : i32, i32
  }
  func.func @transform_1(%arg0: i32, %arg1: i32) -> (i32, i32) {
    %c0_i32 = arith.constant 0 : i32
    %c0_i32_0 = arith.constant 0 : i32
    return %c0_i32, %arg1 : i32, i32
  }
  func.func @transform_2(%arg0: i32, %arg1: i32) -> (i32, i32) {
    %c0_i32 = arith.constant 0 : i32
    %c0_i32_0 = arith.constant 0 : i32
    return %c0_i32, %arg1 : i32, i32
  }
  func.func @transform_3(%arg0: i32, %arg1: i32) -> (i32, i32) {
    %c0_i32 = arith.constant 0 : i32
    return %arg0, %arg1 : i32, i32
  }
}

module attributes {stable_mosaic.version = 11 : i64} {
  func.func @_lstm_recurrent_kernel(%arg0: i32, %arg1: i32, %arg2: memref<8x8x512xbf16, #tpu.memory_space<vmem>>, %arg3: memref<128x512xbf16, #tpu.memory_space<vmem>>, %arg4: memref<8x8x128xbf16, #tpu.memory_space<vmem>>, %arg5: memref<8x128xf32, #tpu.memory_space<vmem>>, %arg6: memref<8x128xf32, #tpu.memory_space<vmem>>) attributes {dimension_semantics = [#tpu.dimension_semantics<parallel>, #tpu.dimension_semantics<arbitrary>], iteration_bounds = array<i64: 2, 1>, scalar_prefetch = 0 : i64, scratch_operands = 2 : i64, tpu.core_type = #tpu.core_type<tc>, window_params = [{transform_indices = @transform_0, window_bounds = array<i64: 8, 8, 512>}, {pipeline_mode = #tpu.pipeline_mode<synchronous>, transform_indices = @transform_1, window_bounds = array<i64: 128, 512>}, {transform_indices = @transform_2, window_bounds = array<i64: 8, 8, 128>}]} {
    %c0_i32 = arith.constant 0 : i32
    %0 = arith.cmpi eq, %arg1, %c0_i32 : i32
    %1 = arith.extui %0 : i1 to i32
    %c0_i32_0 = arith.constant 0 : i32
    %2 = arith.cmpi ne, %1, %c0_i32_0 : i32
    scf.if %2 {
      %cst_96 = arith.constant 0.000000e+00 : f32
      %295 = vector.broadcast %cst_96 : f32 to vector<8x128xf32>
      %c0_97 = arith.constant 0 : index
      %c0_98 = arith.constant 0 : index
      %296 = vector.load %arg5[%c0_97, %c0_98] : memref<8x128xf32, #tpu.memory_space<vmem>>, vector<8x128xf32>
      tpu.vector_store %arg5[%c0_97, %c0_98], %295 {strides = array<i32>} : memref<8x128xf32, #tpu.memory_space<vmem>>, vector<8x128xf32>,
      %cst_99 = arith.constant 0.000000e+00 : f32
      %297 = vector.broadcast %cst_99 : f32 to vector<8x128xf32>
      %c0_100 = arith.constant 0 : index
      %c0_101 = arith.constant 0 : index
      %298 = vector.load %arg6[%c0_100, %c0_101] : memref<8x128xf32, #tpu.memory_space<vmem>>, vector<8x128xf32>
      tpu.vector_store %arg6[%c0_100, %c0_101], %297 {strides = array<i32>} : memref<8x128xf32, #tpu.memory_space<vmem>>, vector<8x128xf32>,
    } else {
    }
    %c0 = arith.constant 0 : index
    %c0_1 = arith.constant 0 : index
    %3 = vector.load %arg5[%c0, %c0_1] : memref<8x128xf32, #tpu.memory_space<vmem>>, vector<8x128xf32>
    %c0_2 = arith.constant 0 : index
    %c0_3 = arith.constant 0 : index
    %4 = vector.load %arg6[%c0_2, %c0_3] : memref<8x128xf32, #tpu.memory_space<vmem>>, vector<8x128xf32>
    %5 = arith.truncf %3 : vector<8x128xf32> to vector<8x128xbf16>
    %c0_4 = arith.constant 0 : index
    %c0_5 = arith.constant 0 : index
    %6 = vector.load %arg3[%c0_4, %c0_5] : memref<128x512xbf16, #tpu.memory_space<vmem>>, vector<128x512xbf16>
    %cst = arith.constant dense<0.000000e+00> : vector<8x512xf32>
    %7 = tpu.matmul %5, %6, %cst {dimension_numbers = #tpu.dot_dimension_numbers<[1], [0], [0], [1], [0, 0, 1, 1], [], []>} : vector<8x128xbf16>, vector<128x512xbf16>, vector<8x512xf32> -> vector<8x512xf32>
    %c0_6 = arith.constant 0 : index
    %c0_7 = arith.constant 0 : index
    %c0_8 = arith.constant 0 : index
    %8 = vector.load %arg2[%c0_6, %c0_7, %c0_8] : memref<8x8x512xbf16, #tpu.memory_space<vmem>>, vector<1x8x512xbf16>
    %9 = vector.shape_cast %8 : vector<1x8x512xbf16> to vector<8x512xbf16>
    %10 = arith.extf %9 : vector<8x512xbf16> to vector<8x512xf32>
    %11 = arith.addf %10, %7 : vector<8x512xf32>
    %12 = vector.extract_strided_slice %11 {offsets = [0, 0], sizes = [8, 128], strides = [1, 1]} : vector<8x512xf32> to vector<8x128xf32>
    %13 = arith.negf %12 : vector<8x128xf32>
    %14 = math.exp %13 : vector<8x128xf32>
    %cst_9 = arith.constant 1.000000e+00 : f32
    %15 = vector.broadcast %cst_9 : f32 to vector<8x128xf32>
    %16 = arith.addf %15, %14 : vector<8x128xf32>
    %17 = arith.divf %15, %16 : vector<8x128xf32>
    %18 = vector.extract_strided_slice %11 {offsets = [0, 128], sizes = [8, 128], strides = [1, 1]} : vector<8x512xf32> to vector<8x128xf32>
    %19 = arith.negf %18 : vector<8x128xf32>
    %20 = math.exp %19 : vector<8x128xf32>
    %cst_10 = arith.constant 1.000000e+00 : f32
    %21 = vector.broadcast %cst_10 : f32 to vector<8x128xf32>
    %22 = arith.addf %21, %20 : vector<8x128xf32>
    %23 = arith.divf %21, %22 : vector<8x128xf32>
    %24 = vector.extract_strided_slice %11 {offsets = [0, 256], sizes = [8, 128], strides = [1, 1]} : vector<8x512xf32> to vector<8x128xf32>
    %25 = math.tanh %24 : vector<8x128xf32>
    %26 = vector.extract_strided_slice %11 {offsets = [0, 384], sizes = [8, 128], strides = [1, 1]} : vector<8x512xf32> to vector<8x128xf32>
    %27 = arith.negf %26 : vector<8x128xf32>
    %28 = math.exp %27 : vector<8x128xf32>
    %cst_11 = arith.constant 1.000000e+00 : f32
    %29 = vector.broadcast %cst_11 : f32 to vector<8x128xf32>
    %30 = arith.addf %29, %28 : vector<8x128xf32>
    %31 = arith.divf %29, %30 : vector<8x128xf32>
    %32 = arith.mulf %23, %4 : vector<8x128xf32>
    %33 = arith.mulf %17, %25 : vector<8x128xf32>
    %34 = arith.addf %32, %33 : vector<8x128xf32>
    %35 = math.tanh %34 : vector<8x128xf32>
    %36 = arith.mulf %31, %35 : vector<8x128xf32>
    %37 = arith.truncf %36 : vector<8x128xf32> to vector<8x128xbf16>
    %c0_12 = arith.constant 0 : index
    %c0_13 = arith.constant 0 : index
    %c0_14 = arith.constant 0 : index
    %38 = vector.load %arg4[%c0_12, %c0_13, %c0_14] : memref<8x8x128xbf16, #tpu.memory_space<vmem>>, vector<8x1x128xbf16>
    %39 = vector.shape_cast %38 : vector<8x1x128xbf16> to vector<8x128xbf16>
    %40 = vector.shape_cast %37 : vector<8x128xbf16> to vector<8x1x128xbf16>
    tpu.vector_store %arg4[%c0_12, %c0_13, %c0_14], %40 {strides = array<i32>} : memref<8x8x128xbf16, #tpu.memory_space<vmem>>, vector<8x1x128xbf16>,
    %41 = arith.truncf %36 : vector<8x128xf32> to vector<8x128xbf16>
    %c0_15 = arith.constant 0 : index
    %c0_16 = arith.constant 0 : index
    %42 = vector.load %arg3[%c0_15, %c0_16] : memref<128x512xbf16, #tpu.memory_space<vmem>>, vector<128x512xbf16>
    %cst_17 = arith.constant dense<0.000000e+00> : vector<8x512xf32>
    %43 = tpu.matmul %41, %42, %cst_17 {dimension_numbers = #tpu.dot_dimension_numbers<[1], [0], [0], [1], [0, 0, 1, 1], [], []>} : vector<8x128xbf16>, vector<128x512xbf16>, vector<8x512xf32> -> vector<8x512xf32>
    %c1 = arith.constant 1 : index
    %c0_18 = arith.constant 0 : index
    %c0_19 = arith.constant 0 : index
    %44 = vector.load %arg2[%c1, %c0_18, %c0_19] : memref<8x8x512xbf16, #tpu.memory_space<vmem>>, vector<1x8x512xbf16>
    %45 = vector.shape_cast %44 : vector<1x8x512xbf16> to vector<8x512xbf16>
    %46 = arith.extf %45 : vector<8x512xbf16> to vector<8x512xf32>
    %47 = arith.addf %46, %43 : vector<8x512xf32>
    %48 = vector.extract_strided_slice %47 {offsets = [0, 0], sizes = [8, 128], strides = [1, 1]} : vector<8x512xf32> to vector<8x128xf32>
    %49 = arith.negf %48 : vector<8x128xf32>
    %50 = math.exp %49 : vector<8x128xf32>
    %cst_20 = arith.constant 1.000000e+00 : f32
    %51 = vector.broadcast %cst_20 : f32 to vector<8x128xf32>
    %52 = arith.addf %51, %50 : vector<8x128xf32>
    %53 = arith.divf %51, %52 : vector<8x128xf32>
    %54 = vector.extract_strided_slice %47 {offsets = [0, 128], sizes = [8, 128], strides = [1, 1]} : vector<8x512xf32> to vector<8x128xf32>
    %55 = arith.negf %54 : vector<8x128xf32>
    %56 = math.exp %55 : vector<8x128xf32>
    %cst_21 = arith.constant 1.000000e+00 : f32
    %57 = vector.broadcast %cst_21 : f32 to vector<8x128xf32>
    %58 = arith.addf %57, %56 : vector<8x128xf32>
    %59 = arith.divf %57, %58 : vector<8x128xf32>
    %60 = vector.extract_strided_slice %47 {offsets = [0, 256], sizes = [8, 128], strides = [1, 1]} : vector<8x512xf32> to vector<8x128xf32>
    %61 = math.tanh %60 : vector<8x128xf32>
    %62 = vector.extract_strided_slice %47 {offsets = [0, 384], sizes = [8, 128], strides = [1, 1]} : vector<8x512xf32> to vector<8x128xf32>
    %63 = arith.negf %62 : vector<8x128xf32>
    %64 = math.exp %63 : vector<8x128xf32>
    %cst_22 = arith.constant 1.000000e+00 : f32
    %65 = vector.broadcast %cst_22 : f32 to vector<8x128xf32>
    %66 = arith.addf %65, %64 : vector<8x128xf32>
    %67 = arith.divf %65, %66 : vector<8x128xf32>
    %68 = arith.mulf %59, %34 : vector<8x128xf32>
    %69 = arith.mulf %53, %61 : vector<8x128xf32>
    %70 = arith.addf %68, %69 : vector<8x128xf32>
    %71 = math.tanh %70 : vector<8x128xf32>
    %72 = arith.mulf %67, %71 : vector<8x128xf32>
    %73 = arith.truncf %72 : vector<8x128xf32> to vector<8x128xbf16>
    %c0_23 = arith.constant 0 : index
    %c1_24 = arith.constant 1 : index
    %c0_25 = arith.constant 0 : index
    %74 = vector.load %arg4[%c0_23, %c1_24, %c0_25] : memref<8x8x128xbf16, #tpu.memory_space<vmem>>, vector<8x1x128xbf16>
    %75 = vector.shape_cast %74 : vector<8x1x128xbf16> to vector<8x128xbf16>
    %76 = vector.shape_cast %73 : vector<8x128xbf16> to vector<8x1x128xbf16>
    tpu.vector_store %arg4[%c0_23, %c1_24, %c0_25], %76 {strides = array<i32>} : memref<8x8x128xbf16, #tpu.memory_space<vmem>>, vector<8x1x128xbf16>,
    %77 = arith.truncf %72 : vector<8x128xf32> to vector<8x128xbf16>
    %c0_26 = arith.constant 0 : index
    %c0_27 = arith.constant 0 : index
    %78 = vector.load %arg3[%c0_26, %c0_27] : memref<128x512xbf16, #tpu.memory_space<vmem>>, vector<128x512xbf16>
    %cst_28 = arith.constant dense<0.000000e+00> : vector<8x512xf32>
    %79 = tpu.matmul %77, %78, %cst_28 {dimension_numbers = #tpu.dot_dimension_numbers<[1], [0], [0], [1], [0, 0, 1, 1], [], []>} : vector<8x128xbf16>, vector<128x512xbf16>, vector<8x512xf32> -> vector<8x512xf32>
    %c2 = arith.constant 2 : index
    %c0_29 = arith.constant 0 : index
    %c0_30 = arith.constant 0 : index
    %80 = vector.load %arg2[%c2, %c0_29, %c0_30] : memref<8x8x512xbf16, #tpu.memory_space<vmem>>, vector<1x8x512xbf16>
    %81 = vector.shape_cast %80 : vector<1x8x512xbf16> to vector<8x512xbf16>
    %82 = arith.extf %81 : vector<8x512xbf16> to vector<8x512xf32>
    %83 = arith.addf %82, %79 : vector<8x512xf32>
    %84 = vector.extract_strided_slice %83 {offsets = [0, 0], sizes = [8, 128], strides = [1, 1]} : vector<8x512xf32> to vector<8x128xf32>
    %85 = arith.negf %84 : vector<8x128xf32>
    %86 = math.exp %85 : vector<8x128xf32>
    %cst_31 = arith.constant 1.000000e+00 : f32
    %87 = vector.broadcast %cst_31 : f32 to vector<8x128xf32>
    %88 = arith.addf %87, %86 : vector<8x128xf32>
    %89 = arith.divf %87, %88 : vector<8x128xf32>
    %90 = vector.extract_strided_slice %83 {offsets = [0, 128], sizes = [8, 128], strides = [1, 1]} : vector<8x512xf32> to vector<8x128xf32>
    %91 = arith.negf %90 : vector<8x128xf32>
    %92 = math.exp %91 : vector<8x128xf32>
    %cst_32 = arith.constant 1.000000e+00 : f32
    %93 = vector.broadcast %cst_32 : f32 to vector<8x128xf32>
    %94 = arith.addf %93, %92 : vector<8x128xf32>
    %95 = arith.divf %93, %94 : vector<8x128xf32>
    %96 = vector.extract_strided_slice %83 {offsets = [0, 256], sizes = [8, 128], strides = [1, 1]} : vector<8x512xf32> to vector<8x128xf32>
    %97 = math.tanh %96 : vector<8x128xf32>
    %98 = vector.extract_strided_slice %83 {offsets = [0, 384], sizes = [8, 128], strides = [1, 1]} : vector<8x512xf32> to vector<8x128xf32>
    %99 = arith.negf %98 : vector<8x128xf32>
    %100 = math.exp %99 : vector<8x128xf32>
    %cst_33 = arith.constant 1.000000e+00 : f32
    %101 = vector.broadcast %cst_33 : f32 to vector<8x128xf32>
    %102 = arith.addf %101, %100 : vector<8x128xf32>
    %103 = arith.divf %101, %102 : vector<8x128xf32>
    %104 = arith.mulf %95, %70 : vector<8x128xf32>
    %105 = arith.mulf %89, %97 : vector<8x128xf32>
    %106 = arith.addf %104, %105 : vector<8x128xf32>
    %107 = math.tanh %106 : vector<8x128xf32>
    %108 = arith.mulf %103, %107 : vector<8x128xf32>
    %109 = arith.truncf %108 : vector<8x128xf32> to vector<8x128xbf16>
    %c0_34 = arith.constant 0 : index
    %c2_35 = arith.constant 2 : index
    %c0_36 = arith.constant 0 : index
    %110 = vector.load %arg4[%c0_34, %c2_35, %c0_36] : memref<8x8x128xbf16, #tpu.memory_space<vmem>>, vector<8x1x128xbf16>
    %111 = vector.shape_cast %110 : vector<8x1x128xbf16> to vector<8x128xbf16>
    %112 = vector.shape_cast %109 : vector<8x128xbf16> to vector<8x1x128xbf16>
    tpu.vector_store %arg4[%c0_34, %c2_35, %c0_36], %112 {strides = array<i32>} : memref<8x8x128xbf16, #tpu.memory_space<vmem>>, vector<8x1x128xbf16>,
    %113 = arith.truncf %108 : vector<8x128xf32> to vector<8x128xbf16>
    %c0_37 = arith.constant 0 : index
    %c0_38 = arith.constant 0 : index
    %114 = vector.load %arg3[%c0_37, %c0_38] : memref<128x512xbf16, #tpu.memory_space<vmem>>, vector<128x512xbf16>
    %cst_39 = arith.constant dense<0.000000e+00> : vector<8x512xf32>
    %115 = tpu.matmul %113, %114, %cst_39 {dimension_numbers = #tpu.dot_dimension_numbers<[1], [0], [0], [1], [0, 0, 1, 1], [], []>} : vector<8x128xbf16>, vector<128x512xbf16>, vector<8x512xf32> -> vector<8x512xf32>
    %c3 = arith.constant 3 : index
    %c0_40 = arith.constant 0 : index
    %c0_41 = arith.constant 0 : index
    %116 = vector.load %arg2[%c3, %c0_40, %c0_41] : memref<8x8x512xbf16, #tpu.memory_space<vmem>>, vector<1x8x512xbf16>
    %117 = vector.shape_cast %116 : vector<1x8x512xbf16> to vector<8x512xbf16>
    %118 = arith.extf %117 : vector<8x512xbf16> to vector<8x512xf32>
    %119 = arith.addf %118, %115 : vector<8x512xf32>
    %120 = vector.extract_strided_slice %119 {offsets = [0, 0], sizes = [8, 128], strides = [1, 1]} : vector<8x512xf32> to vector<8x128xf32>
    %121 = arith.negf %120 : vector<8x128xf32>
    %122 = math.exp %121 : vector<8x128xf32>
    %cst_42 = arith.constant 1.000000e+00 : f32
    %123 = vector.broadcast %cst_42 : f32 to vector<8x128xf32>
    %124 = arith.addf %123, %122 : vector<8x128xf32>
    %125 = arith.divf %123, %124 : vector<8x128xf32>
    %126 = vector.extract_strided_slice %119 {offsets = [0, 128], sizes = [8, 128], strides = [1, 1]} : vector<8x512xf32> to vector<8x128xf32>
    %127 = arith.negf %126 : vector<8x128xf32>
    %128 = math.exp %127 : vector<8x128xf32>
    %cst_43 = arith.constant 1.000000e+00 : f32
    %129 = vector.broadcast %cst_43 : f32 to vector<8x128xf32>
    %130 = arith.addf %129, %128 : vector<8x128xf32>
    %131 = arith.divf %129, %130 : vector<8x128xf32>
    %132 = vector.extract_strided_slice %119 {offsets = [0, 256], sizes = [8, 128], strides = [1, 1]} : vector<8x512xf32> to vector<8x128xf32>
    %133 = math.tanh %132 : vector<8x128xf32>
    %134 = vector.extract_strided_slice %119 {offsets = [0, 384], sizes = [8, 128], strides = [1, 1]} : vector<8x512xf32> to vector<8x128xf32>
    %135 = arith.negf %134 : vector<8x128xf32>
    %136 = math.exp %135 : vector<8x128xf32>
    %cst_44 = arith.constant 1.000000e+00 : f32
    %137 = vector.broadcast %cst_44 : f32 to vector<8x128xf32>
    %138 = arith.addf %137, %136 : vector<8x128xf32>
    %139 = arith.divf %137, %138 : vector<8x128xf32>
    %140 = arith.mulf %131, %106 : vector<8x128xf32>
    %141 = arith.mulf %125, %133 : vector<8x128xf32>
    %142 = arith.addf %140, %141 : vector<8x128xf32>
    %143 = math.tanh %142 : vector<8x128xf32>
    %144 = arith.mulf %139, %143 : vector<8x128xf32>
    %145 = arith.truncf %144 : vector<8x128xf32> to vector<8x128xbf16>
    %c0_45 = arith.constant 0 : index
    %c3_46 = arith.constant 3 : index
    %c0_47 = arith.constant 0 : index
    %146 = vector.load %arg4[%c0_45, %c3_46, %c0_47] : memref<8x8x128xbf16, #tpu.memory_space<vmem>>, vector<8x1x128xbf16>
    %147 = vector.shape_cast %146 : vector<8x1x128xbf16> to vector<8x128xbf16>
    %148 = vector.shape_cast %145 : vector<8x128xbf16> to vector<8x1x128xbf16>
    tpu.vector_store %arg4[%c0_45, %c3_46, %c0_47], %148 {strides = array<i32>} : memref<8x8x128xbf16, #tpu.memory_space<vmem>>, vector<8x1x128xbf16>,
    %149 = arith.truncf %144 : vector<8x128xf32> to vector<8x128xbf16>
    %c0_48 = arith.constant 0 : index
    %c0_49 = arith.constant 0 : index
    %150 = vector.load %arg3[%c0_48, %c0_49] : memref<128x512xbf16, #tpu.memory_space<vmem>>, vector<128x512xbf16>
    %cst_50 = arith.constant dense<0.000000e+00> : vector<8x512xf32>
    %151 = tpu.matmul %149, %150, %cst_50 {dimension_numbers = #tpu.dot_dimension_numbers<[1], [0], [0], [1], [0, 0, 1, 1], [], []>} : vector<8x128xbf16>, vector<128x512xbf16>, vector<8x512xf32> -> vector<8x512xf32>
    %c4 = arith.constant 4 : index
    %c0_51 = arith.constant 0 : index
    %c0_52 = arith.constant 0 : index
    %152 = vector.load %arg2[%c4, %c0_51, %c0_52] : memref<8x8x512xbf16, #tpu.memory_space<vmem>>, vector<1x8x512xbf16>
    %153 = vector.shape_cast %152 : vector<1x8x512xbf16> to vector<8x512xbf16>
    %154 = arith.extf %153 : vector<8x512xbf16> to vector<8x512xf32>
    %155 = arith.addf %154, %151 : vector<8x512xf32>
    %156 = vector.extract_strided_slice %155 {offsets = [0, 0], sizes = [8, 128], strides = [1, 1]} : vector<8x512xf32> to vector<8x128xf32>
    %157 = arith.negf %156 : vector<8x128xf32>
    %158 = math.exp %157 : vector<8x128xf32>
    %cst_53 = arith.constant 1.000000e+00 : f32
    %159 = vector.broadcast %cst_53 : f32 to vector<8x128xf32>
    %160 = arith.addf %159, %158 : vector<8x128xf32>
    %161 = arith.divf %159, %160 : vector<8x128xf32>
    %162 = vector.extract_strided_slice %155 {offsets = [0, 128], sizes = [8, 128], strides = [1, 1]} : vector<8x512xf32> to vector<8x128xf32>
    %163 = arith.negf %162 : vector<8x128xf32>
    %164 = math.exp %163 : vector<8x128xf32>
    %cst_54 = arith.constant 1.000000e+00 : f32
    %165 = vector.broadcast %cst_54 : f32 to vector<8x128xf32>
    %166 = arith.addf %165, %164 : vector<8x128xf32>
    %167 = arith.divf %165, %166 : vector<8x128xf32>
    %168 = vector.extract_strided_slice %155 {offsets = [0, 256], sizes = [8, 128], strides = [1, 1]} : vector<8x512xf32> to vector<8x128xf32>
    %169 = math.tanh %168 : vector<8x128xf32>
    %170 = vector.extract_strided_slice %155 {offsets = [0, 384], sizes = [8, 128], strides = [1, 1]} : vector<8x512xf32> to vector<8x128xf32>
    %171 = arith.negf %170 : vector<8x128xf32>
    %172 = math.exp %171 : vector<8x128xf32>
    %cst_55 = arith.constant 1.000000e+00 : f32
    %173 = vector.broadcast %cst_55 : f32 to vector<8x128xf32>
    %174 = arith.addf %173, %172 : vector<8x128xf32>
    %175 = arith.divf %173, %174 : vector<8x128xf32>
    %176 = arith.mulf %167, %142 : vector<8x128xf32>
    %177 = arith.mulf %161, %169 : vector<8x128xf32>
    %178 = arith.addf %176, %177 : vector<8x128xf32>
    %179 = math.tanh %178 : vector<8x128xf32>
    %180 = arith.mulf %175, %179 : vector<8x128xf32>
    %181 = arith.truncf %180 : vector<8x128xf32> to vector<8x128xbf16>
    %c0_56 = arith.constant 0 : index
    %c4_57 = arith.constant 4 : index
    %c0_58 = arith.constant 0 : index
    %182 = vector.load %arg4[%c0_56, %c4_57, %c0_58] : memref<8x8x128xbf16, #tpu.memory_space<vmem>>, vector<8x1x128xbf16>
    %183 = vector.shape_cast %182 : vector<8x1x128xbf16> to vector<8x128xbf16>
    %184 = vector.shape_cast %181 : vector<8x128xbf16> to vector<8x1x128xbf16>
    tpu.vector_store %arg4[%c0_56, %c4_57, %c0_58], %184 {strides = array<i32>} : memref<8x8x128xbf16, #tpu.memory_space<vmem>>, vector<8x1x128xbf16>,
    %185 = arith.truncf %180 : vector<8x128xf32> to vector<8x128xbf16>
    %c0_59 = arith.constant 0 : index
    %c0_60 = arith.constant 0 : index
    %186 = vector.load %arg3[%c0_59, %c0_60] : memref<128x512xbf16, #tpu.memory_space<vmem>>, vector<128x512xbf16>
    %cst_61 = arith.constant dense<0.000000e+00> : vector<8x512xf32>
    %187 = tpu.matmul %185, %186, %cst_61 {dimension_numbers = #tpu.dot_dimension_numbers<[1], [0], [0], [1], [0, 0, 1, 1], [], []>} : vector<8x128xbf16>, vector<128x512xbf16>, vector<8x512xf32> -> vector<8x512xf32>
    %c5 = arith.constant 5 : index
    %c0_62 = arith.constant 0 : index
    %c0_63 = arith.constant 0 : index
    %188 = vector.load %arg2[%c5, %c0_62, %c0_63] : memref<8x8x512xbf16, #tpu.memory_space<vmem>>, vector<1x8x512xbf16>
    %189 = vector.shape_cast %188 : vector<1x8x512xbf16> to vector<8x512xbf16>
    %190 = arith.extf %189 : vector<8x512xbf16> to vector<8x512xf32>
    %191 = arith.addf %190, %187 : vector<8x512xf32>
    %192 = vector.extract_strided_slice %191 {offsets = [0, 0], sizes = [8, 128], strides = [1, 1]} : vector<8x512xf32> to vector<8x128xf32>
    %193 = arith.negf %192 : vector<8x128xf32>
    %194 = math.exp %193 : vector<8x128xf32>
    %cst_64 = arith.constant 1.000000e+00 : f32
    %195 = vector.broadcast %cst_64 : f32 to vector<8x128xf32>
    %196 = arith.addf %195, %194 : vector<8x128xf32>
    %197 = arith.divf %195, %196 : vector<8x128xf32>
    %198 = vector.extract_strided_slice %191 {offsets = [0, 128], sizes = [8, 128], strides = [1, 1]} : vector<8x512xf32> to vector<8x128xf32>
    %199 = arith.negf %198 : vector<8x128xf32>
    %200 = math.exp %199 : vector<8x128xf32>
    %cst_65 = arith.constant 1.000000e+00 : f32
    %201 = vector.broadcast %cst_65 : f32 to vector<8x128xf32>
    %202 = arith.addf %201, %200 : vector<8x128xf32>
    %203 = arith.divf %201, %202 : vector<8x128xf32>
    %204 = vector.extract_strided_slice %191 {offsets = [0, 256], sizes = [8, 128], strides = [1, 1]} : vector<8x512xf32> to vector<8x128xf32>
    %205 = math.tanh %204 : vector<8x128xf32>
    %206 = vector.extract_strided_slice %191 {offsets = [0, 384], sizes = [8, 128], strides = [1, 1]} : vector<8x512xf32> to vector<8x128xf32>
    %207 = arith.negf %206 : vector<8x128xf32>
    %208 = math.exp %207 : vector<8x128xf32>
    %cst_66 = arith.constant 1.000000e+00 : f32
    %209 = vector.broadcast %cst_66 : f32 to vector<8x128xf32>
    %210 = arith.addf %209, %208 : vector<8x128xf32>
    %211 = arith.divf %209, %210 : vector<8x128xf32>
    %212 = arith.mulf %203, %178 : vector<8x128xf32>
    %213 = arith.mulf %197, %205 : vector<8x128xf32>
    %214 = arith.addf %212, %213 : vector<8x128xf32>
    %215 = math.tanh %214 : vector<8x128xf32>
    %216 = arith.mulf %211, %215 : vector<8x128xf32>
    %217 = arith.truncf %216 : vector<8x128xf32> to vector<8x128xbf16>
    %c0_67 = arith.constant 0 : index
    %c5_68 = arith.constant 5 : index
    %c0_69 = arith.constant 0 : index
    %218 = vector.load %arg4[%c0_67, %c5_68, %c0_69] : memref<8x8x128xbf16, #tpu.memory_space<vmem>>, vector<8x1x128xbf16>
    %219 = vector.shape_cast %218 : vector<8x1x128xbf16> to vector<8x128xbf16>
    %220 = vector.shape_cast %217 : vector<8x128xbf16> to vector<8x1x128xbf16>
    tpu.vector_store %arg4[%c0_67, %c5_68, %c0_69], %220 {strides = array<i32>} : memref<8x8x128xbf16, #tpu.memory_space<vmem>>, vector<8x1x128xbf16>,
    %221 = arith.truncf %216 : vector<8x128xf32> to vector<8x128xbf16>
    %c0_70 = arith.constant 0 : index
    %c0_71 = arith.constant 0 : index
    %222 = vector.load %arg3[%c0_70, %c0_71] : memref<128x512xbf16, #tpu.memory_space<vmem>>, vector<128x512xbf16>
    %cst_72 = arith.constant dense<0.000000e+00> : vector<8x512xf32>
    %223 = tpu.matmul %221, %222, %cst_72 {dimension_numbers = #tpu.dot_dimension_numbers<[1], [0], [0], [1], [0, 0, 1, 1], [], []>} : vector<8x128xbf16>, vector<128x512xbf16>, vector<8x512xf32> -> vector<8x512xf32>
    %c6 = arith.constant 6 : index
    %c0_73 = arith.constant 0 : index
    %c0_74 = arith.constant 0 : index
    %224 = vector.load %arg2[%c6, %c0_73, %c0_74] : memref<8x8x512xbf16, #tpu.memory_space<vmem>>, vector<1x8x512xbf16>
    %225 = vector.shape_cast %224 : vector<1x8x512xbf16> to vector<8x512xbf16>
    %226 = arith.extf %225 : vector<8x512xbf16> to vector<8x512xf32>
    %227 = arith.addf %226, %223 : vector<8x512xf32>
    %228 = vector.extract_strided_slice %227 {offsets = [0, 0], sizes = [8, 128], strides = [1, 1]} : vector<8x512xf32> to vector<8x128xf32>
    %229 = arith.negf %228 : vector<8x128xf32>
    %230 = math.exp %229 : vector<8x128xf32>
    %cst_75 = arith.constant 1.000000e+00 : f32
    %231 = vector.broadcast %cst_75 : f32 to vector<8x128xf32>
    %232 = arith.addf %231, %230 : vector<8x128xf32>
    %233 = arith.divf %231, %232 : vector<8x128xf32>
    %234 = vector.extract_strided_slice %227 {offsets = [0, 128], sizes = [8, 128], strides = [1, 1]} : vector<8x512xf32> to vector<8x128xf32>
    %235 = arith.negf %234 : vector<8x128xf32>
    %236 = math.exp %235 : vector<8x128xf32>
    %cst_76 = arith.constant 1.000000e+00 : f32
    %237 = vector.broadcast %cst_76 : f32 to vector<8x128xf32>
    %238 = arith.addf %237, %236 : vector<8x128xf32>
    %239 = arith.divf %237, %238 : vector<8x128xf32>
    %240 = vector.extract_strided_slice %227 {offsets = [0, 256], sizes = [8, 128], strides = [1, 1]} : vector<8x512xf32> to vector<8x128xf32>
    %241 = math.tanh %240 : vector<8x128xf32>
    %242 = vector.extract_strided_slice %227 {offsets = [0, 384], sizes = [8, 128], strides = [1, 1]} : vector<8x512xf32> to vector<8x128xf32>
    %243 = arith.negf %242 : vector<8x128xf32>
    %244 = math.exp %243 : vector<8x128xf32>
    %cst_77 = arith.constant 1.000000e+00 : f32
    %245 = vector.broadcast %cst_77 : f32 to vector<8x128xf32>
    %246 = arith.addf %245, %244 : vector<8x128xf32>
    %247 = arith.divf %245, %246 : vector<8x128xf32>
    %248 = arith.mulf %239, %214 : vector<8x128xf32>
    %249 = arith.mulf %233, %241 : vector<8x128xf32>
    %250 = arith.addf %248, %249 : vector<8x128xf32>
    %251 = math.tanh %250 : vector<8x128xf32>
    %252 = arith.mulf %247, %251 : vector<8x128xf32>
    %253 = arith.truncf %252 : vector<8x128xf32> to vector<8x128xbf16>
    %c0_78 = arith.constant 0 : index
    %c6_79 = arith.constant 6 : index
    %c0_80 = arith.constant 0 : index
    %254 = vector.load %arg4[%c0_78, %c6_79, %c0_80] : memref<8x8x128xbf16, #tpu.memory_space<vmem>>, vector<8x1x128xbf16>
    %255 = vector.shape_cast %254 : vector<8x1x128xbf16> to vector<8x128xbf16>
    %256 = vector.shape_cast %253 : vector<8x128xbf16> to vector<8x1x128xbf16>
    tpu.vector_store %arg4[%c0_78, %c6_79, %c0_80], %256 {strides = array<i32>} : memref<8x8x128xbf16, #tpu.memory_space<vmem>>, vector<8x1x128xbf16>,
    %257 = arith.truncf %252 : vector<8x128xf32> to vector<8x128xbf16>
    %c0_81 = arith.constant 0 : index
    %c0_82 = arith.constant 0 : index
    %258 = vector.load %arg3[%c0_81, %c0_82] : memref<128x512xbf16, #tpu.memory_space<vmem>>, vector<128x512xbf16>
    %cst_83 = arith.constant dense<0.000000e+00> : vector<8x512xf32>
    %259 = tpu.matmul %257, %258, %cst_83 {dimension_numbers = #tpu.dot_dimension_numbers<[1], [0], [0], [1], [0, 0, 1, 1], [], []>} : vector<8x128xbf16>, vector<128x512xbf16>, vector<8x512xf32> -> vector<8x512xf32>
    %c7 = arith.constant 7 : index
    %c0_84 = arith.constant 0 : index
    %c0_85 = arith.constant 0 : index
    %260 = vector.load %arg2[%c7, %c0_84, %c0_85] : memref<8x8x512xbf16, #tpu.memory_space<vmem>>, vector<1x8x512xbf16>
    %261 = vector.shape_cast %260 : vector<1x8x512xbf16> to vector<8x512xbf16>
    %262 = arith.extf %261 : vector<8x512xbf16> to vector<8x512xf32>
    %263 = arith.addf %262, %259 : vector<8x512xf32>
    %264 = vector.extract_strided_slice %263 {offsets = [0, 0], sizes = [8, 128], strides = [1, 1]} : vector<8x512xf32> to vector<8x128xf32>
    %265 = arith.negf %264 : vector<8x128xf32>
    %266 = math.exp %265 : vector<8x128xf32>
    %cst_86 = arith.constant 1.000000e+00 : f32
    %267 = vector.broadcast %cst_86 : f32 to vector<8x128xf32>
    %268 = arith.addf %267, %266 : vector<8x128xf32>
    %269 = arith.divf %267, %268 : vector<8x128xf32>
    %270 = vector.extract_strided_slice %263 {offsets = [0, 128], sizes = [8, 128], strides = [1, 1]} : vector<8x512xf32> to vector<8x128xf32>
    %271 = arith.negf %270 : vector<8x128xf32>
    %272 = math.exp %271 : vector<8x128xf32>
    %cst_87 = arith.constant 1.000000e+00 : f32
    %273 = vector.broadcast %cst_87 : f32 to vector<8x128xf32>
    %274 = arith.addf %273, %272 : vector<8x128xf32>
    %275 = arith.divf %273, %274 : vector<8x128xf32>
    %276 = vector.extract_strided_slice %263 {offsets = [0, 256], sizes = [8, 128], strides = [1, 1]} : vector<8x512xf32> to vector<8x128xf32>
    %277 = math.tanh %276 : vector<8x128xf32>
    %278 = vector.extract_strided_slice %263 {offsets = [0, 384], sizes = [8, 128], strides = [1, 1]} : vector<8x512xf32> to vector<8x128xf32>
    %279 = arith.negf %278 : vector<8x128xf32>
    %280 = math.exp %279 : vector<8x128xf32>
    %cst_88 = arith.constant 1.000000e+00 : f32
    %281 = vector.broadcast %cst_88 : f32 to vector<8x128xf32>
    %282 = arith.addf %281, %280 : vector<8x128xf32>
    %283 = arith.divf %281, %282 : vector<8x128xf32>
    %284 = arith.mulf %275, %250 : vector<8x128xf32>
    %285 = arith.mulf %269, %277 : vector<8x128xf32>
    %286 = arith.addf %284, %285 : vector<8x128xf32>
    %287 = math.tanh %286 : vector<8x128xf32>
    %288 = arith.mulf %283, %287 : vector<8x128xf32>
    %289 = arith.truncf %288 : vector<8x128xf32> to vector<8x128xbf16>
    %c0_89 = arith.constant 0 : index
    %c7_90 = arith.constant 7 : index
    %c0_91 = arith.constant 0 : index
    %290 = vector.load %arg4[%c0_89, %c7_90, %c0_91] : memref<8x8x128xbf16, #tpu.memory_space<vmem>>, vector<8x1x128xbf16>
    %291 = vector.shape_cast %290 : vector<8x1x128xbf16> to vector<8x128xbf16>
    %292 = vector.shape_cast %289 : vector<8x128xbf16> to vector<8x1x128xbf16>
    tpu.vector_store %arg4[%c0_89, %c7_90, %c0_91], %292 {strides = array<i32>} : memref<8x8x128xbf16, #tpu.memory_space<vmem>>, vector<8x1x128xbf16>,
    %c0_92 = arith.constant 0 : index
    %c0_93 = arith.constant 0 : index
    %293 = vector.load %arg5[%c0_92, %c0_93] : memref<8x128xf32, #tpu.memory_space<vmem>>, vector<8x128xf32>
    tpu.vector_store %arg5[%c0_92, %c0_93], %288 {strides = array<i32>} : memref<8x128xf32, #tpu.memory_space<vmem>>, vector<8x128xf32>,
    %c0_94 = arith.constant 0 : index
    %c0_95 = arith.constant 0 : index
    %294 = vector.load %arg6[%c0_94, %c0_95] : memref<8x128xf32, #tpu.memory_space<vmem>>, vector<8x128xf32>
    tpu.vector_store %arg6[%c0_94, %c0_95], %286 {strides = array<i32>} : memref<8x128xf32, #tpu.memory_space<vmem>>, vector<8x128xf32>,
    return
  }
  func.func @transform_0(%arg0: i32, %arg1: i32) -> (i32, i32, i32) {
    %c0_i32 = arith.constant 0 : i32
    %c0_i32_0 = arith.constant 0 : i32
    return %arg1, %arg0, %c0_i32 : i32, i32, i32
  }
  func.func @transform_1(%arg0: i32, %arg1: i32) -> (i32, i32) {
    %c0_i32 = arith.constant 0 : i32
    %c0_i32_0 = arith.constant 0 : i32
    %c0_i32_1 = arith.constant 0 : i32
    return %c0_i32, %c0_i32_0 : i32, i32
  }
  func.func @transform_2(%arg0: i32, %arg1: i32) -> (i32, i32, i32) {
    %c0_i32 = arith.constant 0 : i32
    %c0_i32_0 = arith.constant 0 : i32
    return %arg0, %arg1, %c0_i32 : i32, i32, i32
  }
}

module attributes {stable_mosaic.version = 11 : i64} {
  func.func @_matmul_bias_kernel(%arg0: i32, %arg1: i32, %arg2: memref<128x128xbf16, #tpu.memory_space<vmem>>, %arg3: memref<128x128xbf16, #tpu.memory_space<vmem>>, %arg4: memref<1x128xf32, #tpu.memory_space<vmem>>, %arg5: memref<128x128xf32, #tpu.memory_space<vmem>>) attributes {dimension_semantics = [#tpu.dimension_semantics<parallel>, #tpu.dimension_semantics<parallel>], iteration_bounds = array<i64: 1, 1>, scalar_prefetch = 0 : i64, scratch_operands = 0 : i64, tpu.core_type = #tpu.core_type<tc>, window_params = [{transform_indices = @transform_0, window_bounds = array<i64: 128, 128>}, {transform_indices = @transform_1, window_bounds = array<i64: 128, 128>}, {transform_indices = @transform_2, window_bounds = array<i64: 1, 128>}, {transform_indices = @transform_3, window_bounds = array<i64: 128, 128>}]} {
    %c0 = arith.constant 0 : index
    %c0_0 = arith.constant 0 : index
    %0 = vector.load %arg2[%c0, %c0_0] : memref<128x128xbf16, #tpu.memory_space<vmem>>, vector<128x128xbf16>
    %c0_1 = arith.constant 0 : index
    %c0_2 = arith.constant 0 : index
    %1 = vector.load %arg3[%c0_1, %c0_2] : memref<128x128xbf16, #tpu.memory_space<vmem>>, vector<128x128xbf16>
    %cst = arith.constant dense<0.000000e+00> : vector<128x128xf32>
    %2 = tpu.matmul %0, %1, %cst {dimension_numbers = #tpu.dot_dimension_numbers<[1], [0], [0], [1], [0, 0, 1, 1], [], []>} : vector<128x128xbf16>, vector<128x128xbf16>, vector<128x128xf32> -> vector<128x128xf32>
    %c0_3 = arith.constant 0 : index
    %c0_4 = arith.constant 0 : index
    %3 = vector.load %arg4[%c0_3, %c0_4] : memref<1x128xf32, #tpu.memory_space<vmem>>, vector<1x128xf32>
    %4 = vector.broadcast %3 : vector<1x128xf32> to vector<128x128xf32>
    %5 = arith.addf %2, %4 : vector<128x128xf32>
    %c0_5 = arith.constant 0 : index
    %c0_6 = arith.constant 0 : index
    %6 = vector.load %arg5[%c0_5, %c0_6] : memref<128x128xf32, #tpu.memory_space<vmem>>, vector<128x128xf32>
    tpu.vector_store %arg5[%c0_5, %c0_6], %5 {strides = array<i32>} : memref<128x128xf32, #tpu.memory_space<vmem>>, vector<128x128xf32>,
    return
  }
  func.func @transform_0(%arg0: i32, %arg1: i32) -> (i32, i32) {
    %c0_i32 = arith.constant 0 : i32
    %c0_i32_0 = arith.constant 0 : i32
    return %arg0, %c0_i32 : i32, i32
  }
  func.func @transform_1(%arg0: i32, %arg1: i32) -> (i32, i32) {
    %c0_i32 = arith.constant 0 : i32
    %c0_i32_0 = arith.constant 0 : i32
    return %c0_i32, %arg1 : i32, i32
  }
  func.func @transform_2(%arg0: i32, %arg1: i32) -> (i32, i32) {
    %c0_i32 = arith.constant 0 : i32
    %c0_i32_0 = arith.constant 0 : i32
    return %c0_i32, %arg1 : i32, i32
  }
  func.func @transform_3(%arg0: i32, %arg1: i32) -> (i32, i32) {
    %c0_i32 = arith.constant 0 : i32
    return %arg0, %arg1 : i32, i32
  }
}

</mosaic_0001>

<bundles_post_ra>
// kernel: _lambda_.3
= control target key start
LH: loop header
LB: loop body
LE: loop exit
PB: predicated region body
PF: predicated region fallthrough
CT: control target
= control target key end

     0   :  { %v908_v1 = vmov 0   ;;  %v65_v41 = vlaneseq  ;;  %s1236_s1 = inlined_call_operand.vmem [shape: bf16[128,512], index: 1, kind: input, shape index: {}]   ;;  %s1237_s0 = inlined_call_operand.vmem [shape: bf16[128,128], index: 0, kind: input, shape index: {}]   ;;  %s1238_s2 = inlined_call_operand.vmem [shape: f32[1,512], index: 2, kind: input, shape index: {}]   ;;  %s1239_s3 = inlined_call_operand.vmem [shape: bf16[128,512], index: 3, kind: output, shape index: {}]  }
   0x1   :  { %v852_v0 = vld [vmem:[%s1236_s1 + $0x4] ss:$16 sps:$4 sm:$0xff]   ;;  %325 = vmatprep.mubr.bf16.mxu0 %v908_v1  ;;  %438 = vmatprep.mubr.bf16.mxu1 %v908_v1  ;;  %v854_v2 = vld [vmem:[%s1236_s1 + $0xc] ss:$16 sps:$4 sm:$0xff]   ;;  %v856_v3 = vld [vmem:[%s1236_s1] ss:$16 sps:$4 sm:$0xff]  }
   0x2   :  { %293 = vmatprep.subr.bf16.mxu0 %v852_v0  ;;  %v857_v4 = vld [vmem:[%s1236_s1 + $0x8] ss:$16 sps:$4 sm:$0xff]   ;;  %406 = vmatprep.subr.bf16.mxu1 %v854_v2  ;;  %v858_v5 = vld [vmem:[%s1236_s1 + $0x24] ss:$16 sps:$4 sm:$0xff]   ;;  %v860_v6 = vld [vmem:[%s1236_s1 + $0x2c] ss:$16 sps:$4 sm:$0xff]  }
   0x3   :  { %294 = vmatpush1.bf16.msra.mxu0 %v856_v3  ;;  %407 = vmatpush1.bf16.msra.mxu1 %v857_v4  ;;  %v862_v7 = vld [vmem:[%s1236_s1 + $0x20] ss:$16 sps:$4 sm:$0xff]   ;;  %v863_v8 = vld [vmem:[%s1236_s1 + $0x28] ss:$16 sps:$4 sm:$0xff]   ;;  %v864_v9 = vld [vmem:[%s1236_s1 + $0x44] ss:$16 sps:$4 sm:$0xff]  }
   0x4   :  { %295 = vmatprep.subr.bf16.mxu0 %v858_v5  ;;  %408 = vmatprep.subr.bf16.mxu1 %v860_v6  ;;  %v866_v10 = vld [vmem:[%s1236_s1 + $0x4c] ss:$16 sps:$4 sm:$0xff]   ;;  %v868_v11 = vld [vmem:[%s1236_s1 + $0x40] ss:$16 sps:$4 sm:$0xff]   ;;  %v869_v12 = vld [vmem:[%s1236_s1 + $0x48] ss:$16 sps:$4 sm:$0xff]  }
   0x5   :  { %v870_v13 = vld [vmem:[%s1236_s1 + $0x64] ss:$16 sps:$4 sm:$0xff]   ;;  %v872_v14 = vld [vmem:[%s1236_s1 + $0x6c] ss:$16 sps:$4 sm:$0xff]   ;;  %v874_v15 = vld [vmem:[%s1236_s1 + $0x60] ss:$16 sps:$4 sm:$0xff]  }
   0x6   :  { %v875_v16 = vld [vmem:[%s1236_s1 + $0x68] ss:$16 sps:$4 sm:$0xff]   ;;  %v876_v17 = vld [vmem:[%s1236_s1 + $0x84] ss:$16 sps:$4 sm:$0xff]   ;;  %v878_v18 = vld [vmem:[%s1236_s1 + $0x8c] ss:$16 sps:$4 sm:$0xff]  }
   0x7   :  { %296 = vmatpush1.bf16.msra.mxu0 %v862_v7  ;;  %409 = vmatpush1.bf16.msra.mxu1 %v863_v8  ;;  %v880_v19 = vld [vmem:[%s1236_s1 + $0x80] ss:$16 sps:$4 sm:$0xff]   ;;  %v881_v20 = vld [vmem:[%s1236_s1 + $0x88] ss:$16 sps:$4 sm:$0xff]   ;;  %v882_v21 = vld [vmem:[%s1236_s1 + $0xa4] ss:$16 sps:$4 sm:$0xff]  }
   0x8   :  { %297 = vmatprep.subr.bf16.mxu0 %v864_v9  ;;  %410 = vmatprep.subr.bf16.mxu1 %v866_v10  ;;  %v884_v22 = vld [vmem:[%s1236_s1 + $0xac] ss:$16 sps:$4 sm:$0xff]   ;;  %v886_v23 = vld [vmem:[%s1236_s1 + $0xa0] ss:$16 sps:$4 sm:$0xff]   ;;  %v887_v24 = vld [vmem:[%s1236_s1 + $0xa8] ss:$16 sps:$4 sm:$0xff]  }
   0x9   :  { %v888_v25 = vld [vmem:[%s1236_s1 + $0xc4] ss:$16 sps:$4 sm:$0xff]   ;;  %v890_v26 = vld [vmem:[%s1236_s1 + $0xcc] ss:$16 sps:$4 sm:$0xff]   ;;  %v892_v27 = vld [vmem:[%s1236_s1 + $0xc0] ss:$16 sps:$4 sm:$0xff]  }
   0xa   :  { %v893_v28 = vld [vmem:[%s1236_s1 + $0xc8] ss:$16 sps:$4 sm:$0xff]   ;;  %v894_v29 = vld [vmem:[%s1236_s1 + $0xe4] ss:$16 sps:$4 sm:$0xff]   ;;  %v896_v30 = vld [vmem:[%s1236_s1 + $0xec] ss:$16 sps:$4 sm:$0xff]  }
   0xb   :  { %298 = vmatpush1.bf16.msra.mxu0 %v868_v11  ;;  %411 = vmatpush1.bf16.msra.mxu1 %v869_v12  ;;  %v898_v31 = vld [vmem:[%s1236_s1 + $0xe0] ss:$16 sps:$4 sm:$0xff]   ;;  %v899_v32 = vld [vmem:[%s1236_s1 + $0xe8] ss:$16 sps:$4 sm:$0xff]   ;;  %v66_v42 = vshrl.u32 %v65_v41, 7 }
   0xc   :  { %299 = vmatprep.subr.bf16.mxu0 %v870_v13  ;;  %412 = vmatprep.subr.bf16.mxu1 %v872_v14  ;;  %v900_v33 = vld [vmem:[%s1237_s0] sm:$0xff]   ;;  %v901_v34 = vld [vmem:[%s1237_s0 + $0x8] sm:$0xff]   ;;  %v902_v35 = vld [vmem:[%s1237_s0 + $0x10] sm:$0xff]  }
   0xd   :  { %v903_v36 = vld [vmem:[%s1237_s0 + $0x18] sm:$0xff]   ;;  %v904_v37 = vld [vmem:[%s1237_s0 + $0x20] sm:$0xff]   ;;  %v905_v38 = vld [vmem:[%s1237_s0 + $0x28] sm:$0xff]   ;;  %v67_v43 = vsub.s32 0, %v66_v42  ;;  %v75_v44 = vsub.s32 2, %v66_v42  ;;  %v71_v46 = vsub.s32 1, %v66_v42 }
   0xe   :  { %v906_v39 = vld [vmem:[%s1237_s0 + $0x30] sm:$0xff]   ;;  %v907_v40 = vld [vmem:[%s1237_s0 + $0x38] sm:$0xff]   ;;  %v63_v45 = vld [vmem:[%s1238_s2] sm:$0xf]  ;;  %v79_v47 = vsub.s32 3, %v66_v42 }
   0xf   :  { %300 = vmatpush1.bf16.msra.mxu0 %v874_v15  ;;  %413 = vmatpush1.bf16.msra.mxu1 %v875_v16  ;;  %v1068_v48 = vrot.slane %v63_v45, %v67_v43  ;;  %v1070_v49 = vrot.slane %v63_v45, %v75_v44  ;;  %v1072_v50 = vrot.slane %v63_v45, %v71_v46 }
  0x10   :  { %301 = vmatprep.subr.bf16.mxu0 %v876_v17  ;;  %414 = vmatprep.subr.bf16.mxu1 %v878_v18  ;;  %v1074_v51 = vrot.slane %v63_v45, %v79_v47 }
  0x13   :  { %302 = vmatpush1.bf16.msra.mxu0 %v880_v19  ;;  %415 = vmatpush1.bf16.msra.mxu1 %v881_v20 }
  0x14   :  { %303 = vmatprep.subr.bf16.mxu0 %v882_v21  ;;  %416 = vmatprep.subr.bf16.mxu1 %v884_v22 }
  0x17   :  { %304 = vmatpush1.bf16.msra.mxu0 %v886_v23  ;;  %417 = vmatpush1.bf16.msra.mxu1 %v887_v24 }
  0x18   :  { %305 = vmatprep.subr.bf16.mxu0 %v888_v25  ;;  %418 = vmatprep.subr.bf16.mxu1 %v890_v26 }
  0x1b   :  { %306 = vmatpush1.bf16.msra.mxu0 %v892_v27  ;;  %419 = vmatpush1.bf16.msra.mxu1 %v893_v28 }
  0x1c   :  { %307 = vmatprep.subr.bf16.mxu0 %v894_v29  ;;  %420 = vmatprep.subr.bf16.mxu1 %v896_v30 }
  0x1f   :  { %308 = vmatpush1.bf16.msra.mxu0 %v898_v31  ;;  %421 = vmatpush1.bf16.msra.mxu1 %v899_v32 }
  0x22   :  { %326 = vmatmul.mubr.bf16.vlgmr.msra.gmra.mrb[0].mxu0 %v900_v33  ;;  %439 = vmatmul.mubr.bf16.vlgmr.msra.gmra.mrb[0].mxu1 %v900_v33 }
  0x23   :  { %335 = vmatprep.mubr.bf16.mxu0 %v908_v1  ;;  %448 = vmatprep.mubr.bf16.mxu1 %v908_v1 }
  0x2a   :  { %336 = vmatmul.mubr.bf16.gmra.mrb[4].mxu0 %v901_v34  ;;  %449 = vmatmul.mubr.bf16.gmra.mrb[4].mxu1 %v901_v34 }
  0x2b   :  { %345 = vmatprep.mubr.bf16.mxu0 %v908_v1  ;;  %458 = vmatprep.mubr.bf16.mxu1 %v908_v1 }
  0x32   :  { %346 = vmatmul.mubr.bf16.gmra.mrb[8].mxu0 %v902_v35  ;;  %459 = vmatmul.mubr.bf16.gmra.mrb[8].mxu1 %v902_v35 }
  0x33   :  { %355 = vmatprep.mubr.bf16.mxu0 %v908_v1  ;;  %468 = vmatprep.mubr.bf16.mxu1 %v908_v1 }
  0x3a   :  { %356 = vmatmul.mubr.bf16.gmra.mrb[12].mxu0 %v903_v36  ;;  %469 = vmatmul.mubr.bf16.gmra.mrb[12].mxu1 %v903_v36 }
  0x3b   :  { %365 = vmatprep.mubr.bf16.mxu0 %v908_v1  ;;  %478 = vmatprep.mubr.bf16.mxu1 %v908_v1 }
  0x42   :  { %366 = vmatmul.mubr.bf16.gmra.mrb[16].mxu0 %v904_v37  ;;  %479 = vmatmul.mubr.bf16.gmra.mrb[16].mxu1 %v904_v37 }
  0x43   :  { %375 = vmatprep.mubr.bf16.mxu0 %v908_v1  ;;  %488 = vmatprep.mubr.bf16.mxu1 %v908_v1 }
  0x4a   :  { %376 = vmatmul.mubr.bf16.gmra.mrb[20].mxu0 %v905_v38  ;;  %489 = vmatmul.mubr.bf16.gmra.mrb[20].mxu1 %v905_v38 }
  0x4b   :  { %385 = vmatprep.mubr.bf16.mxu0 %v908_v1  ;;  %498 = vmatprep.mubr.bf16.mxu1 %v908_v1 }
  0x52   :  { %386 = vmatmul.mubr.bf16.gmra.mrb[24].mxu0 %v906_v39  ;;  %499 = vmatmul.mubr.bf16.gmra.mrb[24].mxu1 %v906_v39 }
  0x53   :  { %395 = vmatprep.mubr.bf16.mxu0 %v908_v1  ;;  %508 = vmatprep.mubr.bf16.mxu1 %v908_v1 }
  0x5a   :  { %396 = vmatmul.mubr.bf16.gmra.mrb[28].mxu0 %v907_v40  ;;  %509 = vmatmul.mubr.bf16.gmra.mrb[28].mxu1 %v907_v40 }
  0xf5   :  { %v327_v52 = vpop.f32.mrb[0].mxu0  ;;  %v440_v53 = vpop.f32.mrb[0].mxu1 }
  0xf6   :  { %v328_v54 = vadd.f32 %v327_v52, %v1068_v48  ;;  %v441_v55 = vadd.f32 %v440_v53, %v1070_v49  ;;  %v329_v56 = vpop.f32.mrb[1].mxu0  ;;  %v442_v57 = vpop.f32.mrb[1].mxu1 }
  0xf7   :  { %v330_v58 = vadd.f32 %v329_v56, %v1072_v50  ;;  %v443_v59 = vadd.f32 %v442_v57, %v1074_v51  ;;  %v331_v60 = vpop.f32.mrb[2].mxu0  ;;  %v444_v61 = vpop.f32.mrb[2].mxu1 }
  0xf8   :  { %v332_v62 = vadd.f32 %v331_v60, %v1068_v48  ;;  %v445_v63 = vadd.f32 %v444_v61, %v1070_v49  ;;  %v333_v0 = vpop.f32.mrb[3].mxu0  ;;  %v446_v1 = vpop.f32.mrb[3].mxu1 }
  0xf9   :  { %v819_v2 = vpack.c.bf16 %v330_v58, %v328_v54  ;;  %v820_v3 = vpack.c.bf16 %v443_v59, %v441_v55  ;;  %v334_v4 = vadd.f32 %v333_v0, %v1072_v50  ;;  %v447_v5 = vadd.f32 %v446_v1, %v1074_v51 }
  0xfb   :  { %711 = vst [vmem:[%s1239_s3] sm:$0xff] %v819_v2  ;;  %712 = vst [vmem:[%s1239_s3 + $0x8] sm:$0xff] %v820_v3  ;;  %v821_v6 = vpack.c.bf16 %v334_v4, %v332_v62  ;;  %v822_v7 = vpack.c.bf16 %v447_v5, %v445_v63 }
  0xfd   :  { %713 = vst [vmem:[%s1239_s3 + $0x10] sm:$0xff] %v821_v6  ;;  %714 = vst [vmem:[%s1239_s3 + $0x18] sm:$0xff] %v822_v7  ;;  %v337_v8 = vpop.f32.mrb[4].mxu0  ;;  %v450_v9 = vpop.f32.mrb[4].mxu1 }
  0xfe   :  { %v338_v10 = vadd.f32 %v337_v8, %v1068_v48  ;;  %v451_v11 = vadd.f32 %v450_v9, %v1070_v49  ;;  %v339_v12 = vpop.f32.mrb[5].mxu0  ;;  %v452_v13 = vpop.f32.mrb[5].mxu1 }
  0xff   :  { %v340_v14 = vadd.f32 %v339_v12, %v1072_v50  ;;  %v453_v15 = vadd.f32 %v452_v13, %v1074_v51  ;;  %v341_v16 = vpop.f32.mrb[6].mxu0  ;;  %v454_v17 = vpop.f32.mrb[6].mxu1 }
 0x100   :  { %v342_v18 = vadd.f32 %v341_v16, %v1068_v48  ;;  %v455_v19 = vadd.f32 %v454_v17, %v1070_v49  ;;  %v343_v20 = vpop.f32.mrb[7].mxu0  ;;  %v456_v21 = vpop.f32.mrb[7].mxu1 }
 0x101   :  { %v823_v22 = vpack.c.bf16 %v340_v14, %v338_v10  ;;  %v824_v23 = vpack.c.bf16 %v453_v15, %v451_v11  ;;  %v344_v24 = vadd.f32 %v343_v20, %v1072_v50  ;;  %v457_v25 = vadd.f32 %v456_v21, %v1074_v51 }
 0x103   :  { %715 = vst [vmem:[%s1239_s3 + $0x20] sm:$0xff] %v823_v22  ;;  %716 = vst [vmem:[%s1239_s3 + $0x28] sm:$0xff] %v824_v23  ;;  %v825_v26 = vpack.c.bf16 %v344_v24, %v342_v18  ;;  %v826_v27 = vpack.c.bf16 %v457_v25, %v455_v19 }
 0x105   :  { %717 = vst [vmem:[%s1239_s3 + $0x30] sm:$0xff] %v825_v26  ;;  %718 = vst [vmem:[%s1239_s3 + $0x38] sm:$0xff] %v826_v27  ;;  %v347_v28 = vpop.f32.mrb[8].mxu0  ;;  %v460_v29 = vpop.f32.mrb[8].mxu1 }
 0x106   :  { %v348_v30 = vadd.f32 %v347_v28, %v1068_v48  ;;  %v461_v31 = vadd.f32 %v460_v29, %v1070_v49  ;;  %v349_v32 = vpop.f32.mrb[9].mxu0  ;;  %v462_v33 = vpop.f32.mrb[9].mxu1 }
 0x107   :  { %v350_v34 = vadd.f32 %v349_v32, %v1072_v50  ;;  %v463_v35 = vadd.f32 %v462_v33, %v1074_v51  ;;  %v351_v36 = vpop.f32.mrb[10].mxu0  ;;  %v464_v37 = vpop.f32.mrb[10].mxu1 }
 0x108   :  { %v352_v38 = vadd.f32 %v351_v36, %v1068_v48  ;;  %v465_v39 = vadd.f32 %v464_v37, %v1070_v49  ;;  %v353_v40 = vpop.f32.mrb[11].mxu0  ;;  %v466_v41 = vpop.f32.mrb[11].mxu1 }
 0x109   :  { %v827_v42 = vpack.c.bf16 %v350_v34, %v348_v30  ;;  %v828_v43 = vpack.c.bf16 %v463_v35, %v461_v31  ;;  %v354_v44 = vadd.f32 %v353_v40, %v1072_v50  ;;  %v467_v45 = vadd.f32 %v466_v41, %v1074_v51 }
 0x10b   :  { %719 = vst [vmem:[%s1239_s3 + $0x40] sm:$0xff] %v827_v42  ;;  %720 = vst [vmem:[%s1239_s3 + $0x48] sm:$0xff] %v828_v43  ;;  %v829_v46 = vpack.c.bf16 %v354_v44, %v352_v38  ;;  %v830_v47 = vpack.c.bf16 %v467_v45, %v465_v39 }
 0x10d   :  { %721 = vst [vmem:[%s1239_s3 + $0x50] sm:$0xff] %v829_v46  ;;  %722 = vst [vmem:[%s1239_s3 + $0x58] sm:$0xff] %v830_v47  ;;  %v357_v52 = vpop.f32.mrb[12].mxu0  ;;  %v470_v53 = vpop.f32.mrb[12].mxu1 }
 0x10e   :  { %v358_v54 = vadd.f32 %v357_v52, %v1068_v48  ;;  %v471_v55 = vadd.f32 %v470_v53, %v1070_v49  ;;  %v359_v56 = vpop.f32.mrb[13].mxu0  ;;  %v472_v57 = vpop.f32.mrb[13].mxu1 }
 0x10f   :  { %v360_v58 = vadd.f32 %v359_v56, %v1072_v50  ;;  %v473_v59 = vadd.f32 %v472_v57, %v1074_v51  ;;  %v361_v60 = vpop.f32.mrb[14].mxu0  ;;  %v474_v61 = vpop.f32.mrb[14].mxu1 }
 0x110   :  { %v362_v62 = vadd.f32 %v361_v60, %v1068_v48  ;;  %v475_v63 = vadd.f32 %v474_v61, %v1070_v49  ;;  %v363_v0 = vpop.f32.mrb[15].mxu0  ;;  %v476_v1 = vpop.f32.mrb[15].mxu1 }
 0x111   :  { %v831_v2 = vpack.c.bf16 %v360_v58, %v358_v54  ;;  %v832_v3 = vpack.c.bf16 %v473_v59, %v471_v55  ;;  %v364_v4 = vadd.f32 %v363_v0, %v1072_v50  ;;  %v477_v5 = vadd.f32 %v476_v1, %v1074_v51 }
 0x113   :  { %723 = vst [vmem:[%s1239_s3 + $0x60] sm:$0xff] %v831_v2  ;;  %724 = vst [vmem:[%s1239_s3 + $0x68] sm:$0xff] %v832_v3  ;;  %v833_v6 = vpack.c.bf16 %v364_v4, %v362_v62  ;;  %v834_v7 = vpack.c.bf16 %v477_v5, %v475_v63 }
 0x115   :  { %725 = vst [vmem:[%s1239_s3 + $0x70] sm:$0xff] %v833_v6  ;;  %726 = vst [vmem:[%s1239_s3 + $0x78] sm:$0xff] %v834_v7  ;;  %v367_v8 = vpop.f32.mrb[16].mxu0  ;;  %v480_v9 = vpop.f32.mrb[16].mxu1 }
 0x116   :  { %v368_v10 = vadd.f32 %v367_v8, %v1068_v48  ;;  %v481_v11 = vadd.f32 %v480_v9, %v1070_v49  ;;  %v369_v12 = vpop.f32.mrb[17].mxu0  ;;  %v482_v13 = vpop.f32.mrb[17].mxu1 }
 0x117   :  { %v370_v14 = vadd.f32 %v369_v12, %v1072_v50  ;;  %v483_v15 = vadd.f32 %v482_v13, %v1074_v51  ;;  %v371_v16 = vpop.f32.mrb[18].mxu0  ;;  %v484_v17 = vpop.f32.mrb[18].mxu1 }
 0x118   :  { %v372_v18 = vadd.f32 %v371_v16, %v1068_v48  ;;  %v485_v19 = vadd.f32 %v484_v17, %v1070_v49  ;;  %v373_v20 = vpop.f32.mrb[19].mxu0  ;;  %v486_v21 = vpop.f32.mrb[19].mxu1 }
 0x119   :  { %v835_v22 = vpack.c.bf16 %v370_v14, %v368_v10  ;;  %v836_v23 = vpack.c.bf16 %v483_v15, %v481_v11  ;;  %v374_v24 = vadd.f32 %v373_v20, %v1072_v50  ;;  %v487_v25 = vadd.f32 %v486_v21, %v1074_v51 }
 0x11b   :  { %727 = vst [vmem:[%s1239_s3 + $0x80] sm:$0xff] %v835_v22  ;;  %728 = vst [vmem:[%s1239_s3 + $0x88] sm:$0xff] %v836_v23  ;;  %v837_v26 = vpack.c.bf16 %v374_v24, %v372_v18  ;;  %v838_v27 = vpack.c.bf16 %v487_v25, %v485_v19 }
 0x11d   :  { %729 = vst [vmem:[%s1239_s3 + $0x90] sm:$0xff] %v837_v26  ;;  %730 = vst [vmem:[%s1239_s3 + $0x98] sm:$0xff] %v838_v27  ;;  %v377_v28 = vpop.f32.mrb[20].mxu0  ;;  %v490_v29 = vpop.f32.mrb[20].mxu1 }
 0x11e   :  { %v378_v30 = vadd.f32 %v377_v28, %v1068_v48  ;;  %v491_v31 = vadd.f32 %v490_v29, %v1070_v49  ;;  %v379_v32 = vpop.f32.mrb[21].mxu0  ;;  %v492_v33 = vpop.f32.mrb[21].mxu1 }
 0x11f   :  { %v380_v34 = vadd.f32 %v379_v32, %v1072_v50  ;;  %v493_v35 = vadd.f32 %v492_v33, %v1074_v51  ;;  %v381_v36 = vpop.f32.mrb[22].mxu0  ;;  %v494_v37 = vpop.f32.mrb[22].mxu1 }
 0x120   :  { %v382_v38 = vadd.f32 %v381_v36, %v1068_v48  ;;  %v495_v39 = vadd.f32 %v494_v37, %v1070_v49  ;;  %v383_v40 = vpop.f32.mrb[23].mxu0  ;;  %v496_v41 = vpop.f32.mrb[23].mxu1 }
 0x121   :  { %v839_v42 = vpack.c.bf16 %v380_v34, %v378_v30  ;;  %v840_v43 = vpack.c.bf16 %v493_v35, %v491_v31  ;;  %v384_v44 = vadd.f32 %v383_v40, %v1072_v50  ;;  %v497_v45 = vadd.f32 %v496_v41, %v1074_v51 }
 0x123   :  { %731 = vst [vmem:[%s1239_s3 + $0xa0] sm:$0xff] %v839_v42  ;;  %732 = vst [vmem:[%s1239_s3 + $0xa8] sm:$0xff] %v840_v43  ;;  %v841_v46 = vpack.c.bf16 %v384_v44, %v382_v38  ;;  %v842_v47 = vpack.c.bf16 %v497_v45, %v495_v39 }
 0x125   :  { %733 = vst [vmem:[%s1239_s3 + $0xb0] sm:$0xff] %v841_v46  ;;  %734 = vst [vmem:[%s1239_s3 + $0xb8] sm:$0xff] %v842_v47  ;;  %v387_v52 = vpop.f32.mrb[24].mxu0  ;;  %v500_v53 = vpop.f32.mrb[24].mxu1 }
 0x126   :  { %v388_v54 = vadd.f32 %v387_v52, %v1068_v48  ;;  %v501_v55 = vadd.f32 %v500_v53, %v1070_v49  ;;  %v389_v56 = vpop.f32.mrb[25].mxu0  ;;  %v502_v57 = vpop.f32.mrb[25].mxu1 }
 0x127   :  { %v390_v58 = vadd.f32 %v389_v56, %v1072_v50  ;;  %v503_v59 = vadd.f32 %v502_v57, %v1074_v51  ;;  %v391_v60 = vpop.f32.mrb[26].mxu0  ;;  %v504_v61 = vpop.f32.mrb[26].mxu1 }
 0x128   :  { %v392_v62 = vadd.f32 %v391_v60, %v1068_v48  ;;  %v505_v63 = vadd.f32 %v504_v61, %v1070_v49  ;;  %v393_v0 = vpop.f32.mrb[27].mxu0  ;;  %v506_v1 = vpop.f32.mrb[27].mxu1 }
 0x129   :  { %v843_v2 = vpack.c.bf16 %v390_v58, %v388_v54  ;;  %v844_v3 = vpack.c.bf16 %v503_v59, %v501_v55  ;;  %v394_v4 = vadd.f32 %v393_v0, %v1072_v50  ;;  %v507_v5 = vadd.f32 %v506_v1, %v1074_v51 }
 0x12b   :  { %735 = vst [vmem:[%s1239_s3 + $0xc0] sm:$0xff] %v843_v2  ;;  %736 = vst [vmem:[%s1239_s3 + $0xc8] sm:$0xff] %v844_v3  ;;  %v845_v6 = vpack.c.bf16 %v394_v4, %v392_v62  ;;  %v846_v7 = vpack.c.bf16 %v507_v5, %v505_v63 }
 0x12d   :  { %737 = vst [vmem:[%s1239_s3 + $0xd0] sm:$0xff] %v845_v6  ;;  %738 = vst [vmem:[%s1239_s3 + $0xd8] sm:$0xff] %v846_v7  ;;  %v397_v8 = vpop.f32.mrb[28].mxu0  ;;  %v510_v9 = vpop.f32.mrb[28].mxu1 }
 0x12e   :  { %v398_v10 = vadd.f32 %v397_v8, %v1068_v48  ;;  %v511_v11 = vadd.f32 %v510_v9, %v1070_v49  ;;  %v399_v12 = vpop.f32.mrb[29].mxu0  ;;  %v512_v13 = vpop.f32.mrb[29].mxu1 }
 0x12f   :  { %v400_v14 = vadd.f32 %v399_v12, %v1072_v50  ;;  %v513_v15 = vadd.f32 %v512_v13, %v1074_v51  ;;  %v401_v16 = vpop.f32.mrb[30].mxu0  ;;  %v514_v17 = vpop.f32.mrb[30].mxu1 }
 0x130   :  { %v402_v18 = vadd.f32 %v401_v16, %v1068_v48  ;;  %v515_v19 = vadd.f32 %v514_v17, %v1070_v49  ;;  %v403_v20 = vpop.f32.mrb[31].mxu0  ;;  %v516_v21 = vpop.f32.mrb[31].mxu1 }
 0x131   :  { %v847_v22 = vpack.c.bf16 %v400_v14, %v398_v10  ;;  %v848_v23 = vpack.c.bf16 %v513_v15, %v511_v11  ;;  %v404_v24 = vadd.f32 %v403_v20, %v1072_v50  ;;  %v517_v25 = vadd.f32 %v516_v21, %v1074_v51 }
 0x133   :  { %739 = vst [vmem:[%s1239_s3 + $0xe0] sm:$0xff] %v847_v22  ;;  %740 = vst [vmem:[%s1239_s3 + $0xe8] sm:$0xff] %v848_v23  ;;  %v849_v26 = vpack.c.bf16 %v404_v24, %v402_v18  ;;  %v850_v48 = vpack.c.bf16 %v517_v25, %v515_v19 }
 0x135   :  { %741 = vst [vmem:[%s1239_s3 + $0xf0] sm:$0xff] %v849_v26  ;;  %742 = vst [vmem:[%s1239_s3 + $0xf8] sm:$0xff] %v850_v48 }

// kernel: _lambda_.5
= control target key start
LH: loop header
LB: loop body
LE: loop exit
PB: predicated region body
PF: predicated region fallthrough
CT: control target
= control target key end

     0   :  { %s483_s1 = inlined_call_operand.vmem [shape: bf16[128,128], index: 1, kind: input, shape index: {}]   ;;  %s484_s0 = inlined_call_operand.vmem [shape: bf16[128,128], index: 0, kind: input, shape index: {}]   ;;  %s485_s2 = inlined_call_operand.vmem [shape: f32[1,128], index: 2, kind: input, shape index: {}]   ;;  %s486_s3 = inlined_call_operand.vmem [shape: f32[128,128], index: 3, kind: output, shape index: {}]  }
   0x1   :  { %v348_v0 = vld [vmem:[%s483_s1] sm:$0xff]   ;;  %v349_v1 = vld [vmem:[%s483_s1 + $0x8] sm:$0xff]   ;;  %v350_v2 = vld [vmem:[%s483_s1 + $0x10] sm:$0xff]  }
   0x2   :  { %300 = vmatprep.subr.bf16.mxu0 %v348_v0  ;;  %332 = vmatprep.subr.bf16.mxu1 %v348_v0  ;;  %v351_v3 = vld [vmem:[%s483_s1 + $0x18] sm:$0xff]   ;;  %v356_v4 = vld [vmem:[%s484_s0] sm:$0xff]   ;;  %v353_v7 = vld [vmem:[%s483_s1 + $0x28] sm:$0xff]  }
   0x3   :  { %301 = vmatpush3.bf16.msra.mxu0 %v348_v0  ;;  %340 = vmatpush3.bf16.msra.mxu1 %v348_v0  ;;  %v357_v5 = vld [vmem:[%s484_s0 + $0x20] sm:$0xff]   ;;  %v354_v8 = vld [vmem:[%s483_s1 + $0x30] sm:$0xff]   ;;  %v355_v9 = vld [vmem:[%s483_s1 + $0x38] sm:$0xff]  }
   0x4   :  { %302 = vmatprep.subr.bf16.mxu0 %v349_v1  ;;  %333 = vmatprep.subr.bf16.mxu1 %v349_v1  ;;  %v352_v6 = vld [vmem:[%s483_s1 + $0x20] sm:$0xff]   ;;  %v358_v10 = vld [vmem:[%s484_s0 + $0x8] sm:$0xff]   ;;  %v360_v12 = vld [vmem:[%s484_s0 + $0x10] sm:$0xff]  }
   0x5   :  { %316 = vmatprep.mubr.bf16.mxu0 %v356_v4  ;;  %324 = vmatprep.mubr.bf16.mxu1 %v357_v5  ;;  %v359_v11 = vld [vmem:[%s484_s0 + $0x28] sm:$0xff]   ;;  %v361_v13 = vld [vmem:[%s484_s0 + $0x30] sm:$0xff]   ;;  %v362_v14 = vld [vmem:[%s484_s0 + $0x18] sm:$0xff]  }
   0x6   :  { %v363_v15 = vld [vmem:[%s484_s0 + $0x38] sm:$0xff]   ;;  %v267_v16 = vld [vmem:[%s485_s2] ss:$0 sm:$0xff] }
   0x7   :  { %303 = vmatpush3.bf16.msra.mxu0 %v349_v1  ;;  %341 = vmatpush3.bf16.msra.mxu1 %v349_v1 }
   0x8   :  { %304 = vmatprep.subr.bf16.mxu0 %v350_v2  ;;  %334 = vmatprep.subr.bf16.mxu1 %v350_v2 }
   0xb   :  { %305 = vmatpush3.bf16.msra.mxu0 %v350_v2  ;;  %342 = vmatpush3.bf16.msra.mxu1 %v350_v2 }
   0xc   :  { %306 = vmatprep.subr.bf16.mxu0 %v351_v3  ;;  %335 = vmatprep.subr.bf16.mxu1 %v351_v3 }
   0xf   :  { %307 = vmatpush3.bf16.msra.mxu0 %v351_v3  ;;  %343 = vmatpush3.bf16.msra.mxu1 %v351_v3 }
  0x10   :  { %308 = vmatprep.subr.bf16.mxu0 %v352_v6  ;;  %336 = vmatprep.subr.bf16.mxu1 %v352_v6 }
  0x13   :  { %309 = vmatpush3.bf16.msra.mxu0 %v352_v6  ;;  %344 = vmatpush3.bf16.msra.mxu1 %v352_v6 }
  0x14   :  { %310 = vmatprep.subr.bf16.mxu0 %v353_v7  ;;  %337 = vmatprep.subr.bf16.mxu1 %v353_v7 }
  0x17   :  { %311 = vmatpush3.bf16.msra.mxu0 %v353_v7  ;;  %345 = vmatpush3.bf16.msra.mxu1 %v353_v7 }
  0x18   :  { %312 = vmatprep.subr.bf16.mxu0 %v354_v8  ;;  %338 = vmatprep.subr.bf16.mxu1 %v354_v8 }
  0x1b   :  { %313 = vmatpush3.bf16.msra.mxu0 %v354_v8  ;;  %346 = vmatpush3.bf16.msra.mxu1 %v354_v8 }
  0x1c   :  { %314 = vmatprep.subr.bf16.mxu0 %v355_v9  ;;  %339 = vmatprep.subr.bf16.mxu1 %v355_v9 }
  0x1f   :  { %315 = vmatpush3.bf16.msra.mxu0 %v355_v9  ;;  %347 = vmatpush3.bf16.msra.mxu1 %v355_v9 }
  0x22   :  { %317 = vmatmul.mubr.bf16.vlgmr.msra.gmra.mrb[0].mxu0 %v358_v10  ;;  %325 = vmatmul.mubr.bf16.vlgmr.msra.gmra.mrb[0].mxu1 %v359_v11 }
  0x23   :  { %320 = vmatprep.mubr.bf16.mxu0 %v360_v12  ;;  %328 = vmatprep.mubr.bf16.mxu1 %v361_v13 }
  0x2a   :  { %321 = vmatmul.mubr.bf16.gmra.mrb[4].mxu0 %v362_v14  ;;  %329 = vmatmul.mubr.bf16.gmra.mrb[4].mxu1 %v363_v15 }
  0xf5   :  { %v318_v17 = vpop.f32.mrb[0].mxu0  ;;  %v326_v18 = vpop.f32.mrb[0].mxu1 }
  0xf6   :  { %v193_v19 = vadd.f32 %v318_v17, %v267_v16  ;;  %v225_v20 = vadd.f32 %v326_v18, %v267_v16  ;;  %v184_v21 = vpop.f32.mrb[1].mxu0  ;;  %v216_v22 = vpop.f32.mrb[1].mxu1 }
  0xf7   :  { %v185_v23 = vadd.f32 %v267_v16, %v184_v21  ;;  %v217_v24 = vadd.f32 %v267_v16, %v216_v22  ;;  %v319_v25 = vpop.f32.mrb[2].mxu0  ;;  %v327_v26 = vpop.f32.mrb[2].mxu1 }
  0xf8   :  { %249 = vst [vmem:[%s486_s3 + $0x10] sm:$0xff] %v193_v19  ;;  %257 = vst [vmem:[%s486_s3 + $0x50] sm:$0xff] %v225_v20  ;;  %v196_v27 = vadd.f32 %v319_v25, %v267_v16  ;;  %v228_v28 = vadd.f32 %v327_v26, %v267_v16  ;;  %v187_v29 = vpop.f32.mrb[3].mxu0  ;;  %v219_v30 = vpop.f32.mrb[3].mxu1 }
  0xf9   :  { %247 = vst [vmem:[%s486_s3] sm:$0xff] %v185_v23  ;;  %255 = vst [vmem:[%s486_s3 + $0x40] sm:$0xff] %v217_v24  ;;  %v188_v31 = vadd.f32 %v267_v16, %v187_v29  ;;  %v220_v32 = vadd.f32 %v267_v16, %v219_v30 }
  0xfa   :  { %250 = vst [vmem:[%s486_s3 + $0x18] sm:$0xff] %v196_v27  ;;  %258 = vst [vmem:[%s486_s3 + $0x58] sm:$0xff] %v228_v28 }
  0xfb   :  { %248 = vst [vmem:[%s486_s3 + $0x8] sm:$0xff] %v188_v31  ;;  %256 = vst [vmem:[%s486_s3 + $0x48] sm:$0xff] %v220_v32 }
  0xfd   :  { %v322_v33 = vpop.f32.mrb[4].mxu0  ;;  %v330_v34 = vpop.f32.mrb[4].mxu1 }
  0xfe   :  { %v209_v35 = vadd.f32 %v322_v33, %v267_v16  ;;  %v241_v36 = vadd.f32 %v330_v34, %v267_v16  ;;  %v200_v37 = vpop.f32.mrb[5].mxu0  ;;  %v232_v38 = vpop.f32.mrb[5].mxu1 }
  0xff   :  { %v201_v39 = vadd.f32 %v267_v16, %v200_v37  ;;  %v233_v40 = vadd.f32 %v267_v16, %v232_v38  ;;  %v323_v41 = vpop.f32.mrb[6].mxu0  ;;  %v331_v42 = vpop.f32.mrb[6].mxu1 }
 0x100   :  { %253 = vst [vmem:[%s486_s3 + $0x30] sm:$0xff] %v209_v35  ;;  %261 = vst [vmem:[%s486_s3 + $0x70] sm:$0xff] %v241_v36  ;;  %v212_v43 = vadd.f32 %v323_v41, %v267_v16  ;;  %v244_v44 = vadd.f32 %v331_v42, %v267_v16  ;;  %v203_v45 = vpop.f32.mrb[7].mxu0  ;;  %v235_v46 = vpop.f32.mrb[7].mxu1 }
 0x101   :  { %251 = vst [vmem:[%s486_s3 + $0x20] sm:$0xff] %v201_v39  ;;  %259 = vst [vmem:[%s486_s3 + $0x60] sm:$0xff] %v233_v40  ;;  %v204_v47 = vadd.f32 %v267_v16, %v203_v45  ;;  %v236_v48 = vadd.f32 %v267_v16, %v235_v46 }
 0x102   :  { %254 = vst [vmem:[%s486_s3 + $0x38] sm:$0xff] %v212_v43  ;;  %262 = vst [vmem:[%s486_s3 + $0x78] sm:$0xff] %v244_v44 }
 0x103   :  { %252 = vst [vmem:[%s486_s3 + $0x28] sm:$0xff] %v204_v47  ;;  %260 = vst [vmem:[%s486_s3 + $0x68] sm:$0xff] %v236_v48 }

// kernel: _lambda_.4
= control target key start
LH: loop header
LB: loop body
LE: loop exit
PB: predicated region body
PF: predicated region fallthrough
CT: control target
= control target key end

     0   :  { %s4563_s9 = smov 0   ;;  %s4565_s10 = smov 0   ;;  %s5834_s0 = inlined_call_operand.vmem [shape: bf16[8,16,512], index: 0, kind: input, shape index: {}]   ;;  %s5835_s1 = inlined_call_operand.vmem [shape: bf16[128,512], index: 1, kind: input, shape index: {}]   ;;  %s5836_s2 = inlined_call_operand.vmem [shape: bf16[16,8,128], index: 2, kind: output, shape index: {}]  }
   0x1   :  { %s4567_s11 = smov 0   ;;  %s4569_s12 = smov 0  }
   0x2   :  { %s4571_s13 = smov 0  }
   0x3 LB: > { %s24_s14 = sadd.s32 1, %s4538_s12  ;;  %p40_p1 = scmp.ne.s32.totalorder %s4530_s10, %s4526_s9  ;;  %s4542_s13 = sphi %s4571_s13, %s12_s13   ;;  %s4538_s12 = sphi %s4569_s12, %s5856_s12   ;;  %s4534_s11 = sphi %s4567_s11, %s5855_s11   ;;  %s4530_s10 = sphi %s4565_s10, %s5854_s10   ;;  %s4526_s9 = sphi %s4563_s9, %s5853_s9  }
   0x4   : > { %p26_p0 = scmp.ge.s32.totalorder %s24_s14, 2  ;;  %p41_p2 = scmp.eq.s32.totalorder %s4542_s13, 0 }
   0x5   : > { %s33_s16 = sadd.s32 1, %s4530_s10  ;;  %p3851_p5 = scmp.ge.s32.totalorder %s4542_s13, 2 }
   0x6   : > { %s5858_s14 = smov (%p26_p0, %s24_s14), 0  ;;  %p42_p3 = por %p41_p2, %p40_p1 }
   0x7   : > { %s29_s15 = ssub.s32 %s4538_s12, %s5858_s14  ;;  %118 = sbr.rel (%p3851_p5) target bundleno = 26 (0x1a), region = 20 }
   0x8   : > { %p31_p4 = scmp.eq.s32.totalorder %s29_s15, 0 }
   0xa   : > { %s4598_s17 = scalar_select %p31_p4, %s4530_s10, %s33_s16  }
   0xe   : > { %121 = sbr.rel (!%p42_p3) target bundleno = 26 (0x1a), region = 24  ;;  %s123_s18 = sand.u32 (%p42_p3), 1, %s4530_s10  }
   0xf   : > { %s4187_s19 = sshll.u32 (%p42_p3), %s4538_s12, 4  ;;  %s3852_s20 = sshll.u32 (%p42_p3), %s123_s18, 7 }
  0x10   : > { %s4606_s23 = scalar_lea.vmem (%p42_p3), %s5834_s0, %s4187_s19  ;;  %s125_s24 = scalar_lea.vmem (%p42_p3), [#allocation4], %s3852_s20 }
  0x11   : > { %v144_v0 = vld [vmem:[%s4606_s23] sm:$0xff] (%p42_p3)  ;;  %v146_v1 = vld [vmem:[%s4606_s23 + $0x8] sm:$0xff] (%p42_p3) }
  0x12   : > { %v148_v2 = vld [vmem:[%s4606_s23 + $0x20] sm:$0xff] (%p42_p3)  ;;  %145 = vst [vmem:[%s125_s24] sm:$0xff] (%p42_p3), %v144_v0  ;;  %147 = vst [vmem:[%s125_s24 + $0x8] sm:$0xff] (%p42_p3), %v146_v1  ;;  %v150_v3 = vld [vmem:[%s4606_s23 + $0x28] sm:$0xff] (%p42_p3) }
  0x13   : > { %149 = vst [vmem:[%s125_s24 + $0x10] sm:$0xff] (%p42_p3), %v148_v2  ;;  %v152_v4 = vld [vmem:[%s4606_s23 + $0x40] sm:$0xff] (%p42_p3)  ;;  %v154_v5 = vld [vmem:[%s4606_s23 + $0x48] sm:$0xff] (%p42_p3)  ;;  %151 = vst [vmem:[%s125_s24 + $0x18] sm:$0xff] (%p42_p3), %v150_v3 }
  0x14   : > { %153 = vst [vmem:[%s125_s24 + $0x20] sm:$0xff] (%p42_p3), %v152_v4  ;;  %155 = vst [vmem:[%s125_s24 + $0x28] sm:$0xff] (%p42_p3), %v154_v5  ;;  %v156_v6 = vld [vmem:[%s4606_s23 + $0x60] sm:$0xff] (%p42_p3)  ;;  %v158_v7 = vld [vmem:[%s4606_s23 + $0x68] sm:$0xff] (%p42_p3) }
  0x15   : > { %v160_v8 = vld [vmem:[%s4606_s23 + $0x80] sm:$0xff]  ;;  %157 = vst [vmem:[%s125_s24 + $0x30] sm:$0xff] %v156_v6  ;;  %159 = vst [vmem:[%s125_s24 + $0x38] sm:$0xff] %v158_v7  ;;  %v162_v9 = vld [vmem:[%s4606_s23 + $0x88] sm:$0xff] }
  0x16   : > { %161 = vst [vmem:[%s125_s24 + $0x40] sm:$0xff] %v160_v8  ;;  %v164_v10 = vld [vmem:[%s4606_s23 + $0xa0] sm:$0xff]  ;;  %v166_v11 = vld [vmem:[%s4606_s23 + $0xa8] sm:$0xff]  ;;  %163 = vst [vmem:[%s125_s24 + $0x48] sm:$0xff] %v162_v9 }
  0x17   : > { %165 = vst [vmem:[%s125_s24 + $0x50] sm:$0xff] %v164_v10  ;;  %167 = vst [vmem:[%s125_s24 + $0x58] sm:$0xff] %v166_v11  ;;  %v168_v12 = vld [vmem:[%s4606_s23 + $0xc0] sm:$0xff]  ;;  %v170_v13 = vld [vmem:[%s4606_s23 + $0xc8] sm:$0xff] }
  0x18   : > { %v172_v14 = vld [vmem:[%s4606_s23 + $0xe0] sm:$0xff]  ;;  %169 = vst [vmem:[%s125_s24 + $0x60] sm:$0xff] %v168_v12  ;;  %171 = vst [vmem:[%s125_s24 + $0x68] sm:$0xff] %v170_v13  ;;  %v174_v15 = vld [vmem:[%s4606_s23 + $0xe8] sm:$0xff] }
  0x19   : > { %173 = vst [vmem:[%s125_s24 + $0x70] sm:$0xff] %v172_v14  ;;  %175 = vst [vmem:[%s125_s24 + $0x78] sm:$0xff] %v174_v15 }
  0x1a PF: > { %p3855_p6 = scmp.ge.s32.totalorder %s4542_s13, 1  ;;  %p180_p7 = scmp.lt.s32.totalorder %s4542_s13, 3 }
  0x1c   : > { %p181_p8 = pnand %p3855_p6, %p180_p7 }
  0x1d   : > { %v4629_v16 = vld [vmem:[%s5835_s1 + $0x4] ss:$16 sps:$4 sm:$0xff] (!%p181_p8)   ;;  %v4634_v17 = vld [vmem:[%s5835_s1] ss:$16 sps:$4 sm:$0xff] (!%p181_p8)   ;;  %v4544_v18 = vmov (!%p181_p8), 0   ;;  %v4545_v49 = vmov (!%p181_p8), 0.0|0.0  }
  0x1e   : > { %184 = sbr.rel (%p181_p8) target bundleno = 2159 (0x86f), region = 47  ;;  %455 = vmatprep.mubr.bf16.mxu0 (!%p181_p8), %v4544_v18  ;;  %496 = vmatprep.mubr.bf16.mxu1 (!%p181_p8), %v4544_v18  ;;  %v4642_v19 = vld [vmem:[%s5835_s1 + $0x24] ss:$16 sps:$4 sm:$0xff] (!%p181_p8)   ;;  %v4648_v20 = vld [vmem:[%s5835_s1 + $0x20] ss:$16 sps:$4 sm:$0xff] (!%p181_p8)   ;;  %s187_s26 = sand.u32 (!%p181_p8), 1, %s4526_s9  }
  0x1f   : > { %423 = vmatprep.subr.bf16.mxu0 (!%p181_p8), %v4629_v16  ;;  %v4654_v21 = vld [vmem:[%s5835_s1 + $0x44] ss:$16 sps:$4 sm:$0xff] (!%p181_p8)   ;;  %v4659_v22 = vld [vmem:[%s5835_s1 + $0xc] ss:$16 sps:$4 sm:$0xff] (!%p181_p8)   ;;  %v4664_v23 = vld [vmem:[%s5835_s1 + $0x8] ss:$16 sps:$4 sm:$0xff] (!%p181_p8)  }
  0x20   : > { %424 = vmatpush1.bf16.msra.mxu0 (!%p181_p8), %v4634_v17  ;;  %v4670_v24 = vld [vmem:[%s5835_s1 + $0x40] ss:$16 sps:$4 sm:$0xff] (!%p181_p8)   ;;  %464 = vmatprep.subr.bf16.mxu1 (!%p181_p8), %v4659_v22  ;;  %v4677_v25 = vld [vmem:[%s5835_s1 + $0x64] ss:$16 sps:$4 sm:$0xff] (!%p181_p8)   ;;  %v4683_v26 = vld [vmem:[%s5835_s1 + $0x2c] ss:$16 sps:$4 sm:$0xff] (!%p181_p8)  }
  0x21   : > { %425 = vmatprep.subr.bf16.mxu0 (!%p181_p8), %v4642_v19  ;;  %465 = vmatpush1.bf16.msra.mxu1 (!%p181_p8), %v4664_v23  ;;  %v4688_v27 = vld [vmem:[%s5835_s1 + $0x28] ss:$16 sps:$4 sm:$0xff] (!%p181_p8)   ;;  %v4695_v28 = vld [vmem:[%s5835_s1 + $0x60] ss:$16 sps:$4 sm:$0xff] (!%p181_p8)   ;;  %v4700_v29 = vld [vmem:[%s5835_s1 + $0x84] ss:$16 sps:$4 sm:$0xff] (!%p181_p8)  }
  0x22   : > { %466 = vmatprep.subr.bf16.mxu1 (!%p181_p8), %v4683_v26  ;;  %v4705_v30 = vld [vmem:[%s5835_s1 + $0x4c] ss:$16 sps:$4 sm:$0xff] (!%p181_p8)   ;;  %v4712_v31 = vld [vmem:[%s5835_s1 + $0x48] ss:$16 sps:$4 sm:$0xff] (!%p181_p8)   ;;  %v4724_v33 = vld [vmem:[%s5835_s1 + $0x80] ss:$16 sps:$4 sm:$0xff] (!%p181_p8)  }
  0x23   : > { %v4718_v32 = vld [vmem:[%s5835_s1 + $0x6c] ss:$16 sps:$4 sm:$0xff] (!%p181_p8)   ;;  %v4730_v34 = vld [vmem:[%s5835_s1 + $0xa4] ss:$16 sps:$4 sm:$0xff] (!%p181_p8)   ;;  %v4736_v35 = vld [vmem:[%s5835_s1 + $0x68] ss:$16 sps:$4 sm:$0xff] (!%p181_p8)  }
  0x24   : > { %426 = vmatpush1.bf16.msra.mxu0 (!%p181_p8), %v4648_v20  ;;  %v4742_v36 = vld [vmem:[%s5835_s1 + $0x8c] ss:$16 sps:$4 sm:$0xff] (!%p181_p8)   ;;  %v4748_v37 = vld [vmem:[%s5835_s1 + $0xa0] ss:$16 sps:$4 sm:$0xff] (!%p181_p8)   ;;  %v4753_v38 = vld [vmem:[%s5835_s1 + $0xc4] ss:$16 sps:$4 sm:$0xff] (!%p181_p8)  }
  0x25   : > { %427 = vmatprep.subr.bf16.mxu0 %v4654_v21  ;;  %467 = vmatpush1.bf16.msra.mxu1 %v4688_v27  ;;  %v4760_v39 = vld [vmem:[%s5835_s1 + $0x88] ss:$16 sps:$4 sm:$0xff]   ;;  %v4765_v40 = vld [vmem:[%s5835_s1 + $0xc0] ss:$16 sps:$4 sm:$0xff]   ;;  %v4771_v41 = vld [vmem:[%s5835_s1 + $0xac] ss:$16 sps:$4 sm:$0xff]  }
  0x26   : > { %468 = vmatprep.subr.bf16.mxu1 %v4705_v30  ;;  %v4776_v42 = vld [vmem:[%s5835_s1 + $0xe4] ss:$16 sps:$4 sm:$0xff]   ;;  %v4781_v43 = vld [vmem:[%s5835_s1 + $0xa8] ss:$16 sps:$4 sm:$0xff]   ;;  %v4787_v44 = vld [vmem:[%s5835_s1 + $0xcc] ss:$16 sps:$4 sm:$0xff]  }
  0x27   : > { %v4794_v45 = vld [vmem:[%s5835_s1 + $0xe0] ss:$16 sps:$4 sm:$0xff]   ;;  %v4800_v46 = vld [vmem:[%s5835_s1 + $0xc8] ss:$16 sps:$4 sm:$0xff]   ;;  %v4806_v47 = vld [vmem:[%s5835_s1 + $0xec] ss:$16 sps:$4 sm:$0xff]  }
  0x28   : > { %428 = vmatpush1.bf16.msra.mxu0 %v4670_v24  ;;  %v4814_v48 = vld [vmem:[%s5835_s1 + $0xe8] ss:$16 sps:$4 sm:$0xff]   ;;  %s3856_s27 = sshll.u32 %s187_s26, 7  ;;  %s3857_s9 = sshll.u32 %s4534_s11, 3  ;;  %vm645_vm0 = vcmask 1040384   ;;  %vm1528_vm5 = vcmask 1041409  }
  0x29   : > { %429 = vmatprep.subr.bf16.mxu0 %v4677_v25  ;;  %469 = vmatpush1.bf16.msra.mxu1 %v4712_v31  ;;  %s4857_s28 = scalar_lea.vmem [#allocation4], %s3856_s27  ;;  %p213_p9 = scmp.lt.s32.totalorder %s3857_s9, 15  ;;  %vm646_vm1 = vsmask.f32 256  ;;  %vm1087_vm3 = vsmask.f32 7938 }
  0x2a   : > { %470 = vmatprep.subr.bf16.mxu1 %v4718_v32  ;;  %v505_v50 = vld [vmem:[%s4857_s28] sm:$0xff]  ;;  %v506_v54 = vld [vmem:[%s4857_s28 + $0x8] sm:$0xff]  ;;  %vm4886_vm2 = vmand %vm645_vm0, %vm646_vm1  ;;  %vm1529_vm6 = vsmask.f32 1280  ;;  %vm1970_vm8 = vsmask.f32 7942 }
  0x2b   : > { %v507_v51 = vunpack.c.l.bf16 %v505_v50  ;;  %v508_v52 = vunpack.c.h.bf16 %v505_v50  ;;  %v510_v61 = vunpack.c.h.bf16 %v506_v54  ;;  %v509_v3 = vunpack.c.l.bf16 %v506_v54  ;;  %s5860_s9 = smov (!%p213_p9, %s3857_s9), 15  ;;  %vm4966_vm4 = vmand %vm645_vm0, %vm1087_vm3 }
  0x2c   : > { %430 = vmatpush1.bf16.msra.mxu0 %v4695_v28  ;;  %v4546_v50 = vmov 1966171168   ;;  %s3858_s29 = sshll.u32 %s5860_s9, 2  ;;  %vm5222_vm7 = vmand %vm1528_vm5, %vm1529_vm6  ;;  %vm2411_vm10 = vcmask 1042434   ;;  %vm2412_vm11 = vsmask.f32 2304 }
  0x2d   : > { %431 = vmatprep.subr.bf16.mxu0 %v4700_v29  ;;  %471 = vmatpush1.bf16.msra.mxu1 %v4736_v35  ;;  %s4876_s3 = scalar_lea.vmem %s5836_s2, %s3858_s29  ;;  %vm5310_vm9 = vmand %vm1528_vm5, %vm1970_vm8  ;;  %vm2853_vm13 = vsmask.f32 7946  ;;  %vm3294_vm15 = vcmask 1043459   ;;  %vm3295_vm0 = vsmask.f32 3328 }
  0x2e   : > { %472 = vmatprep.subr.bf16.mxu1 %v4742_v36  ;;  %vm5390_vm12 = vmand %vm2411_vm10, %vm2412_vm11 }
  0x2f   : > { %vm5646_vm14 = vmand %vm2411_vm10, %vm2853_vm13 }
  0x30   : > { %432 = vmatpush1.bf16.msra.mxu0 %v4724_v33  ;;  %vm5724_vm1 = vmand %vm3294_vm15, %vm3295_vm0 }
  0x31   : > { %433 = vmatprep.subr.bf16.mxu0 %v4730_v34  ;;  %473 = vmatpush1.bf16.msra.mxu1 %v4760_v39 }
  0x32   : > { %474 = vmatprep.subr.bf16.mxu1 %v4771_v41 }
  0x34   : > { %434 = vmatpush1.bf16.msra.mxu0 %v4748_v37 }
  0x35   : > { %435 = vmatprep.subr.bf16.mxu0 %v4753_v38  ;;  %475 = vmatpush1.bf16.msra.mxu1 %v4781_v43 }
  0x36   : > { %476 = vmatprep.subr.bf16.mxu1 %v4787_v44 }
  0x38   : > { %436 = vmatpush1.bf16.msra.mxu0 %v4765_v40 }
  0x39   : > { %437 = vmatprep.subr.bf16.mxu0 %v4776_v42  ;;  %477 = vmatpush1.bf16.msra.mxu1 %v4800_v46 }
  0x3a   : > { %478 = vmatprep.subr.bf16.mxu1 %v4806_v47 }
  0x3c   : > { %438 = vmatpush1.bf16.msra.mxu0 %v4794_v45 }
  0x3d   : > { %864 = vmatprep.subr.bf16.mxu0 %v4629_v16  ;;  %479 = vmatpush1.bf16.msra.mxu1 %v4814_v48 }
  0x3e   : > { %905 = vmatprep.subr.bf16.mxu1 %v4659_v22 }
  0x3f   : > { %456 = vmatmul.mubr.bf16.vlgmr.msra.gmra.mrb[0].mxu0 %v4545_v49 }
  0x40   : > { %865 = vmatpush1.bf16.msra.mxu0 %v4634_v17  ;;  %896 = vmatprep.mubr.bf16.mxu0 %v4544_v18 }
  0x41   : > { %866 = vmatprep.subr.bf16.mxu0 %v4642_v19  ;;  %497 = vmatmul.mubr.bf16.vlgmr.msra.gmra.mrb[0].mxu1 %v4545_v49 }
  0x42   : > { %906 = vmatpush1.bf16.msra.mxu1 %v4664_v23  ;;  %937 = vmatprep.mubr.bf16.mxu1 %v4544_v18 }
  0x43   : > { %907 = vmatprep.subr.bf16.mxu1 %v4683_v26 }
  0x44   : > { %867 = vmatpush1.bf16.msra.mxu0 %v4648_v20 }
  0x45   : > { %868 = vmatprep.subr.bf16.mxu0 %v4654_v21 }
  0x46   : > { %908 = vmatpush1.bf16.msra.mxu1 %v4688_v27 }
  0x47   : > { %909 = vmatprep.subr.bf16.mxu1 %v4705_v30 }
  0x48   : > { %869 = vmatpush1.bf16.msra.mxu0 %v4670_v24 }
  0x49   : > { %870 = vmatprep.subr.bf16.mxu0 %v4677_v25 }
  0x4a   : > { %910 = vmatpush1.bf16.msra.mxu1 %v4712_v31 }
  0x4b   : > { %911 = vmatprep.subr.bf16.mxu1 %v4718_v32 }
  0x4c   : > { %871 = vmatpush1.bf16.msra.mxu0 %v4695_v28 }
  0x4d   : > { %872 = vmatprep.subr.bf16.mxu0 %v4700_v29 }
  0x4e   : > { %912 = vmatpush1.bf16.msra.mxu1 %v4736_v35 }
  0x4f   : > { %913 = vmatprep.subr.bf16.mxu1 %v4742_v36 }
  0x50   : > { %873 = vmatpush1.bf16.msra.mxu0 %v4724_v33 }
  0x51   : > { %874 = vmatprep.subr.bf16.mxu0 %v4730_v34 }
  0x52   : > { %914 = vmatpush1.bf16.msra.mxu1 %v4760_v39 }
  0x53   : > { %915 = vmatprep.subr.bf16.mxu1 %v4771_v41 }
  0x54   : > { %875 = vmatpush1.bf16.msra.mxu0 %v4748_v37 }
  0x55   : > { %876 = vmatprep.subr.bf16.mxu0 %v4753_v38 }
  0x56   : > { %916 = vmatpush1.bf16.msra.mxu1 %v4781_v43 }
  0x57   : > { %917 = vmatprep.subr.bf16.mxu1 %v4787_v44 }
  0x58   : > { %877 = vmatpush1.bf16.msra.mxu0 %v4765_v40 }
  0x59   : > { %878 = vmatprep.subr.bf16.mxu0 %v4776_v42 }
  0x5a   : > { %918 = vmatpush1.bf16.msra.mxu1 %v4800_v46 }
  0x5b   : > { %919 = vmatprep.subr.bf16.mxu1 %v4806_v47 }
  0x5c   : > { %879 = vmatpush1.bf16.msra.mxu0 %v4794_v45 }
  0x5d   : > { %1305 = vmatprep.subr.bf16.mxu0 %v4629_v16 }
  0x5e   : > { %920 = vmatpush1.bf16.msra.mxu1 %v4814_v48 }
  0x5f   : > { %1346 = vmatprep.subr.bf16.mxu1 %v4659_v22 }
 0x112   : > { %v457_v53 = vpop.f32.mrb[0].mxu0 }
 0x113   : > { %v511_v55 = vadd.f32 %v507_v51, %v457_v53  ;;  %v459_v56 = vpop.f32.mrb[1].mxu0  ;;  %v542_v51 = vunpack.c.l.s4 %v4546_v50 }
 0x114   : > { %v512_v57 = vadd.f32 %v508_v52, %v459_v56  ;;  %v461_v58 = vpop.f32.mrb[2].mxu0  ;;  %v498_v63 = vpop.f32.mrb[0].mxu1  ;;  %v544_v52 = vlaneseq }
 0x115   : > { %v3891_v59 = vmul.f32 -1.442695, %v511_v55  ;;  %v462_v60 = vpop.f32.mrb[3].mxu0  ;;  %v500_v0 = vpop.f32.mrb[1].mxu1  ;;  %v513_v6 = vadd.f32 %v509_v3, %v498_v63  ;;  %v543_v53 = vunpack.c.0.s8 %v542_v51  ;;  %v657_v51 = vld [vmem:[%s4876_s3 + $0xc] sm:$0x1] }
 0x116   : > { %v3892_v62 = vmul.f32 -1.442695, %v512_v57  ;;  %v514_v1 = vadd.f32 %v510_v61, %v500_v0  ;;  %v502_v2 = vpop.f32.mrb[2].mxu1  ;;  %v545_v54 = vshrl.u32 %v544_v52, 7  ;;  %v4547_v57 = vmov 286326784  }
 0x117   : > { %4376 = vpow2.f32 %v3891_v59  ;;  %v503_v4 = vpop.f32.mrb[3].mxu1  ;;  %v582_v58 = vunpack.c.l.s4 %v4547_v57  ;;  %v663_v52 = vld [vmem:[%s4876_s3 + $0x14] sm:$0x1] }
 0x118   : > { %4378 = vpow2.f32 %v3892_v62  ;;  %v3893_v5 = vmul.f32 -1.442695, %v514_v1  ;;  %v4865_v60 = vsub.s32 %v543_v53, %v545_v54  ;;  %v666_v53 = vld [vmem:[%s4876_s3 + $0x18] sm:$0x1] }
 0x119   : > { %v583_v62 = vunpack.c.0.s8 %v582_v58 }
 0x11a   : > { %4380 = vpow2.f32 %v3893_v5 }
 0x11b   : > { %4382 = vtanh.f32 %v513_v6  ;;  %v4878_v2 = vsub.s32 %v583_v62, %v545_v54 }
 0x121   : > { %v4377_v7 = vpop.eup %4376 }
 0x122   : > { %v4379_v8 = vpop.eup %4378  ;;  %v518_v9 = vadd.f32 1.0, %v4377_v7 }
 0x123   : > { %v524_v10 = vadd.f32 1.0, %v4379_v8  ;;  %v648_v8 = vld [vmem:[%s4876_s3] sm:$0x1] }
 0x124   : > { %4384 = vrcp.f32 %v518_v9  ;;  %v4381_v11 = vpop.eup %4380 }
 0x125   : > { %4386 = vrcp.f32 %v524_v10  ;;  %v4383_v12 = vpop.eup %4382  ;;  %v531_v14 = vadd.f32 1.0, %v4381_v11 }
 0x127   : > { %4388 = vrcp.f32 %v531_v14  ;;  %v651_v14 = vld [vmem:[%s4876_s3 + $0x4] sm:$0x1] }
 0x12e   : > { %v4385_v13 = vpop.eup %4384 }
 0x12f   : > { %v4387_v15 = vpop.eup %4386  ;;  %v535_v16 = vmul.f32 %v4385_v13, %v4383_v12 }
 0x130   : > { %v534_v22 = vmul.f32 0.0, %v4387_v15  ;;  %v654_v15 = vld [vmem:[%s4876_s3 + $0x8] sm:$0x1] }
 0x131   : > { %v4389_v55 = vpop.eup %4388 }
 0x132   : > { %v4861_v49 = vadd.f32 %v535_v16, %v534_v22  ;;  %v660_v16 = vld [vmem:[%s4876_s3 + $0x10] sm:$0x1] }
 0x134   : > { %4390 = vtanh.f32 %v4861_v49 }
 0x13e   : > { %v4391_v56 = vpop.eup %4390 }
 0x13f   : > { %v538_v59 = vmul.f32 %v4391_v56, %v4389_v55 }
 0x141   : > { %v539_v61 = vpack.c.bf16 %v538_v59, %v538_v59 }
 0x143   : > { %v547_v63 = vrot.slane %v539_v61, %v4865_v60  ;;  %897 = vmatmul.mubr.bf16.vlgmr.msra.gmra.mrb[4].mxu0 %v539_v61  ;;  %938 = vmatmul.mubr.bf16.vlgmr.msra.gmra.mrb[4].mxu1 %v539_v61  ;;  %v669_v61 = vld [vmem:[%s4876_s3 + $0x1c] sm:$0x1] }
 0x144   : > { %1306 = vmatpush1.bf16.msra.mxu0 %v4634_v17  ;;  %1347 = vmatpush1.bf16.msra.mxu1 %v4664_v23 }
 0x145   : > { %v548_v0 = vcombine.high %v547_v63, %v547_v63  ;;  %v555_v1 = vrot.slane %v547_v63, %v4865_v60  ;;  %1307 = vmatprep.subr.bf16.mxu0 %v4642_v19  ;;  %1348 = vmatprep.subr.bf16.mxu1 %v4683_v26 }
 0x146   : > { %1337 = vmatprep.mubr.bf16.mxu0 %v4544_v18  ;;  %1378 = vmatprep.mubr.bf16.mxu1 %v4544_v18 }
 0x147   : > { %v562_v17 = vrot.slane %v548_v0, %v4865_v60  ;;  %v563_v23 = vcombine.high %v555_v1, %v555_v1  ;;  %v566_v19 = vunpack.i.h.s16 %v555_v1  ;;  %v3894_v3 = vpack.i.b16 %v555_v1, %v555_v1 }
 0x148   : > { %1308 = vmatpush1.bf16.msra.mxu0 %v4648_v20  ;;  %1349 = vmatpush1.bf16.msra.mxu1 %v4688_v27 }
 0x149   : > { %v564_v26 = vcombine.high %v562_v17, %v562_v17  ;;  %v568_v4 = vunpack.i.h.s16 %v562_v17  ;;  %v570_v5 = vunpack.i.h.s16 %v563_v23  ;;  %v574_v6 = vpack.i.b16 %v566_v19, %v566_v19  ;;  %1309 = vmatprep.subr.bf16.mxu0 %v4654_v21  ;;  %1350 = vmatprep.subr.bf16.mxu1 %v4705_v30 }
 0x14a   : > { %v3895_v20 = vpack.i.b16 %v562_v17, %v562_v17  ;;  %v3896_v27 = vpack.i.b16 %v563_v23, %v563_v23  ;;  %v587_v9 = vrot.slane %v3894_v3, %v4878_v2 }
 0x14b   : > { %v572_v10 = vunpack.i.h.s16 %v564_v26  ;;  %v576_v11 = vpack.i.b16 %v568_v4, %v568_v4  ;;  %v578_v12 = vpack.i.b16 %v570_v5, %v570_v5  ;;  %v3897_v13 = vpack.i.b16 %v564_v26, %v564_v26 }
 0x14c   : > { %v594_v22 = vrot.slane %v574_v6, %v4878_v2  ;;  %v601_v21 = vrot.slane %v3895_v20, %v4878_v2  ;;  %v615_v30 = vrot.slane %v3896_v27, %v4878_v2  ;;  %v649_v50 = vsel %vm4886_vm2, %v587_v9, %v648_v8  ;;  %1310 = vmatpush1.bf16.msra.mxu0 %v4670_v24 }
 0x14d   : > { %v580_v54 = vpack.i.b16 %v572_v10, %v572_v10  ;;  %v608_v55 = vrot.slane %v576_v11, %v4878_v2  ;;  %v622_v56 = vrot.slane %v578_v12, %v4878_v2  ;;  %v629_v57 = vrot.slane %v3897_v13, %v4878_v2  ;;  %650 = vst [vmem:[%s4876_s3] sm:$0x1] %v649_v50 }
 0x14e   : > { %1351 = vmatpush1.bf16.msra.mxu1 %v4712_v31  ;;  %v652_v58 = vsel %vm4886_vm2, %v594_v22, %v651_v14  ;;  %v655_v24 = vsel %vm4886_vm2, %v601_v21, %v654_v15  ;;  %v661_v59 = vsel %vm4886_vm2, %v615_v30, %v660_v16  ;;  %1311 = vmatprep.subr.bf16.mxu0 %v4677_v25 }
 0x14f   : > { %1352 = vmatprep.subr.bf16.mxu1 %v4718_v32  ;;  %v636_v62 = vrot.slane %v580_v54, %v4878_v2  ;;  %653 = vst [vmem:[%s4876_s3 + $0x4] sm:$0x1] %v652_v58  ;;  %656 = vst [vmem:[%s4876_s3 + $0x8] sm:$0x1] %v655_v24  ;;  %v658_v31 = vsel %vm4886_vm2, %v608_v55, %v657_v51  ;;  %v664_v63 = vsel %vm4886_vm2, %v622_v56, %v663_v52  ;;  %v5178_v54 = vld [vmem:[%s5835_s1 + $0xe4] ss:$16 sps:$4 sm:$0xff]  }
 0x150   : > { %662 = vst [vmem:[%s4876_s3 + $0x10] sm:$0x1] %v661_v59  ;;  %v667_v0 = vsel %vm4886_vm2, %v629_v57, %v666_v53  ;;  %659 = vst [vmem:[%s4876_s3 + $0xc] sm:$0x1] %v658_v31  ;;  %1312 = vmatpush1.bf16.msra.mxu0 %v4695_v28  ;;  %v3930_v28 = vld [vmem:[%s4857_s28 + $0x10] sm:$0xff] }
 0x151   : > { %665 = vst [vmem:[%s4876_s3 + $0x14] sm:$0x1] %v664_v63  ;;  %668 = vst [vmem:[%s4876_s3 + $0x18] sm:$0x1] %v667_v0  ;;  %v670_v25 = vsel %vm4886_vm2, %v636_v62, %v669_v61  ;;  %1313 = vmatprep.subr.bf16.mxu0 %v4700_v29  ;;  %v949_v29 = vunpack.c.l.bf16 %v3930_v28  ;;  %v950_v32 = vunpack.c.h.bf16 %v3930_v28  ;;  %vm3736_vm2 = vsmask.f32 7950 }
 0x152   : > { %1353 = vmatpush1.bf16.msra.mxu1 %v4736_v35  ;;  %671 = vst [vmem:[%s4876_s3 + $0x1c] sm:$0x1] %v670_v25  ;;  %vm5775_vm3 = vmand %vm3294_vm15, %vm3736_vm2 }
 0x153   : > { %1354 = vmatprep.subr.bf16.mxu1 %v4742_v36  ;;  %v3931_v36 = vld [vmem:[%s4857_s28 + $0x18] sm:$0xff] }
 0x154   : > { %1314 = vmatpush1.bf16.msra.mxu0 %v4724_v33  ;;  %v1089_v62 = vld [vmem:[%s4876_s3] sm:$0x1] }
 0x155   : > { %1315 = vmatprep.subr.bf16.mxu0 %v4730_v34 }
 0x156   : > { %1355 = vmatpush1.bf16.msra.mxu1 %v4760_v39 }
 0x157   : > { %1356 = vmatprep.subr.bf16.mxu1 %v4771_v41 }
 0x158   : > { %1316 = vmatpush1.bf16.msra.mxu0 %v4748_v37 }
 0x159   : > { %1317 = vmatprep.subr.bf16.mxu0 %v4753_v38 }
 0x15a   : > { %1357 = vmatpush1.bf16.msra.mxu1 %v4781_v43 }
 0x15b   : > { %1358 = vmatprep.subr.bf16.mxu1 %v4787_v44 }
 0x15c   : > { %1318 = vmatpush1.bf16.msra.mxu0 %v4765_v40 }
 0x15d   : > { %1319 = vmatprep.subr.bf16.mxu0 %v4776_v42 }
 0x15e   : > { %1359 = vmatpush1.bf16.msra.mxu1 %v4800_v46 }
 0x15f   : > { %1360 = vmatprep.subr.bf16.mxu1 %v4806_v47  ;;  %v952_v47 = vunpack.c.h.bf16 %v3931_v36 }
 0x160   : > { %1320 = vmatpush1.bf16.msra.mxu0 %v4794_v45 }
 0x162   : > { %1361 = vmatpush1.bf16.msra.mxu1 %v4814_v48  ;;  %v951_v48 = vunpack.c.l.bf16 %v3931_v36  ;;  %v1101_v36 = vld [vmem:[%s4876_s3 + $0x10] sm:$0x1] }
 0x216   : > { %v898_v33 = vpop.f32.mrb[4].mxu0  ;;  %v939_v34 = vpop.f32.mrb[4].mxu1 }
 0x217   : > { %v953_v35 = vadd.f32 %v949_v29, %v898_v33  ;;  %v900_v37 = vpop.f32.mrb[5].mxu0  ;;  %v941_v38 = vpop.f32.mrb[5].mxu1  ;;  %v955_v17 = vadd.f32 %v951_v48, %v939_v34  ;;  %v1092_v34 = vld [vmem:[%s4876_s3 + $0x4] sm:$0x1] }
 0x218   : > { %v954_v39 = vadd.f32 %v950_v32, %v900_v37  ;;  %v902_v40 = vpop.f32.mrb[6].mxu0  ;;  %v943_v41 = vpop.f32.mrb[6].mxu1  ;;  %v956_v45 = vadd.f32 %v952_v47, %v941_v38 }
 0x219   : > { %v3932_v43 = vmul.f32 -1.442695, %v953_v35  ;;  %v903_v42 = vpop.f32.mrb[7].mxu0  ;;  %v944_v44 = vpop.f32.mrb[7].mxu1  ;;  %v1095_v35 = vld [vmem:[%s4876_s3 + $0x8] sm:$0x1] }
 0x21a   : > { %v3933_v46 = vmul.f32 -1.442695, %v954_v39  ;;  %v3934_v1 = vmul.f32 -1.442695, %v956_v45  ;;  %v1098_v39 = vld [vmem:[%s4876_s3 + $0xc] sm:$0x1] }
 0x21b   : > { %4392 = vpow2.f32 %v3932_v43  ;;  %v1104_v41 = vld [vmem:[%s4876_s3 + $0x14] sm:$0x1]  ;;  %v1107_v43 = vld [vmem:[%s4876_s3 + $0x18] sm:$0x1]  ;;  %v1110_v45 = vld [vmem:[%s4876_s3 + $0x1c] sm:$0x1] }
 0x21c   : > { %4394 = vpow2.f32 %v3933_v46 }
 0x21d   : > { %4396 = vpow2.f32 %v3934_v1  ;;  %v5013_v1 = vld [vmem:[%s5835_s1 + $0x4] ss:$16 sps:$4 sm:$0xff]  }
 0x21e   : > { %4398 = vtanh.f32 %v955_v17  ;;  %v5018_v17 = vld [vmem:[%s5835_s1 + $0xc] ss:$16 sps:$4 sm:$0xff]   ;;  %1747 = vmatprep.subr.bf16.mxu0 %v5013_v1 }
 0x21f   : > { %1788 = vmatprep.subr.bf16.mxu1 %v5018_v17 }
 0x225   : > { %v4393_v23 = vpop.eup %4392 }
 0x226   : > { %v4395_v19 = vpop.eup %4394  ;;  %v960_v3 = vadd.f32 1.0, %v4393_v23  ;;  %v5023_v23 = vld [vmem:[%s5835_s1] ss:$16 sps:$4 sm:$0xff]  }
 0x227   : > { %v966_v26 = vadd.f32 1.0, %v4395_v19  ;;  %v4397_v4 = vpop.eup %4396  ;;  %v5028_v19 = vld [vmem:[%s5835_s1 + $0x8] ss:$16 sps:$4 sm:$0xff]  }
 0x228   : > { %4400 = vrcp.f32 %v960_v3  ;;  %v4399_v5 = vpop.eup %4398  ;;  %v973_v20 = vadd.f32 1.0, %v4397_v4  ;;  %v5037_v3 = vld [vmem:[%s5835_s1 + $0x24] ss:$16 sps:$4 sm:$0xff]   ;;  %v5047_v4 = vld [vmem:[%s5835_s1 + $0x20] ss:$16 sps:$4 sm:$0xff]  }
 0x229   : > { %4402 = vrcp.f32 %v966_v26  ;;  %v5042_v26 = vld [vmem:[%s5835_s1 + $0x2c] ss:$16 sps:$4 sm:$0xff]  }
 0x22a   : > { %4404 = vrcp.f32 %v973_v20  ;;  %v5076_v20 = vld [vmem:[%s5835_s1 + $0x48] ss:$16 sps:$4 sm:$0xff]  }
 0x232   : > { %v4401_v6 = vpop.eup %4400 }
 0x233   : > { %v4403_v7 = vpop.eup %4402  ;;  %v977_v8 = vmul.f32 %v4401_v6, %v4399_v5  ;;  %v5052_v5 = vld [vmem:[%s5835_s1 + $0x28] ss:$16 sps:$4 sm:$0xff]   ;;  %v5061_v6 = vld [vmem:[%s5835_s1 + $0x44] ss:$16 sps:$4 sm:$0xff]  }
 0x234   : > { %v976_v27 = vmul.f32 %v4403_v7, %v4861_v49  ;;  %v4405_v10 = vpop.eup %4404  ;;  %v5066_v7 = vld [vmem:[%s5835_s1 + $0x4c] ss:$16 sps:$4 sm:$0xff]  }
 0x236   : > { %v4957_v9 = vadd.f32 %v977_v8, %v976_v27  ;;  %v5071_v8 = vld [vmem:[%s5835_s1 + $0x40] ss:$16 sps:$4 sm:$0xff]   ;;  %v5085_v27 = vld [vmem:[%s5835_s1 + $0x64] ss:$16 sps:$4 sm:$0xff]  }
 0x238   : > { %4406 = vtanh.f32 %v4957_v9 }
 0x242   : > { %v4407_v11 = vpop.eup %4406 }
 0x243   : > { %v980_v12 = vmul.f32 %v4407_v11, %v4405_v10  ;;  %v5090_v10 = vld [vmem:[%s5835_s1 + $0x6c] ss:$16 sps:$4 sm:$0xff]   ;;  %v5095_v11 = vld [vmem:[%s5835_s1 + $0x60] ss:$16 sps:$4 sm:$0xff]  }
 0x245   : > { %v981_v13 = vpack.c.bf16 %v980_v12, %v980_v12  ;;  %v5100_v12 = vld [vmem:[%s5835_s1 + $0x68] ss:$16 sps:$4 sm:$0xff]  }
 0x247   : > { %v989_v14 = vrot.slane %v981_v13, %v4865_v60  ;;  %1338 = vmatmul.mubr.bf16.vlgmr.msra.gmra.mrb[8].mxu0 %v981_v13  ;;  %1379 = vmatmul.mubr.bf16.vlgmr.msra.gmra.mrb[8].mxu1 %v981_v13  ;;  %v5109_v13 = vld [vmem:[%s5835_s1 + $0x80] ss:$16 sps:$4 sm:$0xff]  }
 0x248   : > { %1779 = vmatprep.mubr.bf16.mxu0 %v4544_v18  ;;  %1820 = vmatprep.mubr.bf16.mxu1 %v4544_v18 }
 0x249   : > { %v990_v15 = vcombine.high %v989_v14, %v989_v14  ;;  %v997_v49 = vrot.slane %v989_v14, %v4865_v60  ;;  %1748 = vmatpush1.bf16.msra.mxu0 %v5023_v23  ;;  %1789 = vmatpush1.bf16.msra.mxu1 %v5028_v19  ;;  %v5114_v14 = vld [vmem:[%s5835_s1 + $0x84] ss:$16 sps:$4 sm:$0xff]  }
 0x24a   : > { %1749 = vmatprep.subr.bf16.mxu0 %v5037_v3  ;;  %1790 = vmatprep.subr.bf16.mxu1 %v5042_v26 }
 0x24b   : > { %v1004_v16 = vrot.slane %v990_v15, %v4865_v60  ;;  %v1005_v22 = vcombine.high %v997_v49, %v997_v49  ;;  %v1008_v21 = vunpack.i.h.s16 %v997_v49  ;;  %v3935_v30 = vpack.i.b16 %v997_v49, %v997_v49  ;;  %v5119_v15 = vld [vmem:[%s5835_s1 + $0x88] ss:$16 sps:$4 sm:$0xff]   ;;  %v5124_v49 = vld [vmem:[%s5835_s1 + $0x8c] ss:$16 sps:$4 sm:$0xff]  }
 0x24d   : > { %v1006_v50 = vcombine.high %v1004_v16, %v1004_v16  ;;  %v1010_v51 = vunpack.i.h.s16 %v1004_v16  ;;  %v1012_v52 = vunpack.i.h.s16 %v1005_v22  ;;  %v1016_v53 = vpack.i.b16 %v1008_v21, %v1008_v21  ;;  %1750 = vmatpush1.bf16.msra.mxu0 %v5047_v4  ;;  %1791 = vmatpush1.bf16.msra.mxu1 %v5052_v5  ;;  %v5142_v21 = vld [vmem:[%s5835_s1 + $0xa0] ss:$16 sps:$4 sm:$0xff]  }
 0x24e   : > { %v3936_v55 = vpack.i.b16 %v1004_v16, %v1004_v16  ;;  %v3937_v56 = vpack.i.b16 %v1005_v22, %v1005_v22  ;;  %v1029_v57 = vrot.slane %v3935_v30, %v4878_v2  ;;  %1751 = vmatprep.subr.bf16.mxu0 %v5061_v6  ;;  %1792 = vmatprep.subr.bf16.mxu1 %v5066_v7  ;;  %v5129_v16 = vld [vmem:[%s5835_s1 + $0xa4] ss:$16 sps:$4 sm:$0xff]   ;;  %v5135_v22 = vld [vmem:[%s5835_s1 + $0xac] ss:$16 sps:$4 sm:$0xff]   ;;  %v5149_v30 = vld [vmem:[%s5835_s1 + $0xa8] ss:$16 sps:$4 sm:$0xff]  }
 0x24f   : > { %v1014_v58 = vunpack.i.h.s16 %v1006_v50  ;;  %v1018_v24 = vpack.i.b16 %v1010_v51, %v1010_v51  ;;  %v1020_v59 = vpack.i.b16 %v1012_v52, %v1012_v52  ;;  %v3938_v61 = vpack.i.b16 %v1006_v50, %v1006_v50  ;;  %v5154_v50 = vld [vmem:[%s5835_s1 + $0xc4] ss:$16 sps:$4 sm:$0xff]   ;;  %v5160_v51 = vld [vmem:[%s5835_s1 + $0xcc] ss:$16 sps:$4 sm:$0xff]   ;;  %v5166_v52 = vld [vmem:[%s5835_s1 + $0xc0] ss:$16 sps:$4 sm:$0xff]  }
 0x250   : > { %v1036_v31 = vrot.slane %v1016_v53, %v4878_v2  ;;  %v1043_v63 = vrot.slane %v3936_v55, %v4878_v2  ;;  %v1057_v0 = vrot.slane %v3937_v56, %v4878_v2  ;;  %v1090_v25 = vsel %vm4966_vm4, %v1029_v57, %v1089_v62  ;;  %v5173_v53 = vld [vmem:[%s5835_s1 + $0xc8] ss:$16 sps:$4 sm:$0xff]   ;;  %v5184_v55 = vld [vmem:[%s5835_s1 + $0xec] ss:$16 sps:$4 sm:$0xff]   ;;  %v5190_v56 = vld [vmem:[%s5835_s1 + $0xe0] ss:$16 sps:$4 sm:$0xff]  }
 0x251   : > { %v1022_v28 = vpack.i.b16 %v1014_v58, %v1014_v58  ;;  %v1050_v29 = vrot.slane %v1018_v24, %v4878_v2  ;;  %v1064_v32 = vrot.slane %v1020_v59, %v4878_v2  ;;  %v1071_v33 = vrot.slane %v3938_v61, %v4878_v2  ;;  %1091 = vst [vmem:[%s4876_s3] sm:$0x1] %v1090_v25  ;;  %v5197_v57 = vld [vmem:[%s5835_s1 + $0xe8] ss:$16 sps:$4 sm:$0xff]   ;;  %v3971_v58 = vld [vmem:[%s4857_s28 + $0x20] sm:$0xff] }
 0x252   : > { %v1093_v37 = vsel %vm4966_vm4, %v1036_v31, %v1092_v34  ;;  %v1096_v38 = vsel %vm4966_vm4, %v1043_v63, %v1095_v35  ;;  %v1102_v40 = vsel %vm4966_vm4, %v1057_v0, %v1101_v36  ;;  %1752 = vmatpush1.bf16.msra.mxu0 %v5071_v8  ;;  %1793 = vmatpush1.bf16.msra.mxu1 %v5076_v20  ;;  %v1390_v24 = vunpack.c.l.bf16 %v3971_v58  ;;  %v3972_v63 = vld [vmem:[%s4857_s28 + $0x28] sm:$0xff] }
 0x253   : > { %v1078_v42 = vrot.slane %v1022_v28, %v4878_v2  ;;  %1094 = vst [vmem:[%s4876_s3 + $0x4] sm:$0x1] %v1093_v37  ;;  %1097 = vst [vmem:[%s4876_s3 + $0x8] sm:$0x1] %v1096_v38  ;;  %v1099_v44 = vsel %vm4966_vm4, %v1050_v29, %v1098_v39  ;;  %v1105_v46 = vsel %vm4966_vm4, %v1064_v32, %v1104_v41  ;;  %1753 = vmatprep.subr.bf16.mxu0 %v5085_v27 }
 0x254   : > { %1103 = vst [vmem:[%s4876_s3 + $0x10] sm:$0x1] %v1102_v40  ;;  %v1108_v47 = vsel %vm4966_vm4, %v1071_v33, %v1107_v43  ;;  %1100 = vst [vmem:[%s4876_s3 + $0xc] sm:$0x1] %v1099_v44  ;;  %1794 = vmatprep.subr.bf16.mxu1 %v5090_v10  ;;  %v1391_v59 = vunpack.c.h.bf16 %v3971_v58  ;;  %v1393_v37 = vunpack.c.h.bf16 %v3972_v63  ;;  %v1392_v39 = vunpack.c.l.bf16 %v3972_v63 }
 0x255   : > { %1106 = vst [vmem:[%s4876_s3 + $0x14] sm:$0x1] %v1105_v46  ;;  %1109 = vst [vmem:[%s4876_s3 + $0x18] sm:$0x1] %v1108_v47  ;;  %v1111_v48 = vsel %vm4966_vm4, %v1078_v42, %v1110_v45 }
 0x256   : > { %1112 = vst [vmem:[%s4876_s3 + $0x1c] sm:$0x1] %v1111_v48  ;;  %1754 = vmatpush1.bf16.msra.mxu0 %v5095_v11  ;;  %1795 = vmatpush1.bf16.msra.mxu1 %v5100_v12 }
 0x257   : > { %1755 = vmatprep.subr.bf16.mxu0 %v5114_v14  ;;  %1796 = vmatprep.subr.bf16.mxu1 %v5124_v49 }
 0x25a   : > { %1756 = vmatpush1.bf16.msra.mxu0 %v5109_v13  ;;  %1797 = vmatpush1.bf16.msra.mxu1 %v5119_v15 }
 0x25b   : > { %1757 = vmatprep.subr.bf16.mxu0 %v5129_v16  ;;  %1798 = vmatprep.subr.bf16.mxu1 %v5135_v22 }
 0x25e   : > { %1758 = vmatpush1.bf16.msra.mxu0 %v5142_v21  ;;  %1799 = vmatpush1.bf16.msra.mxu1 %v5149_v30 }
 0x25f   : > { %1759 = vmatprep.subr.bf16.mxu0 %v5154_v50  ;;  %1800 = vmatprep.subr.bf16.mxu1 %v5160_v51 }
 0x262   : > { %1760 = vmatpush1.bf16.msra.mxu0 %v5166_v52  ;;  %1801 = vmatpush1.bf16.msra.mxu1 %v5173_v53 }
 0x263   : > { %1761 = vmatprep.subr.bf16.mxu0 %v5178_v54  ;;  %1802 = vmatprep.subr.bf16.mxu1 %v5184_v55 }
 0x266   : > { %1762 = vmatpush1.bf16.msra.mxu0 %v5190_v56  ;;  %1803 = vmatpush1.bf16.msra.mxu1 %v5197_v57 }
 0x267   : > { %2188 = vmatprep.subr.bf16.mxu0 %v5013_v1  ;;  %2229 = vmatprep.subr.bf16.mxu1 %v5018_v17 }
 0x31a   : > { %v1339_v61 = vpop.f32.mrb[8].mxu0  ;;  %v1380_v62 = vpop.f32.mrb[8].mxu1 }
 0x31b   : > { %v1394_v31 = vadd.f32 %v1390_v24, %v1339_v61  ;;  %v1341_v0 = vpop.f32.mrb[9].mxu0  ;;  %v1382_v25 = vpop.f32.mrb[9].mxu1  ;;  %v1396_v41 = vadd.f32 %v1392_v39, %v1380_v62 }
 0x31c   : > { %v1395_v28 = vadd.f32 %v1391_v59, %v1341_v0  ;;  %v1343_v29 = vpop.f32.mrb[10].mxu0  ;;  %v1384_v32 = vpop.f32.mrb[10].mxu1  ;;  %v1397_v38 = vadd.f32 %v1393_v37, %v1382_v25 }
 0x31d   : > { %v3973_v33 = vmul.f32 -1.442695, %v1394_v31  ;;  %v1344_v34 = vpop.f32.mrb[11].mxu0  ;;  %v1385_v35 = vpop.f32.mrb[11].mxu1 }
 0x31e   : > { %v3974_v36 = vmul.f32 -1.442695, %v1395_v28  ;;  %v3975_v40 = vmul.f32 -1.442695, %v1397_v38 }
 0x31f   : > { %4408 = vpow2.f32 %v3973_v33 }
 0x320   : > { %4410 = vpow2.f32 %v3974_v36 }
 0x321   : > { %4412 = vpow2.f32 %v3975_v40  ;;  %v4012_v40 = vld [vmem:[%s4857_s28 + $0x30] sm:$0xff] }
 0x322   : > { %4414 = vtanh.f32 %v1396_v41  ;;  %v1531_v41 = vld [vmem:[%s4876_s3] sm:$0x2] }
 0x329   : > { %v4409_v43 = vpop.eup %4408 }
 0x32a   : > { %v4411_v42 = vpop.eup %4410  ;;  %v1401_v44 = vadd.f32 1.0, %v4409_v43 }
 0x32b   : > { %v1407_v46 = vadd.f32 1.0, %v4411_v42  ;;  %v4413_v47 = vpop.eup %4412 }
 0x32c   : > { %4416 = vrcp.f32 %v1401_v44  ;;  %v4415_v45 = vpop.eup %4414  ;;  %v1414_v59 = vadd.f32 1.0, %v4413_v47 }
 0x32d   : > { %4418 = vrcp.f32 %v1407_v46 }
 0x32e   : > { %4420 = vrcp.f32 %v1414_v59  ;;  %v1543_v59 = vld [vmem:[%s4876_s3 + $0x10] sm:$0x2] }
 0x336   : > { %v4417_v48 = vpop.eup %4416 }
 0x337   : > { %v4419_v58 = vpop.eup %4418  ;;  %v1418_v24 = vmul.f32 %v4417_v48, %v4415_v45 }
 0x338   : > { %v1417_v61 = vmul.f32 %v4419_v58, %v4957_v9  ;;  %v4421_v62 = vpop.eup %4420  ;;  %v1534_v58 = vld [vmem:[%s4876_s3 + $0x4] sm:$0x2] }
 0x33a   : > { %v5207_v31 = vadd.f32 %v1418_v24, %v1417_v61  ;;  %v1537_v24 = vld [vmem:[%s4876_s3 + $0x8] sm:$0x2] }
 0x33c   : > { %4422 = vtanh.f32 %v5207_v31 }
 0x346   : > { %v4423_v63 = vpop.eup %4422 }
 0x347   : > { %v1421_v0 = vmul.f32 %v4423_v63, %v4421_v62 }
 0x349   : > { %v1422_v25 = vpack.c.bf16 %v1421_v0, %v1421_v0 }
 0x34b   : > { %v1430_v28 = vrot.slane %v1422_v25, %v4865_v60  ;;  %1780 = vmatmul.mubr.bf16.vlgmr.msra.gmra.mrb[12].mxu0 %v1422_v25  ;;  %1821 = vmatmul.mubr.bf16.vlgmr.msra.gmra.mrb[12].mxu1 %v1422_v25  ;;  %v1540_v25 = vld [vmem:[%s4876_s3 + $0xc] sm:$0x2] }
 0x34c   : > { %2189 = vmatpush1.bf16.msra.mxu0 %v5023_v23  ;;  %2230 = vmatpush1.bf16.msra.mxu1 %v5028_v19 }
 0x34d   : > { %v1431_v29 = vcombine.high %v1430_v28, %v1430_v28  ;;  %v1438_v9 = vrot.slane %v1430_v28, %v4865_v60  ;;  %2190 = vmatprep.subr.bf16.mxu0 %v5037_v3  ;;  %2231 = vmatprep.subr.bf16.mxu1 %v5042_v26  ;;  %v1546_v28 = vld [vmem:[%s4876_s3 + $0x14] sm:$0x2] }
 0x34e   : > { %2220 = vmatprep.mubr.bf16.mxu0 %v4544_v18  ;;  %2261 = vmatprep.mubr.bf16.mxu1 %v4544_v18 }
 0x34f   : > { %v1445_v32 = vrot.slane %v1431_v29, %v4865_v60  ;;  %v1446_v33 = vcombine.high %v1438_v9, %v1438_v9  ;;  %v1449_v34 = vunpack.i.h.s16 %v1438_v9  ;;  %v3976_v35 = vpack.i.b16 %v1438_v9, %v1438_v9  ;;  %v1549_v29 = vld [vmem:[%s4876_s3 + $0x18] sm:$0x2] }
 0x350   : > { %2191 = vmatpush1.bf16.msra.mxu0 %v5047_v4  ;;  %2232 = vmatpush1.bf16.msra.mxu1 %v5052_v5 }
 0x351   : > { %v1447_v36 = vcombine.high %v1445_v32, %v1445_v32  ;;  %v1451_v37 = vunpack.i.h.s16 %v1445_v32  ;;  %v1453_v38 = vunpack.i.h.s16 %v1446_v33  ;;  %v1457_v39 = vpack.i.b16 %v1449_v34, %v1449_v34  ;;  %2192 = vmatprep.subr.bf16.mxu0 %v5061_v6  ;;  %2233 = vmatprep.subr.bf16.mxu1 %v5066_v7 }
 0x352   : > { %v3977_v43 = vpack.i.b16 %v1445_v32, %v1445_v32  ;;  %v3978_v42 = vpack.i.b16 %v1446_v33, %v1446_v33  ;;  %v1470_v44 = vrot.slane %v3976_v35, %v4878_v2 }
 0x353   : > { %v1455_v46 = vunpack.i.h.s16 %v1447_v36  ;;  %v1459_v47 = vpack.i.b16 %v1451_v37, %v1451_v37  ;;  %v1461_v45 = vpack.i.b16 %v1453_v38, %v1453_v38  ;;  %v3979_v48 = vpack.i.b16 %v1447_v36, %v1447_v36  ;;  %v1552_v38 = vld [vmem:[%s4876_s3 + $0x1c] sm:$0x2] }
 0x354   : > { %v1477_v61 = vrot.slane %v1457_v39, %v4878_v2  ;;  %v1484_v62 = vrot.slane %v3977_v43, %v4878_v2  ;;  %v1498_v63 = vrot.slane %v3978_v42, %v4878_v2  ;;  %v1532_v0 = vsel %vm5222_vm7, %v1470_v44, %v1531_v41  ;;  %2193 = vmatpush1.bf16.msra.mxu0 %v5071_v8 }
 0x355   : > { %v1463_v9 = vpack.i.b16 %v1455_v46, %v1455_v46  ;;  %v1491_v32 = vrot.slane %v1459_v47, %v4878_v2  ;;  %v1505_v33 = vrot.slane %v1461_v45, %v4878_v2  ;;  %v1512_v34 = vrot.slane %v3979_v48, %v4878_v2  ;;  %1533 = vst [vmem:[%s4876_s3] sm:$0x2] %v1532_v0 }
 0x356   : > { %2234 = vmatpush1.bf16.msra.mxu1 %v5076_v20  ;;  %v1535_v35 = vsel %vm5222_vm7, %v1477_v61, %v1534_v58  ;;  %v1538_v36 = vsel %vm5222_vm7, %v1484_v62, %v1537_v24  ;;  %v1544_v37 = vsel %vm5222_vm7, %v1498_v63, %v1543_v59  ;;  %2194 = vmatprep.subr.bf16.mxu0 %v5085_v27  ;;  %v1832_v46 = vunpack.c.l.bf16 %v4012_v40  ;;  %v4013_v24 = vld [vmem:[%s4857_s28 + $0x38] sm:$0xff] }
 0x357   : > { %2235 = vmatprep.subr.bf16.mxu1 %v5090_v10  ;;  %v1519_v39 = vrot.slane %v1463_v9, %v4878_v2  ;;  %1536 = vst [vmem:[%s4876_s3 + $0x4] sm:$0x2] %v1535_v35  ;;  %1539 = vst [vmem:[%s4876_s3 + $0x8] sm:$0x2] %v1538_v36  ;;  %v1541_v41 = vsel %vm5222_vm7, %v1491_v32, %v1540_v25  ;;  %v1547_v43 = vsel %vm5222_vm7, %v1505_v33, %v1546_v28 }
 0x358   : > { %1545 = vst [vmem:[%s4876_s3 + $0x10] sm:$0x2] %v1544_v37  ;;  %v1550_v42 = vsel %vm5222_vm7, %v1512_v34, %v1549_v29  ;;  %1542 = vst [vmem:[%s4876_s3 + $0xc] sm:$0x2] %v1541_v41  ;;  %2195 = vmatpush1.bf16.msra.mxu0 %v5095_v11  ;;  %v1833_v47 = vunpack.c.h.bf16 %v4012_v40  ;;  %v1835_v32 = vunpack.c.h.bf16 %v4013_v24 }
 0x359   : > { %1548 = vst [vmem:[%s4876_s3 + $0x14] sm:$0x2] %v1547_v43  ;;  %1551 = vst [vmem:[%s4876_s3 + $0x18] sm:$0x2] %v1550_v42  ;;  %v1553_v44 = vsel %vm5222_vm7, %v1519_v39, %v1552_v38  ;;  %2196 = vmatprep.subr.bf16.mxu0 %v5114_v14 }
 0x35a   : > { %2236 = vmatpush1.bf16.msra.mxu1 %v5100_v12  ;;  %1554 = vst [vmem:[%s4876_s3 + $0x1c] sm:$0x2] %v1553_v44 }
 0x35b   : > { %2237 = vmatprep.subr.bf16.mxu1 %v5124_v49 }
 0x35c   : > { %2197 = vmatpush1.bf16.msra.mxu0 %v5109_v13 }
 0x35d   : > { %2198 = vmatprep.subr.bf16.mxu0 %v5129_v16 }
 0x35e   : > { %2238 = vmatpush1.bf16.msra.mxu1 %v5119_v15 }
 0x35f   : > { %2239 = vmatprep.subr.bf16.mxu1 %v5135_v22 }
 0x360   : > { %2199 = vmatpush1.bf16.msra.mxu0 %v5142_v21 }
 0x361   : > { %2200 = vmatprep.subr.bf16.mxu0 %v5154_v50 }
 0x362   : > { %2240 = vmatpush1.bf16.msra.mxu1 %v5149_v30 }
 0x363   : > { %2241 = vmatprep.subr.bf16.mxu1 %v5160_v51 }
 0x364   : > { %2201 = vmatpush1.bf16.msra.mxu0 %v5166_v52 }
 0x365   : > { %2202 = vmatprep.subr.bf16.mxu0 %v5178_v54 }
 0x366   : > { %2242 = vmatpush1.bf16.msra.mxu1 %v5173_v53 }
 0x367   : > { %2243 = vmatprep.subr.bf16.mxu1 %v5184_v55 }
 0x368   : > { %2203 = vmatpush1.bf16.msra.mxu0 %v5190_v56 }
 0x369   : > { %2630 = vmatprep.subr.bf16.mxu0 %v5013_v1 }
 0x36a   : > { %2244 = vmatpush1.bf16.msra.mxu1 %v5197_v57 }
 0x36b   : > { %2671 = vmatprep.subr.bf16.mxu1 %v5018_v17  ;;  %v1834_v17 = vunpack.c.l.bf16 %v4013_v24 }
 0x41e   : > { %v1781_v45 = vpop.f32.mrb[12].mxu0  ;;  %v1822_v48 = vpop.f32.mrb[12].mxu1 }
 0x41f   : > { %v1836_v58 = vadd.f32 %v1832_v46, %v1781_v45  ;;  %v1783_v59 = vpop.f32.mrb[13].mxu0  ;;  %v1824_v61 = vpop.f32.mrb[13].mxu1  ;;  %v1838_v34 = vadd.f32 %v1834_v17, %v1822_v48 }
 0x420   : > { %v1837_v62 = vadd.f32 %v1833_v47, %v1783_v59  ;;  %v1785_v63 = vpop.f32.mrb[14].mxu0  ;;  %v1826_v0 = vpop.f32.mrb[14].mxu1  ;;  %v1839_v1 = vadd.f32 %v1835_v32, %v1824_v61 }
 0x421   : > { %v4014_v25 = vmul.f32 -1.442695, %v1836_v58  ;;  %v1786_v28 = vpop.f32.mrb[15].mxu0  ;;  %v1827_v29 = vpop.f32.mrb[15].mxu1 }
 0x422   : > { %v4015_v9 = vmul.f32 -1.442695, %v1837_v62  ;;  %v4016_v33 = vmul.f32 -1.442695, %v1839_v1 }
 0x423   : > { %4424 = vpow2.f32 %v4014_v25 }
 0x424   : > { %4426 = vpow2.f32 %v4015_v9 }
 0x425   : > { %4428 = vpow2.f32 %v4016_v33  ;;  %v1972_v33 = vld [vmem:[%s4876_s3] sm:$0x2] }
 0x426   : > { %4430 = vtanh.f32 %v1838_v34 }
 0x42d   : > { %v4425_v35 = vpop.eup %4424 }
 0x42e   : > { %v4427_v36 = vpop.eup %4426  ;;  %v1843_v37 = vadd.f32 1.0, %v4425_v35 }
 0x42f   : > { %v1849_v38 = vadd.f32 1.0, %v4427_v36  ;;  %v4429_v39 = vpop.eup %4428 }
 0x430   : > { %4432 = vrcp.f32 %v1843_v37  ;;  %v4431_v41 = vpop.eup %4430  ;;  %v1856_v40 = vadd.f32 1.0, %v4429_v39 }
 0x431   : > { %4434 = vrcp.f32 %v1849_v38 }
 0x432   : > { %4436 = vrcp.f32 %v1856_v40  ;;  %v1981_v40 = vld [vmem:[%s4876_s3 + $0xc] sm:$0x2] }
 0x43a   : > { %v4433_v43 = vpop.eup %4432 }
 0x43b   : > { %v4435_v42 = vpop.eup %4434  ;;  %v1860_v44 = vmul.f32 %v4433_v43, %v4431_v41  ;;  %v1975_v41 = vld [vmem:[%s4876_s3 + $0x4] sm:$0x2]  ;;  %v1978_v43 = vld [vmem:[%s4876_s3 + $0x8] sm:$0x2] }
 0x43c   : > { %v1859_v46 = vmul.f32 %v4435_v42, %v5207_v31  ;;  %v4437_v45 = vpop.eup %4436  ;;  %v1984_v42 = vld [vmem:[%s4876_s3 + $0x10] sm:$0x2] }
 0x43e   : > { %v5295_v47 = vadd.f32 %v1860_v44, %v1859_v46 }
 0x440   : > { %4438 = vtanh.f32 %v5295_v47 }
 0x44a   : > { %v4439_v48 = vpop.eup %4438 }
 0x44b   : > { %v1863_v58 = vmul.f32 %v4439_v48, %v4437_v45  ;;  %v1987_v45 = vld [vmem:[%s4876_s3 + $0x14] sm:$0x2]  ;;  %v1990_v48 = vld [vmem:[%s4876_s3 + $0x18] sm:$0x2] }
 0x44d   : > { %v1864_v24 = vpack.c.bf16 %v1863_v58, %v1863_v58 }
 0x44f   : > { %v1872_v59 = vrot.slane %v1864_v24, %v4865_v60  ;;  %2221 = vmatmul.mubr.bf16.vlgmr.msra.gmra.mrb[16].mxu0 %v1864_v24  ;;  %2262 = vmatmul.mubr.bf16.vlgmr.msra.gmra.mrb[16].mxu1 %v1864_v24 }
 0x450   : > { %2631 = vmatpush1.bf16.msra.mxu0 %v5023_v23  ;;  %2672 = vmatpush1.bf16.msra.mxu1 %v5028_v19 }
 0x451   : > { %v1873_v61 = vcombine.high %v1872_v59, %v1872_v59  ;;  %v1880_v31 = vrot.slane %v1872_v59, %v4865_v60  ;;  %2632 = vmatprep.subr.bf16.mxu0 %v5037_v3  ;;  %2673 = vmatprep.subr.bf16.mxu1 %v5042_v26 }
 0x452   : > { %2662 = vmatprep.mubr.bf16.mxu0 %v4544_v18  ;;  %2703 = vmatprep.mubr.bf16.mxu1 %v4544_v18 }
 0x453   : > { %v1887_v62 = vrot.slane %v1873_v61, %v4865_v60  ;;  %v1888_v63 = vcombine.high %v1880_v31, %v1880_v31  ;;  %v1891_v0 = vunpack.i.h.s16 %v1880_v31  ;;  %v4017_v25 = vpack.i.b16 %v1880_v31, %v1880_v31 }
 0x454   : > { %2633 = vmatpush1.bf16.msra.mxu0 %v5047_v4  ;;  %2674 = vmatpush1.bf16.msra.mxu1 %v5052_v5 }
 0x455   : > { %v1889_v23 = vcombine.high %v1887_v62, %v1887_v62  ;;  %v1893_v19 = vunpack.i.h.s16 %v1887_v62  ;;  %v1895_v3 = vunpack.i.h.s16 %v1888_v63  ;;  %v1899_v28 = vpack.i.b16 %v1891_v0, %v1891_v0  ;;  %2634 = vmatprep.subr.bf16.mxu0 %v5061_v6  ;;  %2675 = vmatprep.subr.bf16.mxu1 %v5066_v7 }
 0x456   : > { %v4018_v29 = vpack.i.b16 %v1887_v62, %v1887_v62  ;;  %v4019_v9 = vpack.i.b16 %v1888_v63, %v1888_v63  ;;  %v1912_v4 = vrot.slane %v4017_v25, %v4878_v2 }
 0x457   : > { %v1897_v5 = vunpack.i.h.s16 %v1889_v23  ;;  %v1901_v32 = vpack.i.b16 %v1893_v19, %v1893_v19  ;;  %v1903_v1 = vpack.i.b16 %v1895_v3, %v1895_v3  ;;  %v4020_v17 = vpack.i.b16 %v1889_v23, %v1889_v23 }
 0x458   : > { %v1919_v34 = vrot.slane %v1899_v28, %v4878_v2  ;;  %v1926_v6 = vrot.slane %v4018_v29, %v4878_v2  ;;  %v1940_v7 = vrot.slane %v4019_v9, %v4878_v2  ;;  %v1973_v35 = vsel %vm5310_vm9, %v1912_v4, %v1972_v33  ;;  %2635 = vmatpush1.bf16.msra.mxu0 %v5071_v8 }
 0x459   : > { %v1905_v36 = vpack.i.b16 %v1897_v5, %v1897_v5  ;;  %v1933_v37 = vrot.slane %v1901_v32, %v4878_v2  ;;  %v1947_v38 = vrot.slane %v1903_v1, %v4878_v2  ;;  %v1954_v39 = vrot.slane %v4020_v17, %v4878_v2  ;;  %1974 = vst [vmem:[%s4876_s3] sm:$0x2] %v1973_v35 }
 0x45a   : > { %2676 = vmatpush1.bf16.msra.mxu1 %v5076_v20  ;;  %v1976_v8 = vsel %vm5310_vm9, %v1919_v34, %v1975_v41  ;;  %v1979_v44 = vsel %vm5310_vm9, %v1926_v6, %v1978_v43  ;;  %v1985_v46 = vsel %vm5310_vm9, %v1940_v7, %v1984_v42  ;;  %2636 = vmatprep.subr.bf16.mxu0 %v5085_v27  ;;  %v1993_v27 = vld [vmem:[%s4876_s3 + $0x1c] sm:$0x2]  ;;  %v5602_v42 = vld [vmem:[%s5835_s1 + $0xe4] ss:$16 sps:$4 sm:$0xff]  }
 0x45b   : > { %2677 = vmatprep.subr.bf16.mxu1 %v5090_v10  ;;  %v1961_v20 = vrot.slane %v1905_v36, %v4878_v2  ;;  %1977 = vst [vmem:[%s4876_s3 + $0x4] sm:$0x2] %v1976_v8  ;;  %1980 = vst [vmem:[%s4876_s3 + $0x8] sm:$0x2] %v1979_v44  ;;  %v1982_v58 = vsel %vm5310_vm9, %v1933_v37, %v1981_v40  ;;  %v1988_v24 = vsel %vm5310_vm9, %v1947_v38, %v1987_v45  ;;  %v2414_v8 = vld [vmem:[%s4876_s3] sm:$0x4] }
 0x45c   : > { %1986 = vst [vmem:[%s4876_s3 + $0x10] sm:$0x2] %v1985_v46  ;;  %v1991_v59 = vsel %vm5310_vm9, %v1954_v39, %v1990_v48  ;;  %1983 = vst [vmem:[%s4876_s3 + $0xc] sm:$0x2] %v1982_v58  ;;  %2637 = vmatpush1.bf16.msra.mxu0 %v5095_v11  ;;  %v4053_v11 = vld [vmem:[%s4857_s28 + $0x40] sm:$0xff] }
 0x45d   : > { %1989 = vst [vmem:[%s4876_s3 + $0x14] sm:$0x2] %v1988_v24  ;;  %1992 = vst [vmem:[%s4876_s3 + $0x18] sm:$0x2] %v1991_v59  ;;  %v1994_v10 = vsel %vm5310_vm9, %v1961_v20, %v1993_v27  ;;  %2638 = vmatprep.subr.bf16.mxu0 %v5114_v14  ;;  %v2417_v24 = vld [vmem:[%s4876_s3 + $0x4] sm:$0x4] }
 0x45e   : > { %2678 = vmatpush1.bf16.msra.mxu1 %v5100_v12  ;;  %1995 = vst [vmem:[%s4876_s3 + $0x1c] sm:$0x2] %v1994_v10  ;;  %v2273_v12 = vunpack.c.l.bf16 %v4053_v11  ;;  %v2420_v59 = vld [vmem:[%s4876_s3 + $0x8] sm:$0x4]  ;;  %v2426_v27 = vld [vmem:[%s4876_s3 + $0x10] sm:$0x4] }
 0x45f   : > { %2679 = vmatprep.subr.bf16.mxu1 %v5124_v49 }
 0x460   : > { %2639 = vmatpush1.bf16.msra.mxu0 %v5109_v13  ;;  %v2274_v13 = vunpack.c.h.bf16 %v4053_v11 }
 0x461   : > { %2640 = vmatprep.subr.bf16.mxu0 %v5129_v16  ;;  %v4054_v16 = vld [vmem:[%s4857_s28 + $0x48] sm:$0xff] }
 0x462   : > { %2680 = vmatpush1.bf16.msra.mxu1 %v5119_v15  ;;  %v2276_v61 = vunpack.c.h.bf16 %v4054_v16 }
 0x463   : > { %2681 = vmatprep.subr.bf16.mxu1 %v5135_v22 }
 0x464   : > { %2641 = vmatpush1.bf16.msra.mxu0 %v5142_v21 }
 0x465   : > { %2642 = vmatprep.subr.bf16.mxu0 %v5154_v50 }
 0x466   : > { %2682 = vmatpush1.bf16.msra.mxu1 %v5149_v30 }
 0x467   : > { %2683 = vmatprep.subr.bf16.mxu1 %v5160_v51 }
 0x468   : > { %2643 = vmatpush1.bf16.msra.mxu0 %v5166_v52 }
 0x469   : > { %2644 = vmatprep.subr.bf16.mxu0 %v5178_v54 }
 0x46a   : > { %2684 = vmatpush1.bf16.msra.mxu1 %v5173_v53 }
 0x46b   : > { %2685 = vmatprep.subr.bf16.mxu1 %v5184_v55 }
 0x46c   : > { %2645 = vmatpush1.bf16.msra.mxu0 %v5190_v56 }
 0x46e   : > { %2686 = vmatpush1.bf16.msra.mxu1 %v5197_v57  ;;  %v2275_v57 = vunpack.c.l.bf16 %v4054_v16 }
 0x522   : > { %v2222_v14 = vpop.f32.mrb[16].mxu0  ;;  %v2263_v15 = vpop.f32.mrb[16].mxu1 }
 0x523   : > { %v2277_v49 = vadd.f32 %v2273_v12, %v2222_v14  ;;  %v2224_v22 = vpop.f32.mrb[17].mxu0  ;;  %v2265_v21 = vpop.f32.mrb[17].mxu1  ;;  %v2279_v62 = vadd.f32 %v2275_v57, %v2263_v15  ;;  %v2423_v14 = vld [vmem:[%s4876_s3 + $0xc] sm:$0x4]  ;;  %v2429_v15 = vld [vmem:[%s4876_s3 + $0x14] sm:$0x4] }
 0x524   : > { %v2278_v30 = vadd.f32 %v2274_v13, %v2224_v22  ;;  %v2226_v50 = vpop.f32.mrb[18].mxu0  ;;  %v2267_v51 = vpop.f32.mrb[18].mxu1  ;;  %v2280_v56 = vadd.f32 %v2276_v61, %v2265_v21 }
 0x525   : > { %v4055_v52 = vmul.f32 -1.442695, %v2277_v49  ;;  %v2227_v53 = vpop.f32.mrb[19].mxu0  ;;  %v2268_v54 = vpop.f32.mrb[19].mxu1  ;;  %v2432_v49 = vld [vmem:[%s4876_s3 + $0x18] sm:$0x4] }
 0x526   : > { %v4056_v55 = vmul.f32 -1.442695, %v2278_v30  ;;  %v4057_v31 = vmul.f32 -1.442695, %v2280_v56  ;;  %v2435_v53 = vld [vmem:[%s4876_s3 + $0x1c] sm:$0x4] }
 0x527   : > { %4440 = vpow2.f32 %v4055_v52 }
 0x528   : > { %4442 = vpow2.f32 %v4056_v55 }
 0x529   : > { %4444 = vpow2.f32 %v4057_v31  ;;  %v5437_v31 = vld [vmem:[%s5835_s1 + $0x4] ss:$16 sps:$4 sm:$0xff]  }
 0x52a   : > { %4446 = vtanh.f32 %v2279_v62  ;;  %v5442_v62 = vld [vmem:[%s5835_s1 + $0xc] ss:$16 sps:$4 sm:$0xff]   ;;  %3071 = vmatprep.subr.bf16.mxu0 %v5437_v31 }
 0x52b   : > { %3112 = vmatprep.subr.bf16.mxu1 %v5442_v62 }
 0x531   : > { %v4441_v63 = vpop.eup %4440 }
 0x532   : > { %v4443_v0 = vpop.eup %4442  ;;  %v2284_v25 = vadd.f32 1.0, %v4441_v63  ;;  %v5447_v63 = vld [vmem:[%s5835_s1] ss:$16 sps:$4 sm:$0xff]  }
 0x533   : > { %v2290_v23 = vadd.f32 1.0, %v4443_v0  ;;  %v4445_v19 = vpop.eup %4444  ;;  %v5452_v0 = vld [vmem:[%s5835_s1 + $0x8] ss:$16 sps:$4 sm:$0xff]  }
 0x534   : > { %4448 = vrcp.f32 %v2284_v25  ;;  %v4447_v3 = vpop.eup %4446  ;;  %v2297_v9 = vadd.f32 1.0, %v4445_v19  ;;  %v5461_v25 = vld [vmem:[%s5835_s1 + $0x24] ss:$16 sps:$4 sm:$0xff]   ;;  %v5471_v19 = vld [vmem:[%s5835_s1 + $0x20] ss:$16 sps:$4 sm:$0xff]  }
 0x535   : > { %4450 = vrcp.f32 %v2290_v23  ;;  %v5466_v23 = vld [vmem:[%s5835_s1 + $0x2c] ss:$16 sps:$4 sm:$0xff]  }
 0x536   : > { %4452 = vrcp.f32 %v2297_v9  ;;  %v5500_v9 = vld [vmem:[%s5835_s1 + $0x48] ss:$16 sps:$4 sm:$0xff]  }
 0x53e   : > { %v4449_v28 = vpop.eup %4448 }
 0x53f   : > { %v4451_v26 = vpop.eup %4450  ;;  %v2301_v29 = vmul.f32 %v4449_v28, %v4447_v3  ;;  %v5476_v3 = vld [vmem:[%s5835_s1 + $0x28] ss:$16 sps:$4 sm:$0xff]   ;;  %v5485_v28 = vld [vmem:[%s5835_s1 + $0x44] ss:$16 sps:$4 sm:$0xff]  }
 0x540   : > { %v2300_v4 = vmul.f32 %v4451_v26, %v5295_v47  ;;  %v4453_v32 = vpop.eup %4452  ;;  %v5490_v26 = vld [vmem:[%s5835_s1 + $0x4c] ss:$16 sps:$4 sm:$0xff]  }
 0x542   : > { %v5381_v5 = vadd.f32 %v2301_v29, %v2300_v4  ;;  %v5495_v29 = vld [vmem:[%s5835_s1 + $0x40] ss:$16 sps:$4 sm:$0xff]   ;;  %v5509_v4 = vld [vmem:[%s5835_s1 + $0x64] ss:$16 sps:$4 sm:$0xff]  }
 0x544   : > { %4454 = vtanh.f32 %v5381_v5 }
 0x54e   : > { %v4455_v1 = vpop.eup %4454 }
 0x54f   : > { %v2304_v17 = vmul.f32 %v4455_v1, %v4453_v32  ;;  %v5514_v32 = vld [vmem:[%s5835_s1 + $0x6c] ss:$16 sps:$4 sm:$0xff]   ;;  %v5519_v1 = vld [vmem:[%s5835_s1 + $0x60] ss:$16 sps:$4 sm:$0xff]  }
 0x551   : > { %v2305_v33 = vpack.c.bf16 %v2304_v17, %v2304_v17  ;;  %v5524_v17 = vld [vmem:[%s5835_s1 + $0x68] ss:$16 sps:$4 sm:$0xff]  }
 0x553   : > { %v2313_v34 = vrot.slane %v2305_v33, %v4865_v60  ;;  %2663 = vmatmul.mubr.bf16.vlgmr.msra.gmra.mrb[20].mxu0 %v2305_v33  ;;  %2704 = vmatmul.mubr.bf16.vlgmr.msra.gmra.mrb[20].mxu1 %v2305_v33  ;;  %v5533_v33 = vld [vmem:[%s5835_s1 + $0x80] ss:$16 sps:$4 sm:$0xff]  }
 0x554   : > { %3103 = vmatprep.mubr.bf16.mxu0 %v4544_v18  ;;  %3144 = vmatprep.mubr.bf16.mxu1 %v4544_v18 }
 0x555   : > { %v2314_v6 = vcombine.high %v2313_v34, %v2313_v34  ;;  %v2321_v47 = vrot.slane %v2313_v34, %v4865_v60  ;;  %3072 = vmatpush1.bf16.msra.mxu0 %v5447_v63  ;;  %3113 = vmatpush1.bf16.msra.mxu1 %v5452_v0  ;;  %v5538_v34 = vld [vmem:[%s5835_s1 + $0x84] ss:$16 sps:$4 sm:$0xff]  }
 0x556   : > { %3073 = vmatprep.subr.bf16.mxu0 %v5461_v25  ;;  %3114 = vmatprep.subr.bf16.mxu1 %v5466_v23 }
 0x557   : > { %v2328_v7 = vrot.slane %v2314_v6, %v4865_v60  ;;  %v2329_v35 = vcombine.high %v2321_v47, %v2321_v47  ;;  %v2332_v36 = vunpack.i.h.s16 %v2321_v47  ;;  %v4058_v37 = vpack.i.b16 %v2321_v47, %v2321_v47  ;;  %v5543_v6 = vld [vmem:[%s5835_s1 + $0x88] ss:$16 sps:$4 sm:$0xff]   ;;  %v5548_v47 = vld [vmem:[%s5835_s1 + $0x8c] ss:$16 sps:$4 sm:$0xff]  }
 0x559   : > { %v2330_v38 = vcombine.high %v2328_v7, %v2328_v7  ;;  %v2334_v39 = vunpack.i.h.s16 %v2328_v7  ;;  %v2336_v41 = vunpack.i.h.s16 %v2329_v35  ;;  %v2340_v43 = vpack.i.b16 %v2332_v36, %v2332_v36  ;;  %3074 = vmatpush1.bf16.msra.mxu0 %v5471_v19  ;;  %3115 = vmatpush1.bf16.msra.mxu1 %v5476_v3  ;;  %v5566_v36 = vld [vmem:[%s5835_s1 + $0xa0] ss:$16 sps:$4 sm:$0xff]  }
 0x55a   : > { %v4059_v44 = vpack.i.b16 %v2328_v7, %v2328_v7  ;;  %v4060_v40 = vpack.i.b16 %v2329_v35, %v2329_v35  ;;  %v2353_v46 = vrot.slane %v4058_v37, %v4878_v2  ;;  %3075 = vmatprep.subr.bf16.mxu0 %v5485_v28  ;;  %3116 = vmatprep.subr.bf16.mxu1 %v5490_v26  ;;  %v5553_v7 = vld [vmem:[%s5835_s1 + $0xa4] ss:$16 sps:$4 sm:$0xff]   ;;  %v5559_v35 = vld [vmem:[%s5835_s1 + $0xac] ss:$16 sps:$4 sm:$0xff]   ;;  %v5573_v37 = vld [vmem:[%s5835_s1 + $0xa8] ss:$16 sps:$4 sm:$0xff]  }
 0x55b   : > { %v2338_v45 = vunpack.i.h.s16 %v2330_v38  ;;  %v2342_v48 = vpack.i.b16 %v2334_v39, %v2334_v39  ;;  %v2344_v20 = vpack.i.b16 %v2336_v41, %v2336_v41  ;;  %v4061_v58 = vpack.i.b16 %v2330_v38, %v2330_v38  ;;  %v5578_v38 = vld [vmem:[%s5835_s1 + $0xc4] ss:$16 sps:$4 sm:$0xff]   ;;  %v5584_v39 = vld [vmem:[%s5835_s1 + $0xcc] ss:$16 sps:$4 sm:$0xff]   ;;  %v5590_v41 = vld [vmem:[%s5835_s1 + $0xc0] ss:$16 sps:$4 sm:$0xff]  }
 0x55c   : > { %v2360_v10 = vrot.slane %v2340_v43, %v4878_v2  ;;  %v2367_v11 = vrot.slane %v4059_v44, %v4878_v2  ;;  %v2381_v12 = vrot.slane %v4060_v40, %v4878_v2  ;;  %v2415_v13 = vsel %vm5390_vm12, %v2353_v46, %v2414_v8  ;;  %v5597_v43 = vld [vmem:[%s5835_s1 + $0xc8] ss:$16 sps:$4 sm:$0xff]   ;;  %v5608_v8 = vld [vmem:[%s5835_s1 + $0xec] ss:$16 sps:$4 sm:$0xff]   ;;  %v5614_v44 = vld [vmem:[%s5835_s1 + $0xe0] ss:$16 sps:$4 sm:$0xff]  }
 0x55d   : > { %v2346_v16 = vpack.i.b16 %v2338_v45, %v2338_v45  ;;  %v2374_v22 = vrot.slane %v2342_v48, %v4878_v2  ;;  %v2388_v21 = vrot.slane %v2344_v20, %v4878_v2  ;;  %v2395_v30 = vrot.slane %v4061_v58, %v4878_v2  ;;  %2416 = vst [vmem:[%s4876_s3] sm:$0x4] %v2415_v13  ;;  %v5621_v40 = vld [vmem:[%s5835_s1 + $0xe8] ss:$16 sps:$4 sm:$0xff]   ;;  %v4094_v46 = vld [vmem:[%s4857_s28 + $0x50] sm:$0xff] }
 0x55e   : > { %v2418_v50 = vsel %vm5390_vm12, %v2360_v10, %v2417_v24  ;;  %v2421_v51 = vsel %vm5390_vm12, %v2367_v11, %v2420_v59  ;;  %v2427_v52 = vsel %vm5390_vm12, %v2381_v12, %v2426_v27  ;;  %3076 = vmatpush1.bf16.msra.mxu0 %v5495_v29  ;;  %3117 = vmatpush1.bf16.msra.mxu1 %v5500_v9  ;;  %v2715_v45 = vunpack.c.l.bf16 %v4094_v46  ;;  %v4095_v59 = vld [vmem:[%s4857_s28 + $0x58] sm:$0xff] }
 0x55f   : > { %v2402_v54 = vrot.slane %v2346_v16, %v4878_v2  ;;  %2419 = vst [vmem:[%s4876_s3 + $0x4] sm:$0x4] %v2418_v50  ;;  %2422 = vst [vmem:[%s4876_s3 + $0x8] sm:$0x4] %v2421_v51  ;;  %v2424_v55 = vsel %vm5390_vm12, %v2374_v22, %v2423_v14  ;;  %v2430_v61 = vsel %vm5390_vm12, %v2388_v21, %v2429_v15  ;;  %3077 = vmatprep.subr.bf16.mxu0 %v5509_v4 }
 0x560   : > { %2428 = vst [vmem:[%s4876_s3 + $0x10] sm:$0x4] %v2427_v52  ;;  %v2433_v56 = vsel %vm5390_vm12, %v2395_v30, %v2432_v49  ;;  %2425 = vst [vmem:[%s4876_s3 + $0xc] sm:$0x4] %v2424_v55  ;;  %3118 = vmatprep.subr.bf16.mxu1 %v5514_v32  ;;  %v2716_v48 = vunpack.c.h.bf16 %v4094_v46  ;;  %v2718_v22 = vunpack.c.h.bf16 %v4095_v59  ;;  %v2717_v30 = vunpack.c.l.bf16 %v4095_v59 }
 0x561   : > { %2431 = vst [vmem:[%s4876_s3 + $0x14] sm:$0x4] %v2430_v61  ;;  %2434 = vst [vmem:[%s4876_s3 + $0x18] sm:$0x4] %v2433_v56  ;;  %v2436_v57 = vsel %vm5390_vm12, %v2402_v54, %v2435_v53 }
 0x562   : > { %2437 = vst [vmem:[%s4876_s3 + $0x1c] sm:$0x4] %v2436_v57  ;;  %3078 = vmatpush1.bf16.msra.mxu0 %v5519_v1  ;;  %3119 = vmatpush1.bf16.msra.mxu1 %v5524_v17 }
 0x563   : > { %3079 = vmatprep.subr.bf16.mxu0 %v5538_v34  ;;  %3120 = vmatprep.subr.bf16.mxu1 %v5548_v47 }
 0x566   : > { %3080 = vmatpush1.bf16.msra.mxu0 %v5533_v33  ;;  %3121 = vmatpush1.bf16.msra.mxu1 %v5543_v6 }
 0x567   : > { %3081 = vmatprep.subr.bf16.mxu0 %v5553_v7  ;;  %3122 = vmatprep.subr.bf16.mxu1 %v5559_v35 }
 0x56a   : > { %3082 = vmatpush1.bf16.msra.mxu0 %v5566_v36  ;;  %3123 = vmatpush1.bf16.msra.mxu1 %v5573_v37 }
 0x56b   : > { %3083 = vmatprep.subr.bf16.mxu0 %v5578_v38  ;;  %3124 = vmatprep.subr.bf16.mxu1 %v5584_v39 }
 0x56e   : > { %3084 = vmatpush1.bf16.msra.mxu0 %v5590_v41  ;;  %3125 = vmatpush1.bf16.msra.mxu1 %v5597_v43 }
 0x56f   : > { %3085 = vmatprep.subr.bf16.mxu0 %v5602_v42  ;;  %3126 = vmatprep.subr.bf16.mxu1 %v5608_v8 }
 0x572   : > { %3086 = vmatpush1.bf16.msra.mxu0 %v5614_v44  ;;  %3127 = vmatpush1.bf16.msra.mxu1 %v5621_v40 }
 0x573   : > { %3513 = vmatprep.subr.bf16.mxu0 %v5437_v31  ;;  %3554 = vmatprep.subr.bf16.mxu1 %v5442_v62 }
 0x626   : > { %v2664_v20 = vpop.f32.mrb[20].mxu0  ;;  %v2705_v58 = vpop.f32.mrb[20].mxu1 }
 0x627   : > { %v2719_v24 = vadd.f32 %v2715_v45, %v2664_v20  ;;  %v2666_v27 = vpop.f32.mrb[21].mxu0  ;;  %v2707_v10 = vpop.f32.mrb[21].mxu1  ;;  %v2721_v51 = vadd.f32 %v2717_v30, %v2705_v58  ;;  %v2855_v30 = vld [vmem:[%s4876_s3] sm:$0x4] }
 0x628   : > { %v2720_v11 = vadd.f32 %v2716_v48, %v2666_v27  ;;  %v2668_v12 = vpop.f32.mrb[22].mxu0  ;;  %v2709_v13 = vpop.f32.mrb[22].mxu1  ;;  %v2722_v21 = vadd.f32 %v2718_v22, %v2707_v10 }
 0x629   : > { %v4096_v14 = vmul.f32 -1.442695, %v2719_v24  ;;  %v2669_v15 = vpop.f32.mrb[23].mxu0  ;;  %v2710_v49 = vpop.f32.mrb[23].mxu1 }
 0x62a   : > { %v4097_v16 = vmul.f32 -1.442695, %v2720_v11  ;;  %v4098_v50 = vmul.f32 -1.442695, %v2722_v21 }
 0x62b   : > { %4456 = vpow2.f32 %v4096_v14 }
 0x62c   : > { %4458 = vpow2.f32 %v4097_v16 }
 0x62d   : > { %4460 = vpow2.f32 %v4098_v50 }
 0x62e   : > { %4462 = vtanh.f32 %v2721_v51 }
 0x635   : > { %v4457_v52 = vpop.eup %4456 }
 0x636   : > { %v4459_v53 = vpop.eup %4458  ;;  %v2726_v54 = vadd.f32 1.0, %v4457_v52 }
 0x637   : > { %v2732_v55 = vadd.f32 1.0, %v4459_v53  ;;  %v4461_v61 = vpop.eup %4460 }
 0x638   : > { %4464 = vrcp.f32 %v2726_v54  ;;  %v4463_v56 = vpop.eup %4462  ;;  %v2739_v46 = vadd.f32 1.0, %v4461_v61  ;;  %v2858_v61 = vld [vmem:[%s4876_s3 + $0x4] sm:$0x4] }
 0x639   : > { %4466 = vrcp.f32 %v2732_v55 }
 0x63a   : > { %4468 = vrcp.f32 %v2739_v46 }
 0x642   : > { %v4465_v57 = vpop.eup %4464 }
 0x643   : > { %v4467_v31 = vpop.eup %4466  ;;  %v2743_v62 = vmul.f32 %v4465_v57, %v4463_v56  ;;  %v2861_v56 = vld [vmem:[%s4876_s3 + $0x8] sm:$0x4]  ;;  %v2867_v57 = vld [vmem:[%s4876_s3 + $0x10] sm:$0x4] }
 0x644   : > { %v2742_v45 = vmul.f32 %v4467_v31, %v5381_v5  ;;  %v4469_v20 = vpop.eup %4468 }
 0x646   : > { %v5631_v48 = vadd.f32 %v2743_v62, %v2742_v45  ;;  %v2864_v62 = vld [vmem:[%s4876_s3 + $0xc] sm:$0x4]  ;;  %v2870_v45 = vld [vmem:[%s4876_s3 + $0x14] sm:$0x4] }
 0x648   : > { %4470 = vtanh.f32 %v5631_v48 }
 0x652   : > { %v4471_v58 = vpop.eup %4470 }
 0x653   : > { %v2746_v24 = vmul.f32 %v4471_v58, %v4469_v20  ;;  %v2873_v20 = vld [vmem:[%s4876_s3 + $0x18] sm:$0x4] }
 0x655   : > { %v2747_v59 = vpack.c.bf16 %v2746_v24, %v2746_v24 }
 0x657   : > { %v2755_v27 = vrot.slane %v2747_v59, %v4865_v60  ;;  %3104 = vmatmul.mubr.bf16.vlgmr.msra.gmra.mrb[24].mxu0 %v2747_v59  ;;  %3145 = vmatmul.mubr.bf16.vlgmr.msra.gmra.mrb[24].mxu1 %v2747_v59 }
 0x658   : > { %3514 = vmatpush1.bf16.msra.mxu0 %v5447_v63  ;;  %3555 = vmatpush1.bf16.msra.mxu1 %v5452_v0 }
 0x659   : > { %v2756_v10 = vcombine.high %v2755_v27, %v2755_v27  ;;  %v2763_v5 = vrot.slane %v2755_v27, %v4865_v60  ;;  %3515 = vmatprep.subr.bf16.mxu0 %v5461_v25  ;;  %3556 = vmatprep.subr.bf16.mxu1 %v5466_v23 }
 0x65a   : > { %3545 = vmatprep.mubr.bf16.mxu0 %v4544_v18  ;;  %3586 = vmatprep.mubr.bf16.mxu1 %v4544_v18 }
 0x65b   : > { %v2770_v11 = vrot.slane %v2756_v10, %v4865_v60  ;;  %v2771_v12 = vcombine.high %v2763_v5, %v2763_v5  ;;  %v2774_v13 = vunpack.i.h.s16 %v2763_v5  ;;  %v4099_v14 = vpack.i.b16 %v2763_v5, %v2763_v5 }
 0x65c   : > { %3516 = vmatpush1.bf16.msra.mxu0 %v5471_v19  ;;  %3557 = vmatpush1.bf16.msra.mxu1 %v5476_v3 }
 0x65d   : > { %v2772_v63 = vcombine.high %v2770_v11, %v2770_v11  ;;  %v2776_v0 = vunpack.i.h.s16 %v2770_v11  ;;  %v2778_v25 = vunpack.i.h.s16 %v2771_v12  ;;  %v2782_v15 = vpack.i.b16 %v2774_v13, %v2774_v13  ;;  %3517 = vmatprep.subr.bf16.mxu0 %v5485_v28  ;;  %3558 = vmatprep.subr.bf16.mxu1 %v5490_v26 }
 0x65e   : > { %v4100_v18 = vpack.i.b16 %v2770_v11, %v2770_v11  ;;  %v4101_v49 = vpack.i.b16 %v2771_v12, %v2771_v12  ;;  %v2795_v19 = vrot.slane %v4099_v14, %v4878_v2 }
 0x65f   : > { %v2780_v3 = vunpack.i.h.s16 %v2772_v63  ;;  %v2784_v16 = vpack.i.b16 %v2776_v0, %v2776_v0  ;;  %v2786_v22 = vpack.i.b16 %v2778_v25, %v2778_v25  ;;  %v4102_v21 = vpack.i.b16 %v2772_v63, %v2772_v63 }
 0x660   : > { %v2802_v50 = vrot.slane %v2782_v15, %v4878_v2  ;;  %v2809_v28 = vrot.slane %v4100_v18, %v4878_v2  ;;  %v2823_v26 = vrot.slane %v4101_v49, %v4878_v2  ;;  %v2856_v51 = vsel %vm5646_vm14, %v2795_v19, %v2855_v30  ;;  %3518 = vmatpush1.bf16.msra.mxu0 %v5495_v29 }
 0x661   : > { %v2788_v52 = vpack.i.b16 %v2780_v3, %v2780_v3  ;;  %v2816_v53 = vrot.slane %v2784_v16, %v4878_v2  ;;  %v2830_v54 = vrot.slane %v2786_v22, %v4878_v2  ;;  %v2837_v55 = vrot.slane %v4102_v21, %v4878_v2  ;;  %2857 = vst [vmem:[%s4876_s3] sm:$0x4] %v2856_v51 }
 0x662   : > { %3559 = vmatpush1.bf16.msra.mxu1 %v5500_v9  ;;  %v2859_v29 = vsel %vm5646_vm14, %v2802_v50, %v2858_v61  ;;  %v2862_v31 = vsel %vm5646_vm14, %v2809_v28, %v2861_v56  ;;  %v2868_v46 = vsel %vm5646_vm14, %v2823_v26, %v2867_v57  ;;  %3519 = vmatprep.subr.bf16.mxu0 %v5509_v4  ;;  %v2876_v4 = vld [vmem:[%s4876_s3 + $0x1c] sm:$0x4]  ;;  %v3297_v57 = vld [vmem:[%s4876_s3] sm:$0x8] }
 0x663   : > { %3560 = vmatprep.subr.bf16.mxu1 %v5514_v32  ;;  %v2844_v9 = vrot.slane %v2788_v52, %v4878_v2  ;;  %2860 = vst [vmem:[%s4876_s3 + $0x4] sm:$0x4] %v2859_v29  ;;  %2863 = vst [vmem:[%s4876_s3 + $0x8] sm:$0x4] %v2862_v31  ;;  %v2865_v58 = vsel %vm5646_vm14, %v2816_v53, %v2864_v62  ;;  %v2871_v24 = vsel %vm5646_vm14, %v2830_v54, %v2870_v45 }
 0x664   : > { %2869 = vst [vmem:[%s4876_s3 + $0x10] sm:$0x4] %v2868_v46  ;;  %v2874_v59 = vsel %vm5646_vm14, %v2837_v55, %v2873_v20  ;;  %2866 = vst [vmem:[%s4876_s3 + $0xc] sm:$0x4] %v2865_v58  ;;  %3520 = vmatpush1.bf16.msra.mxu0 %v5519_v1  ;;  %v4135_v1 = vld [vmem:[%s4857_s28 + $0x60] sm:$0xff] }
 0x665   : > { %2872 = vst [vmem:[%s4876_s3 + $0x14] sm:$0x4] %v2871_v24  ;;  %2875 = vst [vmem:[%s4876_s3 + $0x18] sm:$0x4] %v2874_v59  ;;  %v2877_v32 = vsel %vm5646_vm14, %v2844_v9, %v2876_v4  ;;  %3521 = vmatprep.subr.bf16.mxu0 %v5538_v34  ;;  %v3300_v58 = vld [vmem:[%s4876_s3 + $0x4] sm:$0x8] }
 0x666   : > { %3561 = vmatpush1.bf16.msra.mxu1 %v5524_v17  ;;  %2878 = vst [vmem:[%s4876_s3 + $0x1c] sm:$0x4] %v2877_v32  ;;  %v3156_v17 = vunpack.c.l.bf16 %v4135_v1  ;;  %v3303_v24 = vld [vmem:[%s4876_s3 + $0x8] sm:$0x8]  ;;  %v3309_v59 = vld [vmem:[%s4876_s3 + $0x10] sm:$0x8] }
 0x667   : > { %3562 = vmatprep.subr.bf16.mxu1 %v5548_v47 }
 0x668   : > { %3522 = vmatpush1.bf16.msra.mxu0 %v5533_v33  ;;  %v3157_v33 = vunpack.c.h.bf16 %v4135_v1 }
 0x669   : > { %3523 = vmatprep.subr.bf16.mxu0 %v5553_v7  ;;  %v4136_v7 = vld [vmem:[%s4857_s28 + $0x68] sm:$0xff] }
 0x66a   : > { %3563 = vmatpush1.bf16.msra.mxu1 %v5543_v6  ;;  %v3159_v27 = vunpack.c.h.bf16 %v4136_v7 }
 0x66b   : > { %3564 = vmatprep.subr.bf16.mxu1 %v5559_v35 }
 0x66c   : > { %3524 = vmatpush1.bf16.msra.mxu0 %v5566_v36 }
 0x66d   : > { %3525 = vmatprep.subr.bf16.mxu0 %v5578_v38 }
 0x66e   : > { %3565 = vmatpush1.bf16.msra.mxu1 %v5573_v37 }
 0x66f   : > { %3566 = vmatprep.subr.bf16.mxu1 %v5584_v39 }
 0x670   : > { %3526 = vmatpush1.bf16.msra.mxu0 %v5590_v41 }
 0x671   : > { %3527 = vmatprep.subr.bf16.mxu0 %v5602_v42 }
 0x672   : > { %3567 = vmatpush1.bf16.msra.mxu1 %v5597_v43 }
 0x673   : > { %3568 = vmatprep.subr.bf16.mxu1 %v5608_v8 }
 0x674   : > { %3528 = vmatpush1.bf16.msra.mxu0 %v5614_v44 }
 0x676   : > { %3569 = vmatpush1.bf16.msra.mxu1 %v5621_v40  ;;  %v3158_v40 = vunpack.c.l.bf16 %v4136_v7 }
 0x72a   : > { %v3105_v34 = vpop.f32.mrb[24].mxu0  ;;  %v3146_v6 = vpop.f32.mrb[24].mxu1 }
 0x72b   : > { %v3160_v47 = vadd.f32 %v3156_v17, %v3105_v34  ;;  %v3107_v35 = vpop.f32.mrb[25].mxu0  ;;  %v3148_v36 = vpop.f32.mrb[25].mxu1  ;;  %v3162_v5 = vadd.f32 %v3158_v40, %v3146_v6  ;;  %v3312_v34 = vld [vmem:[%s4876_s3 + $0x14] sm:$0x8]  ;;  %v3315_v6 = vld [vmem:[%s4876_s3 + $0x18] sm:$0x8] }
 0x72c   : > { %v3161_v37 = vadd.f32 %v3157_v33, %v3107_v35  ;;  %v3109_v38 = vpop.f32.mrb[26].mxu0  ;;  %v3150_v39 = vpop.f32.mrb[26].mxu1  ;;  %v3163_v44 = vadd.f32 %v3159_v27, %v3148_v36  ;;  %v3306_v33 = vld [vmem:[%s4876_s3 + $0xc] sm:$0x8]  ;;  %v4176_v40 = vld [vmem:[%s4857_s28 + $0x70] sm:$0xff] }
 0x72d   : > { %v4137_v41 = vmul.f32 -1.442695, %v3160_v47  ;;  %v3110_v43 = vpop.f32.mrb[27].mxu0  ;;  %v3151_v42 = vpop.f32.mrb[27].mxu1 }
 0x72e   : > { %v4138_v8 = vmul.f32 -1.442695, %v3161_v37  ;;  %v4139_v10 = vmul.f32 -1.442695, %v3163_v44 }
 0x72f   : > { %4472 = vpow2.f32 %v4137_v41  ;;  %v3318_v41 = vld [vmem:[%s4876_s3 + $0x1c] sm:$0x8] }
 0x730   : > { %4474 = vpow2.f32 %v4138_v8 }
 0x731   : > { %4476 = vpow2.f32 %v4139_v10  ;;  %v3598_v10 = vunpack.c.l.bf16 %v4176_v40 }
 0x732   : > { %4478 = vtanh.f32 %v3162_v5  ;;  %v3599_v5 = vunpack.c.h.bf16 %v4176_v40 }
 0x739   : > { %v4473_v11 = vpop.eup %4472 }
 0x73a   : > { %v4475_v12 = vpop.eup %4474  ;;  %v3167_v13 = vadd.f32 1.0, %v4473_v11 }
 0x73b   : > { %v3173_v14 = vadd.f32 1.0, %v4475_v12  ;;  %v4477_v63 = vpop.eup %4476 }
 0x73c   : > { %4480 = vrcp.f32 %v3167_v13  ;;  %v4479_v0 = vpop.eup %4478  ;;  %v3180_v18 = vadd.f32 1.0, %v4477_v63 }
 0x73d   : > { %4482 = vrcp.f32 %v3173_v14  ;;  %v4177_v14 = vld [vmem:[%s4857_s28 + $0x78] sm:$0xff] }
 0x73e   : > { %4484 = vrcp.f32 %v3180_v18 }
 0x746   : > { %v4481_v25 = vpop.eup %4480 }
 0x747   : > { %v4483_v15 = vpop.eup %4482  ;;  %v3184_v23 = vmul.f32 %v4481_v25, %v4479_v0 }
 0x748   : > { %v3183_v49 = vmul.f32 %v4483_v15, %v5631_v48  ;;  %v4485_v3 = vpop.eup %4484 }
 0x74a   : > { %v5717_v19 = vadd.f32 %v3184_v23, %v3183_v49 }
 0x74c   : > { %4486 = vtanh.f32 %v5717_v19 }
 0x756   : > { %v4487_v16 = vpop.eup %4486 }
 0x757   : > { %v3187_v22 = vmul.f32 %v4487_v16, %v4485_v3 }
 0x759   : > { %v3188_v21 = vpack.c.bf16 %v3187_v22, %v3187_v22  ;;  %v3601_v22 = vunpack.c.h.bf16 %v4177_v14 }
 0x75b   : > { %v3196_v30 = vrot.slane %v3188_v21, %v4865_v60  ;;  %3546 = vmatmul.mubr.bf16.vlgmr.msra.gmra.mrb[28].mxu0 %v3188_v21  ;;  %3587 = vmatmul.mubr.bf16.vlgmr.msra.gmra.mrb[28].mxu1 %v3188_v21 }
 0x75d   : > { %v3197_v50 = vcombine.high %v3196_v30, %v3196_v30  ;;  %v3204_v28 = vrot.slane %v3196_v30, %v4865_v60  ;;  %v3600_v30 = vunpack.c.l.bf16 %v4177_v14 }
 0x75f   : > { %v3211_v48 = vrot.slane %v3197_v50, %v4865_v60  ;;  %v3212_v26 = vcombine.high %v3204_v28, %v3204_v28  ;;  %v3215_v51 = vunpack.i.h.s16 %v3204_v28  ;;  %v4140_v52 = vpack.i.b16 %v3204_v28, %v3204_v28 }
 0x761   : > { %v3213_v53 = vcombine.high %v3211_v48, %v3211_v48  ;;  %v3217_v54 = vunpack.i.h.s16 %v3211_v48  ;;  %v3219_v55 = vunpack.i.h.s16 %v3212_v26  ;;  %v3223_v61 = vpack.i.b16 %v3215_v51, %v3215_v51 }
 0x762   : > { %v4141_v29 = vpack.i.b16 %v3211_v48, %v3211_v48  ;;  %v4142_v31 = vpack.i.b16 %v3212_v26, %v3212_v26  ;;  %v3236_v62 = vrot.slane %v4140_v52, %v4878_v2 }
 0x763   : > { %v3221_v46 = vunpack.i.h.s16 %v3213_v53  ;;  %v3225_v45 = vpack.i.b16 %v3217_v54, %v3217_v54  ;;  %v3227_v20 = vpack.i.b16 %v3219_v55, %v3219_v55  ;;  %v4143_v9 = vpack.i.b16 %v3213_v53, %v3213_v53 }
 0x764   : > { %v3243_v4 = vrot.slane %v3223_v61, %v4878_v2  ;;  %v3250_v32 = vrot.slane %v4141_v29, %v4878_v2  ;;  %v3264_v1 = vrot.slane %v4142_v31, %v4878_v2  ;;  %v3298_v17 = vsel %vm5724_vm1, %v3236_v62, %v3297_v57 }
 0x765   : > { %v3229_v47 = vpack.i.b16 %v3221_v46, %v3221_v46  ;;  %v3257_v7 = vrot.slane %v3225_v45, %v4878_v2  ;;  %v3271_v35 = vrot.slane %v3227_v20, %v4878_v2  ;;  %v3278_v36 = vrot.slane %v4143_v9, %v4878_v2  ;;  %3299 = vst [vmem:[%s4876_s3] sm:$0x8] %v3298_v17 }
 0x766   : > { %v3301_v37 = vsel %vm5724_vm1, %v3243_v4, %v3300_v58  ;;  %v3304_v38 = vsel %vm5724_vm1, %v3250_v32, %v3303_v24  ;;  %v3310_v39 = vsel %vm5724_vm1, %v3264_v1, %v3309_v59 }
 0x767   : > { %v3285_v43 = vrot.slane %v3229_v47, %v4878_v2  ;;  %3302 = vst [vmem:[%s4876_s3 + $0x4] sm:$0x8] %v3301_v37  ;;  %3305 = vst [vmem:[%s4876_s3 + $0x8] sm:$0x8] %v3304_v38  ;;  %v3307_v42 = vsel %vm5724_vm1, %v3257_v7, %v3306_v33  ;;  %v3313_v8 = vsel %vm5724_vm1, %v3271_v35, %v3312_v34 }
 0x768   : > { %3311 = vst [vmem:[%s4876_s3 + $0x10] sm:$0x8] %v3310_v39  ;;  %v3316_v27 = vsel %vm5724_vm1, %v3278_v36, %v3315_v6  ;;  %3308 = vst [vmem:[%s4876_s3 + $0xc] sm:$0x8] %v3307_v42 }
 0x769   : > { %3314 = vst [vmem:[%s4876_s3 + $0x14] sm:$0x8] %v3313_v8  ;;  %3317 = vst [vmem:[%s4876_s3 + $0x18] sm:$0x8] %v3316_v27  ;;  %v3319_v44 = vsel %vm5724_vm1, %v3285_v43, %v3318_v41 }
 0x76a   : > { %3320 = vst [vmem:[%s4876_s3 + $0x1c] sm:$0x8] %v3319_v44 }
 0x76c   : > { %v3738_v39 = vld [vmem:[%s4876_s3] sm:$0x8] }
 0x82e   : > { %v3547_v11 = vpop.f32.mrb[28].mxu0  ;;  %v3588_v12 = vpop.f32.mrb[28].mxu1 }
 0x82f   : > { %v3602_v13 = vadd.f32 %v3598_v10, %v3547_v11  ;;  %v3549_v63 = vpop.f32.mrb[29].mxu0  ;;  %v3590_v0 = vpop.f32.mrb[29].mxu1  ;;  %v3604_v28 = vadd.f32 %v3600_v30, %v3588_v12  ;;  %v3744_v11 = vld [vmem:[%s4876_s3 + $0x8] sm:$0x8]  ;;  %v3750_v12 = vld [vmem:[%s4876_s3 + $0x10] sm:$0x8] }
 0x830   : > { %v3603_v25 = vadd.f32 %v3599_v5, %v3549_v63  ;;  %v3551_v15 = vpop.f32.mrb[30].mxu0  ;;  %v3592_v23 = vpop.f32.mrb[30].mxu1  ;;  %v3605_v21 = vadd.f32 %v3601_v22, %v3590_v0  ;;  %v3741_v5 = vld [vmem:[%s4876_s3 + $0x4] sm:$0x8]  ;;  %v3747_v63 = vld [vmem:[%s4876_s3 + $0xc] sm:$0x8] }
 0x831   : > { %v4178_v18 = vmul.f32 -1.442695, %v3602_v13  ;;  %v3552_v49 = vpop.f32.mrb[31].mxu0  ;;  %v3593_v3 = vpop.f32.mrb[31].mxu1  ;;  %v3756_v15 = vld [vmem:[%s4876_s3 + $0x18] sm:$0x8] }
 0x832   : > { %v4179_v16 = vmul.f32 -1.442695, %v3603_v25  ;;  %v4180_v50 = vmul.f32 -1.442695, %v3605_v21  ;;  %v3753_v25 = vld [vmem:[%s4876_s3 + $0x14] sm:$0x8] }
 0x833   : > { %4488 = vpow2.f32 %v4178_v18 }
 0x834   : > { %4490 = vpow2.f32 %v4179_v16  ;;  %v3759_v16 = vld [vmem:[%s4876_s3 + $0x1c] sm:$0x8] }
 0x835   : > { %4492 = vpow2.f32 %v4180_v50 }
 0x836   : > { %4494 = vtanh.f32 %v3604_v28 }
 0x83d   : > { %v4489_v48 = vpop.eup %4488 }
 0x83e   : > { %v4491_v26 = vpop.eup %4490  ;;  %v3609_v51 = vadd.f32 1.0, %v4489_v48 }
 0x83f   : > { %v3615_v52 = vadd.f32 1.0, %v4491_v26  ;;  %v4493_v53 = vpop.eup %4492 }
 0x840   : > { %4496 = vrcp.f32 %v3609_v51  ;;  %v4495_v54 = vpop.eup %4494  ;;  %v3622_v57 = vadd.f32 1.0, %v4493_v53 }
 0x841   : > { %4498 = vrcp.f32 %v3615_v52 }
 0x842   : > { %4500 = vrcp.f32 %v3622_v57 }
 0x84a   : > { %v4497_v55 = vpop.eup %4496 }
 0x84b   : > { %v4499_v61 = vpop.eup %4498  ;;  %v3626_v56 = vmul.f32 %v4497_v55, %v4495_v54 }
 0x84c   : > { %v3625_v29 = vmul.f32 %v4499_v61, %v5717_v19  ;;  %v4501_v62 = vpop.eup %4500 }
 0x84e   : > { %v3627_v31 = vadd.f32 %v3626_v56, %v3625_v29 }
 0x850   : > { %4502 = vtanh.f32 %v3627_v31 }
 0x85a   : > { %v4503_v46 = vpop.eup %4502 }
 0x85b   : > { %v3629_v45 = vmul.f32 %v4503_v46, %v4501_v62 }
 0x85d   : > { %v3630_v20 = vpack.c.bf16 %v3629_v45, %v3629_v45 }
 0x85f   : > { %v3638_v9 = vrot.slane %v3630_v20, %v4865_v60 }
 0x861   : > { %v3639_v58 = vcombine.high %v3638_v9, %v3638_v9  ;;  %v3646_v24 = vrot.slane %v3638_v9, %v4865_v60 }
 0x863   : > { %v3653_v59 = vrot.slane %v3639_v58, %v4865_v60  ;;  %v3654_v4 = vcombine.high %v3646_v24, %v3646_v24  ;;  %v3657_v32 = vunpack.i.h.s16 %v3646_v24  ;;  %v4181_v1 = vpack.i.b16 %v3646_v24, %v3646_v24 }
 0x865   : > { %v3655_v17 = vcombine.high %v3653_v59, %v3653_v59  ;;  %v3659_v33 = vunpack.i.h.s16 %v3653_v59  ;;  %v3661_v34 = vunpack.i.h.s16 %v3654_v4  ;;  %v3665_v6 = vpack.i.b16 %v3657_v32, %v3657_v32 }
 0x866   : > { %v4182_v47 = vpack.i.b16 %v3653_v59, %v3653_v59  ;;  %v4183_v7 = vpack.i.b16 %v3654_v4, %v3654_v4  ;;  %v3678_v35 = vrot.slane %v4181_v1, %v4878_v2 }
 0x867   : > { %v3663_v60 = vunpack.i.h.s16 %v3655_v17  ;;  %v3667_v36 = vpack.i.b16 %v3659_v33, %v3659_v33  ;;  %v3669_v37 = vpack.i.b16 %v3661_v34, %v3661_v34  ;;  %v4184_v38 = vpack.i.b16 %v3655_v17, %v3655_v17 }
 0x868   : > { %v3685_v41 = vrot.slane %v3665_v6, %v4878_v2  ;;  %v3692_v43 = vrot.slane %v4182_v47, %v4878_v2  ;;  %v3706_v42 = vrot.slane %v4183_v7, %v4878_v2  ;;  %v3739_v8 = vsel %vm5775_vm3, %v3678_v35, %v3738_v39 }
 0x869   : > { %v3671_v27 = vpack.i.b16 %v3663_v60, %v3663_v60  ;;  %v3699_v44 = vrot.slane %v3667_v36, %v4878_v2  ;;  %v3713_v40 = vrot.slane %v3669_v37, %v4878_v2  ;;  %v3720_v10 = vrot.slane %v4184_v38, %v4878_v2  ;;  %3740 = vst [vmem:[%s4876_s3] sm:$0x8] %v3739_v8 }
 0x86a   : > { %v3742_v13 = vsel %vm5775_vm3, %v3685_v41, %v3741_v5  ;;  %v3745_v14 = vsel %vm5775_vm3, %v3692_v43, %v3744_v11  ;;  %v3751_v0 = vsel %vm5775_vm3, %v3706_v42, %v3750_v12 }
 0x86b   : > { %v3727_v23 = vrot.slane %v3671_v27, %v4878_v2  ;;  %3743 = vst [vmem:[%s4876_s3 + $0x4] sm:$0x8] %v3742_v13  ;;  %3746 = vst [vmem:[%s4876_s3 + $0x8] sm:$0x8] %v3745_v14  ;;  %v3748_v18 = vsel %vm5775_vm3, %v3699_v44, %v3747_v63  ;;  %v3754_v49 = vsel %vm5775_vm3, %v3713_v40, %v3753_v25 }
 0x86c   : > { %3752 = vst [vmem:[%s4876_s3 + $0x10] sm:$0x8] %v3751_v0  ;;  %v3757_v3 = vsel %vm5775_vm3, %v3720_v10, %v3756_v15  ;;  %3749 = vst [vmem:[%s4876_s3 + $0xc] sm:$0x8] %v3748_v18 }
 0x86d   : > { %3755 = vst [vmem:[%s4876_s3 + $0x14] sm:$0x8] %v3754_v49  ;;  %3758 = vst [vmem:[%s4876_s3 + $0x18] sm:$0x8] %v3757_v3  ;;  %v3760_v22 = vsel %vm5775_vm3, %v3727_v23, %v3759_v16 }
 0x86e   : > { %3761 = vst [vmem:[%s4876_s3 + $0x1c] sm:$0x8] %v3760_v22 }
 0x86f PF: > { %s12_s13 = sadd.s32 1, %s4542_s13   ;;  %s5853_s9 = smov %s4530_s10 }
 0x870   : > { %p9_p10 = scmp.ge.s32.totalorder %s12_s13, 4   ;;  %s5854_s10 = smov %s4598_s17 }
 0x871   : > { %s5855_s11 = smov %s4538_s12  ;;  %s5856_s12 = smov %s5858_s14 }
 0x872   :  { %11 = sbr.rel (!%p9_p10) target bundleno = 3 (0x3), region = 97 }

</bundles_post_ra>
